<compile_context>
chip_gen: v6e
topology: v6e:2x2x1
jax: 0.10.0
libtpu: 0.0.40
codegen_flags: <defaults>
</compile_context>

<pallas_src>
import math
import jax
import jax.numpy as jnp
from jax.experimental import pallas as pl
from jax.experimental.pallas import tpu as pltpu

D_MODEL = 64
NHEAD = 4
HEAD_DIM = D_MODEL // NHEAD
DIM_FF = 2048          # PyTorch TransformerEncoderLayer default dim_feedforward
NUM_LAYERS = 2
LN_EPS = 1e-5          # PyTorch LayerNorm default eps


# ---------------------------------------------------------------------------
# Fused kernel (one grid step == one batch element)
# ---------------------------------------------------------------------------
def _layer_norm(y, gamma, beta):
    # y: (S, D) f32, gamma/beta: (1, D) f32; biased variance (PyTorch semantics)
    mu = jnp.mean(y, axis=-1, keepdims=True)
    var = jnp.mean(jnp.square(y - mu), axis=-1, keepdims=True)
    return (y - mu) * jax.lax.rsqrt(var + LN_EPS) * gamma + beta


def _fused_transformer_kernel(
    src_ref,                    # (1, S, Din)        f32
    emb_w_ref, emb_b_ref,       # (Din, D) f32, (1, D) f32
    in_w_ref, in_b_ref,         # (L, D, 3D) bf16, (L, 1, 3D) f32  (q-scale folded)
    out_w_ref, out_b_ref,       # (L, D, D)  bf16, (L, 1, D)  f32
    lin1_w_ref, lin1_b_ref,     # (L, D, FF) bf16, (L, 1, FF) f32
    lin2_w_ref, lin2_b_ref,     # (L, FF, D) bf16, (L, 1, D)  f32
    ln1_g_ref, ln1_b_ref,       # (L, 1, D) f32
    ln2_g_ref, ln2_b_ref,       # (L, 1, D) f32
    fc_w_ref, fc_b_ref,         # (1, D) f32, (1, 1) f32
    o_ref,                      # (1, 1, 1) f32
):
    S = src_ref.shape[1]

    # ---- embedding: (S, Din) @ (Din, D) + b   (tiny K=4, keep f32) ----
    x = jnp.dot(src_ref[0], emb_w_ref[...],
                preferred_element_type=jnp.float32) + emb_b_ref[...]

    # ---- transformer encoder layers (post-norm, ReLU FFN, dropout = identity) ----
    for l in range(NUM_LAYERS):
        # QKV projection; 1/sqrt(head_dim) already folded into the q columns.
        qkv = jnp.dot(x.astype(jnp.bfloat16), in_w_ref[l],
                      preferred_element_type=jnp.float32) + in_b_ref[l]   # (S, 3D)

        # Per-head attention via static 16-lane slices; all math in f32.
        heads = []
        for h in range(NHEAD):
            q_h = qkv[:, h * HEAD_DIM:(h + 1) * HEAD_DIM]
            k_h = qkv[:, D_MODEL + h * HEAD_DIM:D_MODEL + (h + 1) * HEAD_DIM]
            v_h = qkv[:, 2 * D_MODEL + h * HEAD_DIM:2 * D_MODEL + (h + 1) * HEAD_DIM]
            s = jnp.einsum('qd,kd->qk', q_h, k_h,
                           preferred_element_type=jnp.float32)            # (S, S)
            s = s - jnp.max(s, axis=-1, keepdims=True)
            p = jnp.exp(s)
            p = p * pl.reciprocal(jnp.sum(p, axis=-1, keepdims=True), approx=True)
            heads.append(jnp.dot(p, v_h, preferred_element_type=jnp.float32))
        ao = jnp.concatenate(heads, axis=-1)                              # (S, D)

        # Attention output projection.
        ao = jnp.dot(ao.astype(jnp.bfloat16), out_w_ref[l],
                     preferred_element_type=jnp.float32) + out_b_ref[l]

        # norm1(x + attn)
        x = _layer_norm(x + ao, ln1_g_ref[l], ln1_b_ref[l])

        # Feed-forward: ReLU(x W1 + b1) W2 + b2   (bf16 MXU operands, f32 acc)
        h1 = jnp.dot(x.astype(jnp.bfloat16), lin1_w_ref[l],
                     preferred_element_type=jnp.float32) + lin1_b_ref[l]
        h1 = jnp.maximum(h1, 0.0)
        ff = jnp.dot(h1.astype(jnp.bfloat16), lin2_w_ref[l],
                     preferred_element_type=jnp.float32) + lin2_b_ref[l]

        # norm2(x + ffn)
        x = _layer_norm(x + ff, ln2_g_ref[l], ln2_b_ref[l])

    # ---- head on the last timestep: fc(x[-1]) done in the epilogue ----
    last = x[S - 1:S, :]                                                  # (1, D)
    out = jnp.sum(last * fc_w_ref[...], axis=-1, keepdims=True) + fc_b_ref[...]
    o_ref[...] = out.reshape(1, 1, 1)


# ---------------------------------------------------------------------------
# Parameters (deterministic synthetic init; weights pre-transposed to (in,out),
# matmul weights stored in bf16, attention scale folded into q projection)
# ---------------------------------------------------------------------------
def init_params(key, input_dim):
    scale_q = 1.0 / math.sqrt(HEAD_DIM)

    def nrm(k, shape, scale=0.02):
        return scale * jax.random.normal(k, shape, jnp.float32)

    keys = jax.random.split(key, 4 + NUM_LAYERS)
    emb_w = nrm(keys[0], (D_MODEL, input_dim))          # PyTorch layout (out, in)
    emb_b = nrm(keys[1], (D_MODEL,))
    fc_w = nrm(keys[2], (1, D_MODEL))
    fc_b = nrm(keys[3], (1,))

    in_w, in_b, out_w, out_b = [], [], [], []
    l1_w, l1_b, l2_w, l2_b = [], [], [], []
    ln1g, ln1b, ln2g, ln2b = [], [], [], []
    for l in range(NUM_LAYERS):
        lk = jax.random.split(keys[4 + l], 8)
        ipw = nrm(lk[0], (3 * D_MODEL, D_MODEL))        # PyTorch (3E, E)
        ipb = nrm(lk[1], (3 * D_MODEL,))
        # Fold 1/sqrt(head_dim) into the q rows of the in-projection.
        ipw = ipw.at[:D_MODEL].multiply(scale_q)
        ipb = ipb.at[:D_MODEL].multiply(scale_q)
        in_w.append(ipw.T.astype(jnp.bfloat16))                        # (E, 3E)
        in_b.append(ipb.reshape(1, -1))
        out_w.append(nrm(lk[2], (D_MODEL, D_MODEL)).T.astype(jnp.bfloat16))
        out_b.append(nrm(lk[3], (D_MODEL,)).reshape(1, -1))
        l1_w.append(nrm(lk[4], (DIM_FF, D_MODEL)).T.astype(jnp.bfloat16))
        l1_b.append(nrm(lk[5], (DIM_FF,)).reshape(1, -1))
        l2_w.append(nrm(lk[6], (D_MODEL, DIM_FF)).T.astype(jnp.bfloat16))
        l2_b.append(nrm(lk[7], (D_MODEL,)).reshape(1, -1))
        ln1g.append(jnp.ones((1, D_MODEL), jnp.float32))
        ln1b.append(jnp.zeros((1, D_MODEL), jnp.float32))
        ln2g.append(jnp.ones((1, D_MODEL), jnp.float32))
        ln2b.append(jnp.zeros((1, D_MODEL), jnp.float32))

    stack = lambda xs: jnp.stack(xs, axis=0)
    return {
        'emb_w': emb_w.T,                 # (Din, E) f32, pre-transposed
        'emb_b': emb_b.reshape(1, -1),    # (1, E)  f32
        'fc_w': fc_w,                     # (1, E)  f32 (used as a row vector)
        'fc_b': fc_b.reshape(1, 1),       # (1, 1)  f32
        'in_proj_w': stack(in_w), 'in_proj_b': stack(in_b),
        'out_proj_w': stack(out_w), 'out_proj_b': stack(out_b),
        'lin1_w': stack(l1_w), 'lin1_b': stack(l1_b),
        'lin2_w': stack(l2_w), 'lin2_b': stack(l2_b),
        'ln1_g': stack(ln1g), 'ln1_b': stack(ln1b),
        'ln2_g': stack(ln2g), 'ln2_b': stack(ln2b),
    }


# ---------------------------------------------------------------------------
# Forward pass: one fused pallas_call, gridded over the batch dimension
# ---------------------------------------------------------------------------
def stock_price_transformer(params, src):
    # src: (S, N, input_dim), sequence-first like PyTorch batch_first=False.
    S, N, Din = src.shape
    src_nb = jnp.transpose(src, (1, 0, 2))            # (N, S, Din) batch-major
    L = NUM_LAYERS

    def full(shape):
        return pl.BlockSpec(shape, lambda n, _k=len(shape): (0,) * _k)

    out = pl.pallas_call(
        _fused_transformer_kernel,
        out_shape=jax.ShapeDtypeStruct((N, 1, 1), jnp.float32),
        grid=(N,),
        in_specs=[
            pl.BlockSpec((1, S, Din), lambda n: (n, 0, 0)),        # src (per batch)
            full((Din, D_MODEL)), full((1, D_MODEL)),              # embedding
            full((L, D_MODEL, 3 * D_MODEL)), full((L, 1, 3 * D_MODEL)),
            full((L, D_MODEL, D_MODEL)), full((L, 1, D_MODEL)),
            full((L, D_MODEL, DIM_FF)), full((L, 1, DIM_FF)),
            full((L, DIM_FF, D_MODEL)), full((L, 1, D_MODEL)),
            full((L, 1, D_MODEL)), full((L, 1, D_MODEL)),          # ln1 gamma/beta
            full((L, 1, D_MODEL)), full((L, 1, D_MODEL)),          # ln2 gamma/beta
            full((1, D_MODEL)), full((1, 1)),                      # fc head
        ],
        out_specs=pl.BlockSpec((1, 1, 1), lambda n: (n, 0, 0)),
        compiler_params=pltpu.CompilerParams(
            dimension_semantics=("parallel",)),                    # v7x: 2 TCs
    )(
        src_nb,
        params['emb_w'], params['emb_b'],
        params['in_proj_w'], params['in_proj_b'],
        params['out_proj_w'], params['out_proj_b'],
        params['lin1_w'], params['lin1_b'],
        params['lin2_w'], params['lin2_b'],
        params['ln1_g'], params['ln1_b'],
        params['ln2_g'], params['ln2_b'],
        params['fc_w'], params['fc_b'],
    )
    return out.reshape(N, 1)


if __name__ == "__main__":
    key = jax.random.PRNGKey(0)
    pkey, xkey = jax.random.split(key)

    input_dim = 4
    S, N = 8, 2                       # seq_len=8, batch=2
    params = init_params(pkey, input_dim)
    src = jax.random.normal(xkey, (S, N, input_dim), jnp.float32)

    out = jax.jit(stock_price_transformer)(params, src)
    out = jax.block_until_ready(out)
    assert out.shape == (N, 1) and out.dtype == jnp.float32
    print("KERNEL_OK")
</pallas_src>

<mosaic_0001>
module attributes {stable_mosaic.version = 11 : i64} {
  func.func @_fused_transformer_kernel(%arg0: i32, %arg1: memref<1x8x4xf32, #tpu.memory_space<vmem>>, %arg2: memref<4x64xf32, #tpu.memory_space<vmem>>, %arg3: memref<1x64xf32, #tpu.memory_space<vmem>>, %arg4: memref<2x64x192xbf16, #tpu.memory_space<vmem>>, %arg5: memref<2x1x192xf32, #tpu.memory_space<vmem>>, %arg6: memref<2x64x64xbf16, #tpu.memory_space<vmem>>, %arg7: memref<2x1x64xf32, #tpu.memory_space<vmem>>, %arg8: memref<2x64x2048xbf16, #tpu.memory_space<vmem>>, %arg9: memref<2x1x2048xf32, #tpu.memory_space<vmem>>, %arg10: memref<2x2048x64xbf16, #tpu.memory_space<vmem>>, %arg11: memref<2x1x64xf32, #tpu.memory_space<vmem>>, %arg12: memref<2x1x64xf32, #tpu.memory_space<vmem>>, %arg13: memref<2x1x64xf32, #tpu.memory_space<vmem>>, %arg14: memref<2x1x64xf32, #tpu.memory_space<vmem>>, %arg15: memref<2x1x64xf32, #tpu.memory_space<vmem>>, %arg16: memref<1x64xf32, #tpu.memory_space<vmem>>, %arg17: memref<1x1xf32, #tpu.memory_space<vmem>>, %arg18: memref<1x1x1xf32, #tpu.memory_space<vmem>>) attributes {dimension_semantics = [#tpu.dimension_semantics<parallel>], iteration_bounds = array<i64: 2>, scalar_prefetch = 0 : i64, scratch_operands = 0 : i64, tpu.core_type = #tpu.core_type<tc>, window_params = [{transform_indices = @transform_0, window_bounds = array<i64: 1, 8, 4>}, {pipeline_mode = #tpu.pipeline_mode<synchronous>, transform_indices = @transform_1, window_bounds = array<i64: 4, 64>}, {pipeline_mode = #tpu.pipeline_mode<synchronous>, transform_indices = @transform_2, window_bounds = array<i64: 1, 64>}, {pipeline_mode = #tpu.pipeline_mode<synchronous>, transform_indices = @transform_3, window_bounds = array<i64: 2, 64, 192>}, {pipeline_mode = #tpu.pipeline_mode<synchronous>, transform_indices = @transform_4, window_bounds = array<i64: 2, 1, 192>}, {pipeline_mode = #tpu.pipeline_mode<synchronous>, transform_indices = @transform_5, window_bounds = array<i64: 2, 64, 64>}, {pipeline_mode = #tpu.pipeline_mode<synchronous>, transform_indices = @transform_6, window_bounds = array<i64: 2, 1, 64>}, {pipeline_mode = #tpu.pipeline_mode<synchronous>, transform_indices = @transform_7, window_bounds = array<i64: 2, 64, 2048>}, {pipeline_mode = #tpu.pipeline_mode<synchronous>, transform_indices = @transform_8, window_bounds = array<i64: 2, 1, 2048>}, {pipeline_mode = #tpu.pipeline_mode<synchronous>, transform_indices = @transform_9, window_bounds = array<i64: 2, 2048, 64>}, {pipeline_mode = #tpu.pipeline_mode<synchronous>, transform_indices = @transform_10, window_bounds = array<i64: 2, 1, 64>}, {pipeline_mode = #tpu.pipeline_mode<synchronous>, transform_indices = @transform_11, window_bounds = array<i64: 2, 1, 64>}, {pipeline_mode = #tpu.pipeline_mode<synchronous>, transform_indices = @transform_12, window_bounds = array<i64: 2, 1, 64>}, {pipeline_mode = #tpu.pipeline_mode<synchronous>, transform_indices = @transform_13, window_bounds = array<i64: 2, 1, 64>}, {pipeline_mode = #tpu.pipeline_mode<synchronous>, transform_indices = @transform_14, window_bounds = array<i64: 2, 1, 64>}, {pipeline_mode = #tpu.pipeline_mode<synchronous>, transform_indices = @transform_15, window_bounds = array<i64: 1, 64>}, {pipeline_mode = #tpu.pipeline_mode<synchronous>, transform_indices = @transform_16, window_bounds = array<i64: 1, 1>}, {transform_indices = @transform_17, window_bounds = array<i64: 1, 1, 1>}]} {
    %c0 = arith.constant 0 : index
    %c0_0 = arith.constant 0 : index
    %c0_1 = arith.constant 0 : index
    %0 = vector.load %arg1[%c0, %c0_0, %c0_1] : memref<1x8x4xf32, #tpu.memory_space<vmem>>, vector<1x8x4xf32>
    %1 = vector.shape_cast %0 : vector<1x8x4xf32> to vector<8x4xf32>
    %c0_2 = arith.constant 0 : index
    %c0_3 = arith.constant 0 : index
    %2 = vector.load %arg2[%c0_2, %c0_3] : memref<4x64xf32, #tpu.memory_space<vmem>>, vector<4x64xf32>
    %cst = arith.constant dense<0.000000e+00> : vector<8x64xf32>
    %3 = tpu.matmul %1, %2, %cst {dimension_numbers = #tpu.dot_dimension_numbers<[1], [0], [0], [1], [0, 0, 1, 1], [], []>} : vector<8x4xf32>, vector<4x64xf32>, vector<8x64xf32> -> vector<8x64xf32>
    %c0_4 = arith.constant 0 : index
    %c0_5 = arith.constant 0 : index
    %4 = vector.load %arg3[%c0_4, %c0_5] : memref<1x64xf32, #tpu.memory_space<vmem>>, vector<1x64xf32>
    %5 = vector.broadcast %4 : vector<1x64xf32> to vector<8x64xf32>
    %6 = arith.addf %3, %5 : vector<8x64xf32>
    %7 = arith.truncf %6 : vector<8x64xf32> to vector<8x64xbf16>
    %c0_6 = arith.constant 0 : index
    %c0_7 = arith.constant 0 : index
    %c0_8 = arith.constant 0 : index
    %8 = vector.load %arg4[%c0_6, %c0_7, %c0_8] : memref<2x64x192xbf16, #tpu.memory_space<vmem>>, vector<1x64x192xbf16>
    %9 = vector.shape_cast %8 : vector<1x64x192xbf16> to vector<64x192xbf16>
    %cst_9 = arith.constant dense<0.000000e+00> : vector<8x192xf32>
    %10 = tpu.matmul %7, %9, %cst_9 {dimension_numbers = #tpu.dot_dimension_numbers<[1], [0], [0], [1], [0, 0, 1, 1], [], []>} : vector<8x64xbf16>, vector<64x192xbf16>, vector<8x192xf32> -> vector<8x192xf32>
    %c0_10 = arith.constant 0 : index
    %c0_11 = arith.constant 0 : index
    %c0_12 = arith.constant 0 : index
    %11 = vector.load %arg5[%c0_10, %c0_11, %c0_12] : memref<2x1x192xf32, #tpu.memory_space<vmem>>, vector<1x1x192xf32>
    %12 = vector.shape_cast %11 : vector<1x1x192xf32> to vector<1x192xf32>
    %13 = vector.broadcast %12 : vector<1x192xf32> to vector<8x192xf32>
    %14 = arith.addf %10, %13 : vector<8x192xf32>
    %15 = vector.extract_strided_slice %14 {offsets = [0, 0], sizes = [8, 16], strides = [1, 1]} : vector<8x192xf32> to vector<8x16xf32>
    %16 = vector.extract_strided_slice %14 {offsets = [0, 64], sizes = [8, 16], strides = [1, 1]} : vector<8x192xf32> to vector<8x16xf32>
    %17 = vector.extract_strided_slice %14 {offsets = [0, 128], sizes = [8, 16], strides = [1, 1]} : vector<8x192xf32> to vector<8x16xf32>
    "tpu.trace_start"() <{level = 10 : i32, message = "qd,kd->qk"}> : () -> ()
    %cst_13 = arith.constant dense<0.000000e+00> : vector<8x8xf32>
    %18 = tpu.matmul %15, %16, %cst_13 {dimension_numbers = #tpu.dot_dimension_numbers<[1], [1], [0], [0], [0, 0, 1, 0], [], []>} : vector<8x16xf32>, vector<8x16xf32>, vector<8x8xf32> -> vector<8x8xf32>
    "tpu.trace_stop"() : () -> ()
    %cst_14 = arith.constant dense<0xFF800000> : vector<8xf32>
    %19 = vector.multi_reduction <maximumf>, %18, %cst_14 [1] : vector<8x8xf32> to vector<8xf32>
    %20 = vector.shape_cast %19 : vector<8xf32> to vector<8x1xf32>
    %21 = vector.broadcast %20 : vector<8x1xf32> to vector<8x8xf32>
    %22 = arith.subf %18, %21 : vector<8x8xf32>
    %23 = math.exp %22 : vector<8x8xf32>
    %cst_15 = arith.constant dense<0.000000e+00> : vector<8xf32>
    %24 = vector.multi_reduction <add>, %23, %cst_15 [1] : vector<8x8xf32> to vector<8xf32>
    %25 = vector.shape_cast %24 : vector<8xf32> to vector<8x1xf32>
    %26 = tpu.reciprocal %25 {approx = true} : vector<8x1xf32> -> vector<8x1xf32>
    %27 = vector.broadcast %26 : vector<8x1xf32> to vector<8x8xf32>
    %28 = arith.mulf %23, %27 : vector<8x8xf32>
    %cst_16 = arith.constant dense<0.000000e+00> : vector<8x16xf32>
    %29 = tpu.matmul %28, %17, %cst_16 {dimension_numbers = #tpu.dot_dimension_numbers<[1], [0], [0], [1], [0, 0, 1, 1], [], []>} : vector<8x8xf32>, vector<8x16xf32>, vector<8x16xf32> -> vector<8x16xf32>
    %30 = vector.extract_strided_slice %14 {offsets = [0, 16], sizes = [8, 16], strides = [1, 1]} : vector<8x192xf32> to vector<8x16xf32>
    %31 = vector.extract_strided_slice %14 {offsets = [0, 80], sizes = [8, 16], strides = [1, 1]} : vector<8x192xf32> to vector<8x16xf32>
    %32 = vector.extract_strided_slice %14 {offsets = [0, 144], sizes = [8, 16], strides = [1, 1]} : vector<8x192xf32> to vector<8x16xf32>
    "tpu.trace_start"() <{level = 10 : i32, message = "qd,kd->qk"}> : () -> ()
    %cst_17 = arith.constant dense<0.000000e+00> : vector<8x8xf32>
    %33 = tpu.matmul %30, %31, %cst_17 {dimension_numbers = #tpu.dot_dimension_numbers<[1], [1], [0], [0], [0, 0, 1, 0], [], []>} : vector<8x16xf32>, vector<8x16xf32>, vector<8x8xf32> -> vector<8x8xf32>
    "tpu.trace_stop"() : () -> ()
    %cst_18 = arith.constant dense<0xFF800000> : vector<8xf32>
    %34 = vector.multi_reduction <maximumf>, %33, %cst_18 [1] : vector<8x8xf32> to vector<8xf32>
    %35 = vector.shape_cast %34 : vector<8xf32> to vector<8x1xf32>
    %36 = vector.broadcast %35 : vector<8x1xf32> to vector<8x8xf32>
    %37 = arith.subf %33, %36 : vector<8x8xf32>
    %38 = math.exp %37 : vector<8x8xf32>
    %cst_19 = arith.constant dense<0.000000e+00> : vector<8xf32>
    %39 = vector.multi_reduction <add>, %38, %cst_19 [1] : vector<8x8xf32> to vector<8xf32>
    %40 = vector.shape_cast %39 : vector<8xf32> to vector<8x1xf32>
    %41 = tpu.reciprocal %40 {approx = true} : vector<8x1xf32> -> vector<8x1xf32>
    %42 = vector.broadcast %41 : vector<8x1xf32> to vector<8x8xf32>
    %43 = arith.mulf %38, %42 : vector<8x8xf32>
    %cst_20 = arith.constant dense<0.000000e+00> : vector<8x16xf32>
    %44 = tpu.matmul %43, %32, %cst_20 {dimension_numbers = #tpu.dot_dimension_numbers<[1], [0], [0], [1], [0, 0, 1, 1], [], []>} : vector<8x8xf32>, vector<8x16xf32>, vector<8x16xf32> -> vector<8x16xf32>
    %45 = vector.extract_strided_slice %14 {offsets = [0, 32], sizes = [8, 16], strides = [1, 1]} : vector<8x192xf32> to vector<8x16xf32>
    %46 = vector.extract_strided_slice %14 {offsets = [0, 96], sizes = [8, 16], strides = [1, 1]} : vector<8x192xf32> to vector<8x16xf32>
    %47 = vector.extract_strided_slice %14 {offsets = [0, 160], sizes = [8, 16], strides = [1, 1]} : vector<8x192xf32> to vector<8x16xf32>
    "tpu.trace_start"() <{level = 10 : i32, message = "qd,kd->qk"}> : () -> ()
    %cst_21 = arith.constant dense<0.000000e+00> : vector<8x8xf32>
    %48 = tpu.matmul %45, %46, %cst_21 {dimension_numbers = #tpu.dot_dimension_numbers<[1], [1], [0], [0], [0, 0, 1, 0], [], []>} : vector<8x16xf32>, vector<8x16xf32>, vector<8x8xf32> -> vector<8x8xf32>
    "tpu.trace_stop"() : () -> ()
    %cst_22 = arith.constant dense<0xFF800000> : vector<8xf32>
    %49 = vector.multi_reduction <maximumf>, %48, %cst_22 [1] : vector<8x8xf32> to vector<8xf32>
    %50 = vector.shape_cast %49 : vector<8xf32> to vector<8x1xf32>
    %51 = vector.broadcast %50 : vector<8x1xf32> to vector<8x8xf32>
    %52 = arith.subf %48, %51 : vector<8x8xf32>
    %53 = math.exp %52 : vector<8x8xf32>
    %cst_23 = arith.constant dense<0.000000e+00> : vector<8xf32>
    %54 = vector.multi_reduction <add>, %53, %cst_23 [1] : vector<8x8xf32> to vector<8xf32>
    %55 = vector.shape_cast %54 : vector<8xf32> to vector<8x1xf32>
    %56 = tpu.reciprocal %55 {approx = true} : vector<8x1xf32> -> vector<8x1xf32>
    %57 = vector.broadcast %56 : vector<8x1xf32> to vector<8x8xf32>
    %58 = arith.mulf %53, %57 : vector<8x8xf32>
    %cst_24 = arith.constant dense<0.000000e+00> : vector<8x16xf32>
    %59 = tpu.matmul %58, %47, %cst_24 {dimension_numbers = #tpu.dot_dimension_numbers<[1], [0], [0], [1], [0, 0, 1, 1], [], []>} : vector<8x8xf32>, vector<8x16xf32>, vector<8x16xf32> -> vector<8x16xf32>
    %60 = vector.extract_strided_slice %14 {offsets = [0, 48], sizes = [8, 16], strides = [1, 1]} : vector<8x192xf32> to vector<8x16xf32>
    %61 = vector.extract_strided_slice %14 {offsets = [0, 112], sizes = [8, 16], strides = [1, 1]} : vector<8x192xf32> to vector<8x16xf32>
    %62 = vector.extract_strided_slice %14 {offsets = [0, 176], sizes = [8, 16], strides = [1, 1]} : vector<8x192xf32> to vector<8x16xf32>
    "tpu.trace_start"() <{level = 10 : i32, message = "qd,kd->qk"}> : () -> ()
    %cst_25 = arith.constant dense<0.000000e+00> : vector<8x8xf32>
    %63 = tpu.matmul %60, %61, %cst_25 {dimension_numbers = #tpu.dot_dimension_numbers<[1], [1], [0], [0], [0, 0, 1, 0], [], []>} : vector<8x16xf32>, vector<8x16xf32>, vector<8x8xf32> -> vector<8x8xf32>
    "tpu.trace_stop"() : () -> ()
    %cst_26 = arith.constant dense<0xFF800000> : vector<8xf32>
    %64 = vector.multi_reduction <maximumf>, %63, %cst_26 [1] : vector<8x8xf32> to vector<8xf32>
    %65 = vector.shape_cast %64 : vector<8xf32> to vector<8x1xf32>
    %66 = vector.broadcast %65 : vector<8x1xf32> to vector<8x8xf32>
    %67 = arith.subf %63, %66 : vector<8x8xf32>
    %68 = math.exp %67 : vector<8x8xf32>
    %cst_27 = arith.constant dense<0.000000e+00> : vector<8xf32>
    %69 = vector.multi_reduction <add>, %68, %cst_27 [1] : vector<8x8xf32> to vector<8xf32>
    %70 = vector.shape_cast %69 : vector<8xf32> to vector<8x1xf32>
    %71 = tpu.reciprocal %70 {approx = true} : vector<8x1xf32> -> vector<8x1xf32>
    %72 = vector.broadcast %71 : vector<8x1xf32> to vector<8x8xf32>
    %73 = arith.mulf %68, %72 : vector<8x8xf32>
    %cst_28 = arith.constant dense<0.000000e+00> : vector<8x16xf32>
    %74 = tpu.matmul %73, %62, %cst_28 {dimension_numbers = #tpu.dot_dimension_numbers<[1], [0], [0], [1], [0, 0, 1, 1], [], []>} : vector<8x8xf32>, vector<8x16xf32>, vector<8x16xf32> -> vector<8x16xf32>
    %75 = tpu.concatenate %29, %44, %59, %74 in 1 : vector<8x16xf32>, vector<8x16xf32>, vector<8x16xf32>, vector<8x16xf32> -> vector<8x64xf32>
    %76 = arith.truncf %75 : vector<8x64xf32> to vector<8x64xbf16>
    %c0_29 = arith.constant 0 : index
    %c0_30 = arith.constant 0 : index
    %c0_31 = arith.constant 0 : index
    %77 = vector.load %arg6[%c0_29, %c0_30, %c0_31] : memref<2x64x64xbf16, #tpu.memory_space<vmem>>, vector<1x64x64xbf16>
    %78 = vector.shape_cast %77 : vector<1x64x64xbf16> to vector<64x64xbf16>
    %cst_32 = arith.constant dense<0.000000e+00> : vector<8x64xf32>
    %79 = tpu.matmul %76, %78, %cst_32 {dimension_numbers = #tpu.dot_dimension_numbers<[1], [0], [0], [1], [0, 0, 1, 1], [], []>} : vector<8x64xbf16>, vector<64x64xbf16>, vector<8x64xf32> -> vector<8x64xf32>
    %c0_33 = arith.constant 0 : index
    %c0_34 = arith.constant 0 : index
    %c0_35 = arith.constant 0 : index
    %80 = vector.load %arg7[%c0_33, %c0_34, %c0_35] : memref<2x1x64xf32, #tpu.memory_space<vmem>>, vector<1x1x64xf32>
    %81 = vector.shape_cast %80 : vector<1x1x64xf32> to vector<1x64xf32>
    %82 = vector.broadcast %81 : vector<1x64xf32> to vector<8x64xf32>
    %83 = arith.addf %79, %82 : vector<8x64xf32>
    %84 = arith.addf %6, %83 : vector<8x64xf32>
    %c0_36 = arith.constant 0 : index
    %c0_37 = arith.constant 0 : index
    %c0_38 = arith.constant 0 : index
    %85 = vector.load %arg12[%c0_36, %c0_37, %c0_38] : memref<2x1x64xf32, #tpu.memory_space<vmem>>, vector<1x1x64xf32>
    %86 = vector.shape_cast %85 : vector<1x1x64xf32> to vector<1x64xf32>
    %c0_39 = arith.constant 0 : index
    %c0_40 = arith.constant 0 : index
    %c0_41 = arith.constant 0 : index
    %87 = vector.load %arg13[%c0_39, %c0_40, %c0_41] : memref<2x1x64xf32, #tpu.memory_space<vmem>>, vector<1x1x64xf32>
    %88 = vector.shape_cast %87 : vector<1x1x64xf32> to vector<1x64xf32>
    %cst_42 = arith.constant dense<0.000000e+00> : vector<8xf32>
    %89 = vector.multi_reduction <add>, %84, %cst_42 [1] : vector<8x64xf32> to vector<8xf32>
    %90 = vector.shape_cast %89 : vector<8xf32> to vector<8x1xf32>
    %cst_43 = arith.constant 6.400000e+01 : f32
    %91 = vector.broadcast %cst_43 : f32 to vector<8x1xf32>
    %92 = arith.divf %90, %91 : vector<8x1xf32>
    %93 = vector.broadcast %92 : vector<8x1xf32> to vector<8x64xf32>
    %94 = arith.subf %84, %93 : vector<8x64xf32>
    %95 = arith.mulf %94, %94 : vector<8x64xf32>
    %cst_44 = arith.constant dense<0.000000e+00> : vector<8xf32>
    %96 = vector.multi_reduction <add>, %95, %cst_44 [1] : vector<8x64xf32> to vector<8xf32>
    %97 = vector.shape_cast %96 : vector<8xf32> to vector<8x1xf32>
    %cst_45 = arith.constant 6.400000e+01 : f32
    %98 = vector.broadcast %cst_45 : f32 to vector<8x1xf32>
    %99 = arith.divf %97, %98 : vector<8x1xf32>
    %100 = vector.broadcast %92 : vector<8x1xf32> to vector<8x64xf32>
    %101 = arith.subf %84, %100 : vector<8x64xf32>
    %cst_46 = arith.constant 9.99999974E-6 : f32
    %102 = vector.broadcast %cst_46 : f32 to vector<8x1xf32>
    %103 = arith.addf %99, %102 : vector<8x1xf32>
    %104 = math.rsqrt %103 : vector<8x1xf32>
    %105 = vector.broadcast %104 : vector<8x1xf32> to vector<8x64xf32>
    %106 = arith.mulf %101, %105 : vector<8x64xf32>
    %107 = vector.broadcast %86 : vector<1x64xf32> to vector<8x64xf32>
    %108 = arith.mulf %106, %107 : vector<8x64xf32>
    %109 = vector.broadcast %88 : vector<1x64xf32> to vector<8x64xf32>
    %110 = arith.addf %108, %109 : vector<8x64xf32>
    %111 = arith.truncf %110 : vector<8x64xf32> to vector<8x64xbf16>
    %c0_47 = arith.constant 0 : index
    %c0_48 = arith.constant 0 : index
    %c0_49 = arith.constant 0 : index
    %112 = vector.load %arg8[%c0_47, %c0_48, %c0_49] : memref<2x64x2048xbf16, #tpu.memory_space<vmem>>, vector<1x64x2048xbf16>
    %113 = vector.shape_cast %112 : vector<1x64x2048xbf16> to vector<64x2048xbf16>
    %cst_50 = arith.constant dense<0.000000e+00> : vector<8x2048xf32>
    %114 = tpu.matmul %111, %113, %cst_50 {dimension_numbers = #tpu.dot_dimension_numbers<[1], [0], [0], [1], [0, 0, 1, 1], [], []>} : vector<8x64xbf16>, vector<64x2048xbf16>, vector<8x2048xf32> -> vector<8x2048xf32>
    %c0_51 = arith.constant 0 : index
    %c0_52 = arith.constant 0 : index
    %c0_53 = arith.constant 0 : index
    %115 = vector.load %arg9[%c0_51, %c0_52, %c0_53] : memref<2x1x2048xf32, #tpu.memory_space<vmem>>, vector<1x1x2048xf32>
    %116 = vector.shape_cast %115 : vector<1x1x2048xf32> to vector<1x2048xf32>
    %117 = vector.broadcast %116 : vector<1x2048xf32> to vector<8x2048xf32>
    %118 = arith.addf %114, %117 : vector<8x2048xf32>
    %cst_54 = arith.constant 0.000000e+00 : f32
    %119 = vector.broadcast %cst_54 : f32 to vector<8x2048xf32>
    %120 = arith.maximumf %118, %119 : vector<8x2048xf32>
    %121 = arith.truncf %120 : vector<8x2048xf32> to vector<8x2048xbf16>
    %c0_55 = arith.constant 0 : index
    %c0_56 = arith.constant 0 : index
    %c0_57 = arith.constant 0 : index
    %122 = vector.load %arg10[%c0_55, %c0_56, %c0_57] : memref<2x2048x64xbf16, #tpu.memory_space<vmem>>, vector<1x2048x64xbf16>
    %123 = vector.shape_cast %122 : vector<1x2048x64xbf16> to vector<2048x64xbf16>
    %cst_58 = arith.constant dense<0.000000e+00> : vector<8x64xf32>
    %124 = tpu.matmul %121, %123, %cst_58 {dimension_numbers = #tpu.dot_dimension_numbers<[1], [0], [0], [1], [0, 0, 1, 1], [], []>} : vector<8x2048xbf16>, vector<2048x64xbf16>, vector<8x64xf32> -> vector<8x64xf32>
    %c0_59 = arith.constant 0 : index
    %c0_60 = arith.constant 0 : index
    %c0_61 = arith.constant 0 : index
    %125 = vector.load %arg11[%c0_59, %c0_60, %c0_61] : memref<2x1x64xf32, #tpu.memory_space<vmem>>, vector<1x1x64xf32>
    %126 = vector.shape_cast %125 : vector<1x1x64xf32> to vector<1x64xf32>
    %127 = vector.broadcast %126 : vector<1x64xf32> to vector<8x64xf32>
    %128 = arith.addf %124, %127 : vector<8x64xf32>
    %129 = arith.addf %110, %128 : vector<8x64xf32>
    %c0_62 = arith.constant 0 : index
    %c0_63 = arith.constant 0 : index
    %c0_64 = arith.constant 0 : index
    %130 = vector.load %arg14[%c0_62, %c0_63, %c0_64] : memref<2x1x64xf32, #tpu.memory_space<vmem>>, vector<1x1x64xf32>
    %131 = vector.shape_cast %130 : vector<1x1x64xf32> to vector<1x64xf32>
    %c0_65 = arith.constant 0 : index
    %c0_66 = arith.constant 0 : index
    %c0_67 = arith.constant 0 : index
    %132 = vector.load %arg15[%c0_65, %c0_66, %c0_67] : memref<2x1x64xf32, #tpu.memory_space<vmem>>, vector<1x1x64xf32>
    %133 = vector.shape_cast %132 : vector<1x1x64xf32> to vector<1x64xf32>
    %cst_68 = arith.constant dense<0.000000e+00> : vector<8xf32>
    %134 = vector.multi_reduction <add>, %129, %cst_68 [1] : vector<8x64xf32> to vector<8xf32>
    %135 = vector.shape_cast %134 : vector<8xf32> to vector<8x1xf32>
    %cst_69 = arith.constant 6.400000e+01 : f32
    %136 = vector.broadcast %cst_69 : f32 to vector<8x1xf32>
    %137 = arith.divf %135, %136 : vector<8x1xf32>
    %138 = vector.broadcast %137 : vector<8x1xf32> to vector<8x64xf32>
    %139 = arith.subf %129, %138 : vector<8x64xf32>
    %140 = arith.mulf %139, %139 : vector<8x64xf32>
    %cst_70 = arith.constant dense<0.000000e+00> : vector<8xf32>
    %141 = vector.multi_reduction <add>, %140, %cst_70 [1] : vector<8x64xf32> to vector<8xf32>
    %142 = vector.shape_cast %141 : vector<8xf32> to vector<8x1xf32>
    %cst_71 = arith.constant 6.400000e+01 : f32
    %143 = vector.broadcast %cst_71 : f32 to vector<8x1xf32>
    %144 = arith.divf %142, %143 : vector<8x1xf32>
    %145 = vector.broadcast %137 : vector<8x1xf32> to vector<8x64xf32>
    %146 = arith.subf %129, %145 : vector<8x64xf32>
    %cst_72 = arith.constant 9.99999974E-6 : f32
    %147 = vector.broadcast %cst_72 : f32 to vector<8x1xf32>
    %148 = arith.addf %144, %147 : vector<8x1xf32>
    %149 = math.rsqrt %148 : vector<8x1xf32>
    %150 = vector.broadcast %149 : vector<8x1xf32> to vector<8x64xf32>
    %151 = arith.mulf %146, %150 : vector<8x64xf32>
    %152 = vector.broadcast %131 : vector<1x64xf32> to vector<8x64xf32>
    %153 = arith.mulf %151, %152 : vector<8x64xf32>
    %154 = vector.broadcast %133 : vector<1x64xf32> to vector<8x64xf32>
    %155 = arith.addf %153, %154 : vector<8x64xf32>
    %156 = arith.truncf %155 : vector<8x64xf32> to vector<8x64xbf16>
    %c1 = arith.constant 1 : index
    %c0_73 = arith.constant 0 : index
    %c0_74 = arith.constant 0 : index
    %157 = vector.load %arg4[%c1, %c0_73, %c0_74] : memref<2x64x192xbf16, #tpu.memory_space<vmem>>, vector<1x64x192xbf16>
    %158 = vector.shape_cast %157 : vector<1x64x192xbf16> to vector<64x192xbf16>
    %cst_75 = arith.constant dense<0.000000e+00> : vector<8x192xf32>
    %159 = tpu.matmul %156, %158, %cst_75 {dimension_numbers = #tpu.dot_dimension_numbers<[1], [0], [0], [1], [0, 0, 1, 1], [], []>} : vector<8x64xbf16>, vector<64x192xbf16>, vector<8x192xf32> -> vector<8x192xf32>
    %c1_76 = arith.constant 1 : index
    %c0_77 = arith.constant 0 : index
    %c0_78 = arith.constant 0 : index
    %160 = vector.load %arg5[%c1_76, %c0_77, %c0_78] : memref<2x1x192xf32, #tpu.memory_space<vmem>>, vector<1x1x192xf32>
    %161 = vector.shape_cast %160 : vector<1x1x192xf32> to vector<1x192xf32>
    %162 = vector.broadcast %161 : vector<1x192xf32> to vector<8x192xf32>
    %163 = arith.addf %159, %162 : vector<8x192xf32>
    %164 = vector.extract_strided_slice %163 {offsets = [0, 0], sizes = [8, 16], strides = [1, 1]} : vector<8x192xf32> to vector<8x16xf32>
    %165 = vector.extract_strided_slice %163 {offsets = [0, 64], sizes = [8, 16], strides = [1, 1]} : vector<8x192xf32> to vector<8x16xf32>
    %166 = vector.extract_strided_slice %163 {offsets = [0, 128], sizes = [8, 16], strides = [1, 1]} : vector<8x192xf32> to vector<8x16xf32>
    "tpu.trace_start"() <{level = 10 : i32, message = "qd,kd->qk"}> : () -> ()
    %cst_79 = arith.constant dense<0.000000e+00> : vector<8x8xf32>
    %167 = tpu.matmul %164, %165, %cst_79 {dimension_numbers = #tpu.dot_dimension_numbers<[1], [1], [0], [0], [0, 0, 1, 0], [], []>} : vector<8x16xf32>, vector<8x16xf32>, vector<8x8xf32> -> vector<8x8xf32>
    "tpu.trace_stop"() : () -> ()
    %cst_80 = arith.constant dense<0xFF800000> : vector<8xf32>
    %168 = vector.multi_reduction <maximumf>, %167, %cst_80 [1] : vector<8x8xf32> to vector<8xf32>
    %169 = vector.shape_cast %168 : vector<8xf32> to vector<8x1xf32>
    %170 = vector.broadcast %169 : vector<8x1xf32> to vector<8x8xf32>
    %171 = arith.subf %167, %170 : vector<8x8xf32>
    %172 = math.exp %171 : vector<8x8xf32>
    %cst_81 = arith.constant dense<0.000000e+00> : vector<8xf32>
    %173 = vector.multi_reduction <add>, %172, %cst_81 [1] : vector<8x8xf32> to vector<8xf32>
    %174 = vector.shape_cast %173 : vector<8xf32> to vector<8x1xf32>
    %175 = tpu.reciprocal %174 {approx = true} : vector<8x1xf32> -> vector<8x1xf32>
    %176 = vector.broadcast %175 : vector<8x1xf32> to vector<8x8xf32>
    %177 = arith.mulf %172, %176 : vector<8x8xf32>
    %cst_82 = arith.constant dense<0.000000e+00> : vector<8x16xf32>
    %178 = tpu.matmul %177, %166, %cst_82 {dimension_numbers = #tpu.dot_dimension_numbers<[1], [0], [0], [1], [0, 0, 1, 1], [], []>} : vector<8x8xf32>, vector<8x16xf32>, vector<8x16xf32> -> vector<8x16xf32>
    %179 = vector.extract_strided_slice %163 {offsets = [0, 16], sizes = [8, 16], strides = [1, 1]} : vector<8x192xf32> to vector<8x16xf32>
    %180 = vector.extract_strided_slice %163 {offsets = [0, 80], sizes = [8, 16], strides = [1, 1]} : vector<8x192xf32> to vector<8x16xf32>
    %181 = vector.extract_strided_slice %163 {offsets = [0, 144], sizes = [8, 16], strides = [1, 1]} : vector<8x192xf32> to vector<8x16xf32>
    "tpu.trace_start"() <{level = 10 : i32, message = "qd,kd->qk"}> : () -> ()
    %cst_83 = arith.constant dense<0.000000e+00> : vector<8x8xf32>
    %182 = tpu.matmul %179, %180, %cst_83 {dimension_numbers = #tpu.dot_dimension_numbers<[1], [1], [0], [0], [0, 0, 1, 0], [], []>} : vector<8x16xf32>, vector<8x16xf32>, vector<8x8xf32> -> vector<8x8xf32>
    "tpu.trace_stop"() : () -> ()
    %cst_84 = arith.constant dense<0xFF800000> : vector<8xf32>
    %183 = vector.multi_reduction <maximumf>, %182, %cst_84 [1] : vector<8x8xf32> to vector<8xf32>
    %184 = vector.shape_cast %183 : vector<8xf32> to vector<8x1xf32>
    %185 = vector.broadcast %184 : vector<8x1xf32> to vector<8x8xf32>
    %186 = arith.subf %182, %185 : vector<8x8xf32>
    %187 = math.exp %186 : vector<8x8xf32>
    %cst_85 = arith.constant dense<0.000000e+00> : vector<8xf32>
    %188 = vector.multi_reduction <add>, %187, %cst_85 [1] : vector<8x8xf32> to vector<8xf32>
    %189 = vector.shape_cast %188 : vector<8xf32> to vector<8x1xf32>
    %190 = tpu.reciprocal %189 {approx = true} : vector<8x1xf32> -> vector<8x1xf32>
    %191 = vector.broadcast %190 : vector<8x1xf32> to vector<8x8xf32>
    %192 = arith.mulf %187, %191 : vector<8x8xf32>
    %cst_86 = arith.constant dense<0.000000e+00> : vector<8x16xf32>
    %193 = tpu.matmul %192, %181, %cst_86 {dimension_numbers = #tpu.dot_dimension_numbers<[1], [0], [0], [1], [0, 0, 1, 1], [], []>} : vector<8x8xf32>, vector<8x16xf32>, vector<8x16xf32> -> vector<8x16xf32>
    %194 = vector.extract_strided_slice %163 {offsets = [0, 32], sizes = [8, 16], strides = [1, 1]} : vector<8x192xf32> to vector<8x16xf32>
    %195 = vector.extract_strided_slice %163 {offsets = [0, 96], sizes = [8, 16], strides = [1, 1]} : vector<8x192xf32> to vector<8x16xf32>
    %196 = vector.extract_strided_slice %163 {offsets = [0, 160], sizes = [8, 16], strides = [1, 1]} : vector<8x192xf32> to vector<8x16xf32>
    "tpu.trace_start"() <{level = 10 : i32, message = "qd,kd->qk"}> : () -> ()
    %cst_87 = arith.constant dense<0.000000e+00> : vector<8x8xf32>
    %197 = tpu.matmul %194, %195, %cst_87 {dimension_numbers = #tpu.dot_dimension_numbers<[1], [1], [0], [0], [0, 0, 1, 0], [], []>} : vector<8x16xf32>, vector<8x16xf32>, vector<8x8xf32> -> vector<8x8xf32>
    "tpu.trace_stop"() : () -> ()
    %cst_88 = arith.constant dense<0xFF800000> : vector<8xf32>
    %198 = vector.multi_reduction <maximumf>, %197, %cst_88 [1] : vector<8x8xf32> to vector<8xf32>
    %199 = vector.shape_cast %198 : vector<8xf32> to vector<8x1xf32>
    %200 = vector.broadcast %199 : vector<8x1xf32> to vector<8x8xf32>
    %201 = arith.subf %197, %200 : vector<8x8xf32>
    %202 = math.exp %201 : vector<8x8xf32>
    %cst_89 = arith.constant dense<0.000000e+00> : vector<8xf32>
    %203 = vector.multi_reduction <add>, %202, %cst_89 [1] : vector<8x8xf32> to vector<8xf32>
    %204 = vector.shape_cast %203 : vector<8xf32> to vector<8x1xf32>
    %205 = tpu.reciprocal %204 {approx = true} : vector<8x1xf32> -> vector<8x1xf32>
    %206 = vector.broadcast %205 : vector<8x1xf32> to vector<8x8xf32>
    %207 = arith.mulf %202, %206 : vector<8x8xf32>
    %cst_90 = arith.constant dense<0.000000e+00> : vector<8x16xf32>
    %208 = tpu.matmul %207, %196, %cst_90 {dimension_numbers = #tpu.dot_dimension_numbers<[1], [0], [0], [1], [0, 0, 1, 1], [], []>} : vector<8x8xf32>, vector<8x16xf32>, vector<8x16xf32> -> vector<8x16xf32>
    %209 = vector.extract_strided_slice %163 {offsets = [0, 48], sizes = [8, 16], strides = [1, 1]} : vector<8x192xf32> to vector<8x16xf32>
    %210 = vector.extract_strided_slice %163 {offsets = [0, 112], sizes = [8, 16], strides = [1, 1]} : vector<8x192xf32> to vector<8x16xf32>
    %211 = vector.extract_strided_slice %163 {offsets = [0, 176], sizes = [8, 16], strides = [1, 1]} : vector<8x192xf32> to vector<8x16xf32>
    "tpu.trace_start"() <{level = 10 : i32, message = "qd,kd->qk"}> : () -> ()
    %cst_91 = arith.constant dense<0.000000e+00> : vector<8x8xf32>
    %212 = tpu.matmul %209, %210, %cst_91 {dimension_numbers = #tpu.dot_dimension_numbers<[1], [1], [0], [0], [0, 0, 1, 0], [], []>} : vector<8x16xf32>, vector<8x16xf32>, vector<8x8xf32> -> vector<8x8xf32>
    "tpu.trace_stop"() : () -> ()
    %cst_92 = arith.constant dense<0xFF800000> : vector<8xf32>
    %213 = vector.multi_reduction <maximumf>, %212, %cst_92 [1] : vector<8x8xf32> to vector<8xf32>
    %214 = vector.shape_cast %213 : vector<8xf32> to vector<8x1xf32>
    %215 = vector.broadcast %214 : vector<8x1xf32> to vector<8x8xf32>
    %216 = arith.subf %212, %215 : vector<8x8xf32>
    %217 = math.exp %216 : vector<8x8xf32>
    %cst_93 = arith.constant dense<0.000000e+00> : vector<8xf32>
    %218 = vector.multi_reduction <add>, %217, %cst_93 [1] : vector<8x8xf32> to vector<8xf32>
    %219 = vector.shape_cast %218 : vector<8xf32> to vector<8x1xf32>
    %220 = tpu.reciprocal %219 {approx = true} : vector<8x1xf32> -> vector<8x1xf32>
    %221 = vector.broadcast %220 : vector<8x1xf32> to vector<8x8xf32>
    %222 = arith.mulf %217, %221 : vector<8x8xf32>
    %cst_94 = arith.constant dense<0.000000e+00> : vector<8x16xf32>
    %223 = tpu.matmul %222, %211, %cst_94 {dimension_numbers = #tpu.dot_dimension_numbers<[1], [0], [0], [1], [0, 0, 1, 1], [], []>} : vector<8x8xf32>, vector<8x16xf32>, vector<8x16xf32> -> vector<8x16xf32>
    %224 = tpu.concatenate %178, %193, %208, %223 in 1 : vector<8x16xf32>, vector<8x16xf32>, vector<8x16xf32>, vector<8x16xf32> -> vector<8x64xf32>
    %225 = arith.truncf %224 : vector<8x64xf32> to vector<8x64xbf16>
    %c1_95 = arith.constant 1 : index
    %c0_96 = arith.constant 0 : index
    %c0_97 = arith.constant 0 : index
    %226 = vector.load %arg6[%c1_95, %c0_96, %c0_97] : memref<2x64x64xbf16, #tpu.memory_space<vmem>>, vector<1x64x64xbf16>
    %227 = vector.shape_cast %226 : vector<1x64x64xbf16> to vector<64x64xbf16>
    %cst_98 = arith.constant dense<0.000000e+00> : vector<8x64xf32>
    %228 = tpu.matmul %225, %227, %cst_98 {dimension_numbers = #tpu.dot_dimension_numbers<[1], [0], [0], [1], [0, 0, 1, 1], [], []>} : vector<8x64xbf16>, vector<64x64xbf16>, vector<8x64xf32> -> vector<8x64xf32>
    %c1_99 = arith.constant 1 : index
    %c0_100 = arith.constant 0 : index
    %c0_101 = arith.constant 0 : index
    %229 = vector.load %arg7[%c1_99, %c0_100, %c0_101] : memref<2x1x64xf32, #tpu.memory_space<vmem>>, vector<1x1x64xf32>
    %230 = vector.shape_cast %229 : vector<1x1x64xf32> to vector<1x64xf32>
    %231 = vector.broadcast %230 : vector<1x64xf32> to vector<8x64xf32>
    %232 = arith.addf %228, %231 : vector<8x64xf32>
    %233 = arith.addf %155, %232 : vector<8x64xf32>
    %c1_102 = arith.constant 1 : index
    %c0_103 = arith.constant 0 : index
    %c0_104 = arith.constant 0 : index
    %234 = vector.load %arg12[%c1_102, %c0_103, %c0_104] : memref<2x1x64xf32, #tpu.memory_space<vmem>>, vector<1x1x64xf32>
    %235 = vector.shape_cast %234 : vector<1x1x64xf32> to vector<1x64xf32>
    %c1_105 = arith.constant 1 : index
    %c0_106 = arith.constant 0 : index
    %c0_107 = arith.constant 0 : index
    %236 = vector.load %arg13[%c1_105, %c0_106, %c0_107] : memref<2x1x64xf32, #tpu.memory_space<vmem>>, vector<1x1x64xf32>
    %237 = vector.shape_cast %236 : vector<1x1x64xf32> to vector<1x64xf32>
    %cst_108 = arith.constant dense<0.000000e+00> : vector<8xf32>
    %238 = vector.multi_reduction <add>, %233, %cst_108 [1] : vector<8x64xf32> to vector<8xf32>
    %239 = vector.shape_cast %238 : vector<8xf32> to vector<8x1xf32>
    %cst_109 = arith.constant 6.400000e+01 : f32
    %240 = vector.broadcast %cst_109 : f32 to vector<8x1xf32>
    %241 = arith.divf %239, %240 : vector<8x1xf32>
    %242 = vector.broadcast %241 : vector<8x1xf32> to vector<8x64xf32>
    %243 = arith.subf %233, %242 : vector<8x64xf32>
    %244 = arith.mulf %243, %243 : vector<8x64xf32>
    %cst_110 = arith.constant dense<0.000000e+00> : vector<8xf32>
    %245 = vector.multi_reduction <add>, %244, %cst_110 [1] : vector<8x64xf32> to vector<8xf32>
    %246 = vector.shape_cast %245 : vector<8xf32> to vector<8x1xf32>
    %cst_111 = arith.constant 6.400000e+01 : f32
    %247 = vector.broadcast %cst_111 : f32 to vector<8x1xf32>
    %248 = arith.divf %246, %247 : vector<8x1xf32>
    %249 = vector.broadcast %241 : vector<8x1xf32> to vector<8x64xf32>
    %250 = arith.subf %233, %249 : vector<8x64xf32>
    %cst_112 = arith.constant 9.99999974E-6 : f32
    %251 = vector.broadcast %cst_112 : f32 to vector<8x1xf32>
    %252 = arith.addf %248, %251 : vector<8x1xf32>
    %253 = math.rsqrt %252 : vector<8x1xf32>
    %254 = vector.broadcast %253 : vector<8x1xf32> to vector<8x64xf32>
    %255 = arith.mulf %250, %254 : vector<8x64xf32>
    %256 = vector.broadcast %235 : vector<1x64xf32> to vector<8x64xf32>
    %257 = arith.mulf %255, %256 : vector<8x64xf32>
    %258 = vector.broadcast %237 : vector<1x64xf32> to vector<8x64xf32>
    %259 = arith.addf %257, %258 : vector<8x64xf32>
    %260 = arith.truncf %259 : vector<8x64xf32> to vector<8x64xbf16>
    %c1_113 = arith.constant 1 : index
    %c0_114 = arith.constant 0 : index
    %c0_115 = arith.constant 0 : index
    %261 = vector.load %arg8[%c1_113, %c0_114, %c0_115] : memref<2x64x2048xbf16, #tpu.memory_space<vmem>>, vector<1x64x2048xbf16>
    %262 = vector.shape_cast %261 : vector<1x64x2048xbf16> to vector<64x2048xbf16>
    %cst_116 = arith.constant dense<0.000000e+00> : vector<8x2048xf32>
    %263 = tpu.matmul %260, %262, %cst_116 {dimension_numbers = #tpu.dot_dimension_numbers<[1], [0], [0], [1], [0, 0, 1, 1], [], []>} : vector<8x64xbf16>, vector<64x2048xbf16>, vector<8x2048xf32> -> vector<8x2048xf32>
    %c1_117 = arith.constant 1 : index
    %c0_118 = arith.constant 0 : index
    %c0_119 = arith.constant 0 : index
    %264 = vector.load %arg9[%c1_117, %c0_118, %c0_119] : memref<2x1x2048xf32, #tpu.memory_space<vmem>>, vector<1x1x2048xf32>
    %265 = vector.shape_cast %264 : vector<1x1x2048xf32> to vector<1x2048xf32>
    %266 = vector.broadcast %265 : vector<1x2048xf32> to vector<8x2048xf32>
    %267 = arith.addf %263, %266 : vector<8x2048xf32>
    %cst_120 = arith.constant 0.000000e+00 : f32
    %268 = vector.broadcast %cst_120 : f32 to vector<8x2048xf32>
    %269 = arith.maximumf %267, %268 : vector<8x2048xf32>
    %270 = arith.truncf %269 : vector<8x2048xf32> to vector<8x2048xbf16>
    %c1_121 = arith.constant 1 : index
    %c0_122 = arith.constant 0 : index
    %c0_123 = arith.constant 0 : index
    %271 = vector.load %arg10[%c1_121, %c0_122, %c0_123] : memref<2x2048x64xbf16, #tpu.memory_space<vmem>>, vector<1x2048x64xbf16>
    %272 = vector.shape_cast %271 : vector<1x2048x64xbf16> to vector<2048x64xbf16>
    %cst_124 = arith.constant dense<0.000000e+00> : vector<8x64xf32>
    %273 = tpu.matmul %270, %272, %cst_124 {dimension_numbers = #tpu.dot_dimension_numbers<[1], [0], [0], [1], [0, 0, 1, 1], [], []>} : vector<8x2048xbf16>, vector<2048x64xbf16>, vector<8x64xf32> -> vector<8x64xf32>
    %c1_125 = arith.constant 1 : index
    %c0_126 = arith.constant 0 : index
    %c0_127 = arith.constant 0 : index
    %274 = vector.load %arg11[%c1_125, %c0_126, %c0_127] : memref<2x1x64xf32, #tpu.memory_space<vmem>>, vector<1x1x64xf32>
    %275 = vector.shape_cast %274 : vector<1x1x64xf32> to vector<1x64xf32>
    %276 = vector.broadcast %275 : vector<1x64xf32> to vector<8x64xf32>
    %277 = arith.addf %273, %276 : vector<8x64xf32>
    %278 = arith.addf %259, %277 : vector<8x64xf32>
    %c1_128 = arith.constant 1 : index
    %c0_129 = arith.constant 0 : index
    %c0_130 = arith.constant 0 : index
    %279 = vector.load %arg14[%c1_128, %c0_129, %c0_130] : memref<2x1x64xf32, #tpu.memory_space<vmem>>, vector<1x1x64xf32>
    %280 = vector.shape_cast %279 : vector<1x1x64xf32> to vector<1x64xf32>
    %c1_131 = arith.constant 1 : index
    %c0_132 = arith.constant 0 : index
    %c0_133 = arith.constant 0 : index
    %281 = vector.load %arg15[%c1_131, %c0_132, %c0_133] : memref<2x1x64xf32, #tpu.memory_space<vmem>>, vector<1x1x64xf32>
    %282 = vector.shape_cast %281 : vector<1x1x64xf32> to vector<1x64xf32>
    %cst_134 = arith.constant dense<0.000000e+00> : vector<8xf32>
    %283 = vector.multi_reduction <add>, %278, %cst_134 [1] : vector<8x64xf32> to vector<8xf32>
    %284 = vector.shape_cast %283 : vector<8xf32> to vector<8x1xf32>
    %cst_135 = arith.constant 6.400000e+01 : f32
    %285 = vector.broadcast %cst_135 : f32 to vector<8x1xf32>
    %286 = arith.divf %284, %285 : vector<8x1xf32>
    %287 = vector.broadcast %286 : vector<8x1xf32> to vector<8x64xf32>
    %288 = arith.subf %278, %287 : vector<8x64xf32>
    %289 = arith.mulf %288, %288 : vector<8x64xf32>
    %cst_136 = arith.constant dense<0.000000e+00> : vector<8xf32>
    %290 = vector.multi_reduction <add>, %289, %cst_136 [1] : vector<8x64xf32> to vector<8xf32>
    %291 = vector.shape_cast %290 : vector<8xf32> to vector<8x1xf32>
    %cst_137 = arith.constant 6.400000e+01 : f32
    %292 = vector.broadcast %cst_137 : f32 to vector<8x1xf32>
    %293 = arith.divf %291, %292 : vector<8x1xf32>
    %294 = vector.broadcast %286 : vector<8x1xf32> to vector<8x64xf32>
    %295 = arith.subf %278, %294 : vector<8x64xf32>
    %cst_138 = arith.constant 9.99999974E-6 : f32
    %296 = vector.broadcast %cst_138 : f32 to vector<8x1xf32>
    %297 = arith.addf %293, %296 : vector<8x1xf32>
    %298 = math.rsqrt %297 : vector<8x1xf32>
    %299 = vector.broadcast %298 : vector<8x1xf32> to vector<8x64xf32>
    %300 = arith.mulf %295, %299 : vector<8x64xf32>
    %301 = vector.broadcast %280 : vector<1x64xf32> to vector<8x64xf32>
    %302 = arith.mulf %300, %301 : vector<8x64xf32>
    %303 = vector.broadcast %282 : vector<1x64xf32> to vector<8x64xf32>
    %304 = arith.addf %302, %303 : vector<8x64xf32>
    %305 = vector.extract_strided_slice %304 {offsets = [7, 0], sizes = [1, 64], strides = [1, 1]} : vector<8x64xf32> to vector<1x64xf32>
    %c0_139 = arith.constant 0 : index
    %c0_140 = arith.constant 0 : index
    %306 = vector.load %arg16[%c0_139, %c0_140] : memref<1x64xf32, #tpu.memory_space<vmem>>, vector<1x64xf32>
    %307 = arith.mulf %305, %306 : vector<1x64xf32>
    %cst_141 = arith.constant dense<0.000000e+00> : vector<1xf32>
    %308 = vector.multi_reduction <add>, %307, %cst_141 [1] : vector<1x64xf32> to vector<1xf32>
    %309 = vector.shape_cast %308 : vector<1xf32> to vector<1x1xf32>
    %c0_142 = arith.constant 0 : index
    %c0_143 = arith.constant 0 : index
    %310 = vector.load %arg17[%c0_142, %c0_143] : memref<1x1xf32, #tpu.memory_space<vmem>>, vector<1x1xf32>
    %311 = arith.addf %309, %310 : vector<1x1xf32>
    %312 = vector.shape_cast %311 : vector<1x1xf32> to vector<1x1x1xf32>
    %c0_144 = arith.constant 0 : index
    %c0_145 = arith.constant 0 : index
    %c0_146 = arith.constant 0 : index
    %313 = vector.load %arg18[%c0_144, %c0_145, %c0_146] : memref<1x1x1xf32, #tpu.memory_space<vmem>>, vector<1x1x1xf32>
    tpu.vector_store %arg18[%c0_144, %c0_145, %c0_146], %312 {strides = array<i32>} : memref<1x1x1xf32, #tpu.memory_space<vmem>>, vector<1x1x1xf32>,
    return
  }
  func.func @transform_0(%arg0: i32) -> (i32, i32, i32) {
    %c0_i32 = arith.constant 0 : i32
    %c0_i32_0 = arith.constant 0 : i32
    %c0_i32_1 = arith.constant 0 : i32
    return %arg0, %c0_i32, %c0_i32_0 : i32, i32, i32
  }
  func.func @transform_1(%arg0: i32) -> (i32, i32) {
    %c0_i32 = arith.constant 0 : i32
    %c0_i32_0 = arith.constant 0 : i32
    %c0_i32_1 = arith.constant 0 : i32
    return %c0_i32, %c0_i32_0 : i32, i32
  }
  func.func @transform_2(%arg0: i32) -> (i32, i32) {
    %c0_i32 = arith.constant 0 : i32
    %c0_i32_0 = arith.constant 0 : i32
    %c0_i32_1 = arith.constant 0 : i32
    return %c0_i32, %c0_i32_0 : i32, i32
  }
  func.func @transform_3(%arg0: i32) -> (i32, i32, i32) {
    %c0_i32 = arith.constant 0 : i32
    %c0_i32_0 = arith.constant 0 : i32
    %c0_i32_1 = arith.constant 0 : i32
    %c0_i32_2 = arith.constant 0 : i32
    return %c0_i32, %c0_i32_0, %c0_i32_1 : i32, i32, i32
  }
  func.func @transform_4(%arg0: i32) -> (i32, i32, i32) {
    %c0_i32 = arith.constant 0 : i32
    %c0_i32_0 = arith.constant 0 : i32
    %c0_i32_1 = arith.constant 0 : i32
    %c0_i32_2 = arith.constant 0 : i32
    return %c0_i32, %c0_i32_0, %c0_i32_1 : i32, i32, i32
  }
  func.func @transform_5(%arg0: i32) -> (i32, i32, i32) {
    %c0_i32 = arith.constant 0 : i32
    %c0_i32_0 = arith.constant 0 : i32
    %c0_i32_1 = arith.constant 0 : i32
    %c0_i32_2 = arith.constant 0 : i32
    return %c0_i32, %c0_i32_0, %c0_i32_1 : i32, i32, i32
  }
  func.func @transform_6(%arg0: i32) -> (i32, i32, i32) {
    %c0_i32 = arith.constant 0 : i32
    %c0_i32_0 = arith.constant 0 : i32
    %c0_i32_1 = arith.constant 0 : i32
    %c0_i32_2 = arith.constant 0 : i32
    return %c0_i32, %c0_i32_0, %c0_i32_1 : i32, i32, i32
  }
  func.func @transform_7(%arg0: i32) -> (i32, i32, i32) {
    %c0_i32 = arith.constant 0 : i32
    %c0_i32_0 = arith.constant 0 : i32
    %c0_i32_1 = arith.constant 0 : i32
    %c0_i32_2 = arith.constant 0 : i32
    return %c0_i32, %c0_i32_0, %c0_i32_1 : i32, i32, i32
  }
  func.func @transform_8(%arg0: i32) -> (i32, i32, i32) {
    %c0_i32 = arith.constant 0 : i32
    %c0_i32_0 = arith.constant 0 : i32
    %c0_i32_1 = arith.constant 0 : i32
    %c0_i32_2 = arith.constant 0 : i32
    return %c0_i32, %c0_i32_0, %c0_i32_1 : i32, i32, i32
  }
  func.func @transform_9(%arg0: i32) -> (i32, i32, i32) {
    %c0_i32 = arith.constant 0 : i32
    %c0_i32_0 = arith.constant 0 : i32
    %c0_i32_1 = arith.constant 0 : i32
    %c0_i32_2 = arith.constant 0 : i32
    return %c0_i32, %c0_i32_0, %c0_i32_1 : i32, i32, i32
  }
  func.func @transform_10(%arg0: i32) -> (i32, i32, i32) {
    %c0_i32 = arith.constant 0 : i32
    %c0_i32_0 = arith.constant 0 : i32
    %c0_i32_1 = arith.constant 0 : i32
    %c0_i32_2 = arith.constant 0 : i32
    return %c0_i32, %c0_i32_0, %c0_i32_1 : i32, i32, i32
  }
  func.func @transform_11(%arg0: i32) -> (i32, i32, i32) {
    %c0_i32 = arith.constant 0 : i32
    %c0_i32_0 = arith.constant 0 : i32
    %c0_i32_1 = arith.constant 0 : i32
    %c0_i32_2 = arith.constant 0 : i32
    return %c0_i32, %c0_i32_0, %c0_i32_1 : i32, i32, i32
  }
  func.func @transform_12(%arg0: i32) -> (i32, i32, i32) {
    %c0_i32 = arith.constant 0 : i32
    %c0_i32_0 = arith.constant 0 : i32
    %c0_i32_1 = arith.constant 0 : i32
    %c0_i32_2 = arith.constant 0 : i32
    return %c0_i32, %c0_i32_0, %c0_i32_1 : i32, i32, i32
  }
  func.func @transform_13(%arg0: i32) -> (i32, i32, i32) {
    %c0_i32 = arith.constant 0 : i32
    %c0_i32_0 = arith.constant 0 : i32
    %c0_i32_1 = arith.constant 0 : i32
    %c0_i32_2 = arith.constant 0 : i32
    return %c0_i32, %c0_i32_0, %c0_i32_1 : i32, i32, i32
  }
  func.func @transform_14(%arg0: i32) -> (i32, i32, i32) {
    %c0_i32 = arith.constant 0 : i32
    %c0_i32_0 = arith.constant 0 : i32
    %c0_i32_1 = arith.constant 0 : i32
    %c0_i32_2 = arith.constant 0 : i32
    return %c0_i32, %c0_i32_0, %c0_i32_1 : i32, i32, i32
  }
  func.func @transform_15(%arg0: i32) -> (i32, i32) {
    %c0_i32 = arith.constant 0 : i32
    %c0_i32_0 = arith.constant 0 : i32
    %c0_i32_1 = arith.constant 0 : i32
    return %c0_i32, %c0_i32_0 : i32, i32
  }
  func.func @transform_16(%arg0: i32) -> (i32, i32) {
    %c0_i32 = arith.constant 0 : i32
    %c0_i32_0 = arith.constant 0 : i32
    %c0_i32_1 = arith.constant 0 : i32
    return %c0_i32, %c0_i32_0 : i32, i32
  }
  func.func @transform_17(%arg0: i32) -> (i32, i32, i32) {
    %c0_i32 = arith.constant 0 : i32
    %c0_i32_0 = arith.constant 0 : i32
    %c0_i32_1 = arith.constant 0 : i32
    return %arg0, %c0_i32, %c0_i32_0 : i32, i32, i32
  }
}

</mosaic_0001>

<bundles_post_ra>
// kernel: stock_price_transformer.1
= control target key start
LH: loop header
LB: loop body
LE: loop exit
PB: predicated region body
PF: predicated region fallthrough
CT: control target
= control target key end

     0   :  { %s8709_s26 = smov 0   ;;  %s10399_s0 = inlined_call_operand.vmem [shape: f32[2,8,4], index: 0, kind: input, shape index: {}]   ;;  %s10400_s1 = inlined_call_operand.vmem [shape: f32[4,64], index: 1, kind: input, shape index: {}]   ;;  %s10401_s2 = inlined_call_operand.vmem [shape: f32[1,64], index: 2, kind: input, shape index: {}]   ;;  %s10402_s3 = inlined_call_operand.vmem [shape: bf16[2,64,192], index: 3, kind: input, shape index: {}]   ;;  %s10403_s4 = inlined_call_operand.vmem [shape: f32[2,1,192], index: 4, kind: input, shape index: {}]   ;;  %s10404_s5 = inlined_call_operand.vmem [shape: bf16[2,64,64], index: 5, kind: input, shape index: {}]   ;;  %s10405_s6 = inlined_call_operand.vmem [shape: f32[2,1,64], index: 6, kind: input, shape index: {}]   ;;  %s10406_s7 = inlined_call_operand.vmem [shape: bf16[2,64,2048], index: 7, kind: input, shape index: {}]   ;;  %s10407_s8 = inlined_call_operand.vmem [shape: f32[2,1,2048], index: 8, kind: input, shape index: {}]   ;;  %s10408_s9 = inlined_call_operand.vmem [shape: bf16[2,2048,64], index: 9, kind: input, shape index: {}]   ;;  %s10409_s10 = inlined_call_operand.vmem [shape: f32[2,1,64], index: 10, kind: input, shape index: {}]   ;;  %s10410_s11 = inlined_call_operand.vmem [shape: f32[2,1,64], index: 11, kind: input, shape index: {}]   ;;  %s10411_s12 = inlined_call_operand.vmem [shape: f32[2,1,64], index: 12, kind: input, shape index: {}]   ;;  %s10412_s13 = inlined_call_operand.vmem [shape: f32[2,1,64], index: 13, kind: input, shape index: {}]   ;;  %s10413_s14 = inlined_call_operand.vmem [shape: f32[2,1,64], index: 14, kind: input, shape index: {}]   ;;  %s10414_s15 = inlined_call_operand.vmem [shape: f32[1,64], index: 15, kind: input, shape index: {}]   ;;  %s10415_s16 = inlined_call_operand.<no memory space> [shape: f32[1,1], index: 16, kind: input, shape index: {}]   ;;  %s10416_s17 = inlined_call_operand.vmem [shape: f32[2,1,1], index: 17, kind: output, shape index: {}]  }
   0x1   :  { %10423 = sst [smem:[#allocation3_spill]] %s10399_s0  ;;  %v22_v0 = vstv %s10415_s16 }
   0x2   :  { %10424 = sst [smem:[#allocation4_spill]] %s10400_s1  ;;  %23 = vst [vmem:[#allocation2] sm:$0x1] %v22_v0 }
   0x3 LB: > { %s6925_s27 = sadd.s32 4294967295, %s8604_s26   ;;  %p6929_p0 = scmp.ge.s32.totalorder %s8604_s26, 1  ;;  %s8604_s26 = sphi %s8709_s26, %s29_s26  }
   0x4   : > { %p488_p1 = scmp.lt.s32.totalorder %s8604_s26, 3 }
   0x6   : > { %p489_p2 = pnand %p6929_p0, %p488_p1 }
   0x7   : > { %s10425_s0 = sld [smem:[#allocation4_spill]] (!%p489_p2)  ;;  %p537_p3 = scmp.lt.s32.totalorder (!%p489_p2), %s6925_s27, 1 }
   0x8   : > { %492 = sbr.rel (%p489_p2) target bundleno = 6329 (0x18b9), region = 88  ;;  %s10426_s22 = sld [smem:[#allocation3_spill]] (!%p489_p2) }
   0x9   : > { %s8609_s28 = smov (!%p489_p2), 48   ;;  %s8610_s29 = smov (!%p489_p2), 64  }
   0xa   : > { %s8612_s16 = smov (!%p489_p2), 96   ;;  %s10419_s30 = smov (!%p489_p2), 32  }
   0xb   : > { %s10417_s19 = smov (!%p489_p2), 16  }
   0xd   : > { %v546_v1 = vld [vmem:[%s10425_s0] sm:$0xf]  ;;  %vm558_vm0 = vcmask 1043456   ;;  %v8606_v2 = vmov 0.0   ;;  %vm8607_vm1 = vmmov 0   ;;  %s10431_s27 = smov (!%p537_p3, %s6925_s27), 1  ;;  %v643_v18 = vlaneseq }
   0xe   : > { %8143 = vmatprep.subr.mxu1 %v8606_v2  ;;  %8145 = vmatprep.mubr.msk.f32.mxu1 %vm8607_vm1, %v8606_v2  ;;  %v8272_v3 = vld [vmem:[%s10402_s3 + $0x34] ss:$8 sps:$4 sm:$0xff]   ;;  %s6930_s18 = sshll.u32 %s10431_s27, 3  ;;  %vm554_vm2 = vcmask 31744   ;;  %v8270_v4 = vld [vmem:[%s10402_s3 + $0x30] ss:$8 sps:$4 sm:$0xff]   ;;  %s543_s24 = scalar_lea.vmem %s10416_s17, %s10431_s27 }
   0xf   : > { %8144 = vmatpush3.msk.msra.mxu1 %vm558_vm0, %v546_v1  ;;  %8153 = vmatprep.subr.mxu0 %v8606_v2  ;;  %s540_s23 = scalar_lea.vmem %s10426_s22, %s6930_s18  ;;  %v8275_v5 = vld [vmem:[%s10402_s3 + $0x24] ss:$8 sps:$4 sm:$0xff]   ;;  %v8273_v7 = vld [vmem:[%s10402_s3 + $0x20] ss:$8 sps:$4 sm:$0xff]   ;;  %v8278_v8 = vld [vmem:[%s10402_s3 + $0x14] ss:$8 sps:$4 sm:$0xff]  }
  0x10   : > { %8155 = vmatprep.mubr.msk.f32.mxu0 %vm8607_vm1, %v8606_v2  ;;  %705 = vmatprep.subr.bf16.mxu1 %v8272_v3  ;;  %v545_v6 = vld [vmem:[%s540_s23] sm:$0xff]  ;;  %v8276_v9 = vld [vmem:[%s10402_s3 + $0x10] ss:$8 sps:$4 sm:$0xff]   ;;  %v8608_v12 = vmov 0   ;;  %vm693_vm3 = vcmask 523264   ;;  %v8768_v19 = vshrl.u32 %v643_v18, 7 }
  0x11   : > { %8146 = vmatmul.mubr.msk.f32.vlgmr.msra.gmra.mxu1 %vm554_vm2, %v545_v6  ;;  %v8281_v10 = vld [vmem:[%s10402_s3 + $0x4] ss:$8 sps:$4 sm:$0xff]   ;;  %v8279_v11 = vld [vmem:[%s10402_s3] ss:$8 sps:$4 sm:$0xff]   ;;  %vm741_vm4 = vcmask 130048   ;;  %vm816_vm5 = vcmask 64512  }
  0x12   : > { %706 = vmatpush1.bf16.msra.mxu1 %v8270_v4  ;;  %729 = vmatprep.mubr.bf16.mxu1 %v8608_v12  ;;  %v6931_v13 = vld [vmem:[%s10401_s2] ss:$0 sm:$0xff]  ;;  %v8771_v20 = vsub.s32 0, %v8768_v19  ;;  %v8777_v22 = vsub.s32 1, %v8768_v19  ;;  %s8611_s0 = smov 112   ;;  %s10421_s18 = smov 80  }
  0x13   : > { %707 = vmatprep.subr.bf16.mxu1 %v8275_v5  ;;  %v641_v21 = vld [vmem:[%s10403_s4] sm:$0x3]  ;;  %vm1410_vm6 = vcmask 261120   ;;  %vm1412_vm7 = vcmask 392192   ;;  %vm6864_vm8 = vcmask 523271   ;;  %vm6876_vm9 = vcmask 7175  }
  0x14   : > { %v646_v23 = vrot.slane %v641_v21, %v8771_v20  ;;  %v650_v24 = vrot.slane %v641_v21, %v8777_v22 }
  0x16   : > { %708 = vmatpush1.bf16.msra.mxu1 %v8273_v7 }
  0x17   : > { %709 = vmatprep.subr.bf16.mxu1 %v8278_v8 }
  0x1a   : > { %710 = vmatpush1.bf16.msra.mxu1 %v8276_v9 }
  0x1b   : > { %711 = vmatprep.subr.bf16.mxu1 %v8281_v10 }
  0x1e   : > { %712 = vmatpush1.bf16.msra.mxu1 %v8279_v11 }
  0x1f   : > { %8148 = vmatprep.subr.mxu1 %v8606_v2 }
  0xd1   : > { %v628_v14 = vpop.f32.mrf.mxu1 }
  0xd2   : > { %v8761_v15 = vadd.f32 %v6931_v13, %v628_v14 }
  0xd3   : > { %v8147_v16 = vpop.f32.mrf.mxu1 }
  0xd4   : > { %v632_v17 = vpack.c.bf16 %v8761_v15, %v8761_v15 }
  0xd6   : > { %6942 = vmatmul.mubr.msk.bf16.vlgmr.msra.gmra.mxu1 %vm693_vm3, %v632_v17 }
  0xd7   : > { %8150 = vmatprep.mubr.msk.f32.mxu1 %vm8607_vm1, %v8606_v2 }
 0x196   : > { %v731_v25 = vpop.f32.mrf.mxu1 }
 0x197   : > { %v8781_v26 = vadd.f32 %v731_v25, %v646_v23 }
 0x198   : > { %v733_v27 = vpop.f32.mrf.mxu1 }
 0x199   : > { %v8783_v28 = vadd.f32 %v733_v27, %v650_v24  ;;  %903 = vrot.lane.b32.xlu1 %v8781_v26, %s8609_s28  ;;  %739 = vrot.lane.b32.xlu0 %v8781_v26, %s8610_s29 }
 0x19a   : > { %v735_v29 = vpop.f32.mrf.mxu1 }
 0x19b   : > { %8154 = vmatpush3.msra.mxu0 %v8783_v28 }
 0x19c   : > { %v736_v30 = vpop.f32.mrf.mxu1  ;;  %8158 = vmatprep.subr.mxu0 %v8606_v2 }
 0x20b   : > { %v740_v31 = vpop.permute.xlu0 %739  ;;  %v904_v40 = vpop.permute.xlu1 %903 }
 0x20c   : > { %8149 = vmatpush3.xpose.msk.msra.mxu1 %vm741_vm4, %v740_v31 }
 0x20d   : > { %8173 = vmatprep.subr.mxu1 %v8606_v2 }
 0x20f   : > { %8151 = vmatmul.mubr.msk.f32.vlgmr.msra.gmra.mxu1 %vm741_vm4, %v8781_v26 }
 0x210   : > { %8175 = vmatprep.mubr.msk.f32.mxu1 %vm8607_vm1, %v8606_v2 }
 0x2cf   : > { %v812_v32 = vpop.f32.mrf.mxu1 }
 0x2d0   : > { %v817_v33 = vsel %vm816_vm5, %v812_v32, -inf }
 0x2d1   : > { %818 = vmax.xlane.f32.xlu0 %v817_v33  ;;  %v8152_v34 = vpop.f32.mrf.mxu1  ;;  %v8284_v33 = vld [vmem:[%s10404_s5 + $0x8] sm:$0xff]  }
 0x2d2   : > { %v8285_v34 = vld [vmem:[%s10404_s5] sm:$0xff]  }
 0x2e7   : > { %991 = vrot.lane.b32.xlu0 %v8783_v28, %s8611_s0 }
 0x35a   : > { %v819_v35 = vpop.xlane.xlu0 %818 }
 0x35b   : > { %v820_v36 = vsub.f32 %v812_v32, %v819_v35  ;;  %v8283_v32 = vld [vmem:[%s10404_s5 + $0x10] sm:$0xff]  }
 0x35d   : > { %v821_v37 = vmul.f32 1.442695, %v820_v36 }
 0x35e   : > { %v992_v45 = vpop.permute.xlu0 %991 }
 0x35f   : > { %8558 = vpow2.f32 %v821_v37 }
 0x36c   : > { %v8559_v38 = vpop.eup %8558 }
 0x36d   : > { %v823_v39 = vsel %vm816_vm5, %v8559_v38, 0.0 }
 0x36e   : > { %824 = vadd.xlane.f32.xlu1 %v823_v39 }
 0x37f   : > { %901 = vrot.lane.b32.xlu1 %v8781_v26, %s8611_s0 }
 0x3f7   : > { %v825_v41 = vpop.xlane.xlu1 %824 }
 0x3f8   : > { %8560 = vrcp.f32 %v825_v41 }
 0x3fb   : > { %v902_v44 = vpop.permute.xlu1 %901 }
 0x405   : > { %v8561_v42 = vpop.eup %8560 }
 0x406   : > { %v827_v43 = vmul.f32 %v8561_v42, %v8559_v38 }
 0x408   : > { %8156 = vmatmul.mubr.msk.f32.vlgmr.msra.gmra.mxu0 %vm816_vm5, %v827_v43 }
 0x409   : > { %8159 = vmatpush3.xpose.msk.msra.mxu0 %vm741_vm4, %v904_v40  ;;  %8160 = vmatprep.mubr.msk.f32.mxu0 %vm8607_vm1, %v8606_v2 }
 0x40a   : > { %8163 = vmatprep.subr.mxu0 %v8606_v2 }
 0x40c   : > { %8161 = vmatmul.mubr.msk.f32.vlgmr.msra.gmra.mxu0 %vm741_vm4, %v902_v44 }
 0x40d   : > { %8164 = vmatpush3.msra.mxu0 %v992_v45  ;;  %8165 = vmatprep.mubr.msk.f32.mxu0 %vm8607_vm1, %v8606_v2 }
 0x40e   : > { %8168 = vmatprep.subr.mxu0 %v8606_v2 }
 0x4c8   : > { %v8812_v46 = vpop.f32.mrf.mxu0 }
 0x4ca   : > { %v8157_v47 = vpop.f32.mrf.mxu0 }
 0x4cb   : > { %v6955_v47 = vld [vmem:[%s10405_s6] ss:$0 sm:$0xff] }
 0x4cc   : > { %v975_v48 = vpop.f32.mrf.mxu0 }
 0x4cd   : > { %v979_v49 = vsel %vm816_vm5, %v975_v48, -inf }
 0x4ce   : > { %980 = vmax.xlane.f32.xlu1 %v979_v49  ;;  %v8162_v50 = vpop.f32.mrf.mxu0 }
 0x4df   : > { %1067 = vrot.lane.b32.xlu1 %v8781_v26, %s8612_s16 }
 0x557   : > { %v981_v51 = vpop.xlane.xlu1 %980 }
 0x558   : > { %v982_v52 = vsub.f32 %v975_v48, %v981_v51 }
 0x55a   : > { %v983_v53 = vmul.f32 1.442695, %v982_v52 }
 0x55b   : > { %v1068_v61 = vpop.permute.xlu1 %1067 }
 0x55c   : > { %8562 = vpow2.f32 %v983_v53 }
 0x569   : > { %v8563_v54 = vpop.eup %8562 }
 0x56a   : > { %v985_v55 = vsel %vm816_vm5, %v8563_v54, 0.0 }
 0x56b   : > { %986 = vadd.xlane.f32.xlu0 %v985_v55 }
 0x581   : > { %1069 = vrot.lane.b32.xlu0 %v8781_v26, %s10419_s30 }
 0x585   : > { %1234 = vrot.lane.b32.xlu0 %v8781_v26, %s10417_s19 }
 0x589   : > { %1232 = vrot.lane.b32.xlu0 %v8781_v26, %s10421_s18 }
 0x5f4   : > { %v987_v56 = vpop.xlane.xlu0 %986 }
 0x5f5   : > { %8564 = vrcp.f32 %v987_v56 }
 0x5f8   : > { %v1070_v57 = vpop.permute.xlu0 %1069 }
 0x5fc   : > { %v1235_v60 = vpop.permute.xlu0 %1234 }
 0x600   : > { %v1233_v62 = vpop.permute.xlu0 %1232 }
 0x602   : > { %v8565_v58 = vpop.eup %8564 }
 0x603   : > { %v989_v59 = vmul.f32 %v8565_v58, %v8563_v54 }
 0x605   : > { %8166 = vmatmul.mubr.msk.f32.vlgmr.msra.gmra.mxu0 %vm816_vm5, %v989_v59  ;;  %v1577_v59 = vld [vmem:[%s10406_s7 + $0x180] sm:$0xff] }
 0x606   : > { %8169 = vmatpush3.xpose.msk.msra.mxu0 %vm741_vm4, %v1070_v57  ;;  %8170 = vmatprep.mubr.msk.f32.mxu0 %vm8607_vm1, %v8606_v2 }
 0x607   : > { %8178 = vmatprep.subr.mxu0 %v8606_v2 }
 0x609   : > { %8171 = vmatmul.mubr.msk.f32.vlgmr.msra.gmra.mxu0 %vm741_vm4, %v1068_v61 }
 0x60a   : > { %8179 = vmatpush3.xpose.msk.msra.mxu0 %vm741_vm4, %v1235_v60  ;;  %8180 = vmatprep.mubr.msk.f32.mxu0 %vm8607_vm1, %v8606_v2  ;;  %v1578_v60 = vld [vmem:[%s10406_s7 + $0x188] sm:$0xff] }
 0x60b   : > { %8188 = vmatprep.subr.bf16.mxu0 %v8606_v2 }
 0x60d   : > { %8181 = vmatmul.mubr.msk.f32.vlgmr.msra.gmra.mxu0 %vm741_vm4, %v1233_v62  ;;  %v1586_v62 = vld [vmem:[%s10406_s7 + $0x1c8] sm:$0xff] }
 0x60e   : > { %8196 = vmatprep.mubr.msk.bf16.mxu0 %vm8607_vm1, %v8606_v2 }
 0x6c5   : > { %v1063_v63 = vpop.f32.mrf.mxu0 }
 0x6c7   : > { %v8167_v0 = vpop.f32.mrf.mxu0 }
 0x6c8   : > { %v7013_v0 = vcombine.low %v1578_v60, %v1586_v62 }
 0x6c9   : > { %v1141_v1 = vpop.f32.mrf.mxu0 }
 0x6ca   : > { %v1145_v3 = vsel %vm816_vm5, %v1141_v1, -inf }
 0x6cb   : > { %1146 = vmax.xlane.f32.xlu0 %v1145_v3  ;;  %v8172_v4 = vpop.f32.mrf.mxu0  ;;  %v1561_v3 = vld [vmem:[%s10406_s7 + $0x100] sm:$0xff] }
 0x6cc   : > { %v1569_v4 = vld [vmem:[%s10406_s7 + $0x140] sm:$0xff] }
 0x6cd   : > { %v1306_v5 = vpop.f32.mrf.mxu0 }
 0x6ce   : > { %v1310_v6 = vsel %vm816_vm5, %v1306_v5, -inf }
 0x6cf   : > { %1311 = vmax.xlane.f32.xlu1 %v1310_v6  ;;  %v8182_v7 = vpop.f32.mrf.mxu0  ;;  %v6996_v6 = vcombine.high %v1561_v3, %v1569_v4 }
 0x6d0   : > { %v1570_v7 = vld [vmem:[%s10406_s7 + $0x148] sm:$0xff] }
 0x6e0   : > { %1321 = vrot.lane.b32.xlu1 %v8783_v28, %s10421_s18  ;;  %s10428_s18 = smov 32  }
 0x6e4   : > { %1398 = vrot.lane.b32.xlu1 %v1063_v63, %s10417_s19  ;;  %s10429_s19 = smov 16  }
 0x754   : > { %v1147_v8 = vpop.xlane.xlu0 %1146 }
 0x755   : > { %v1148_v9 = vsub.f32 %v1141_v1, %v1147_v8  ;;  %v7014_v1 = vcombine.high %v1578_v60, %v1586_v62  ;;  %v6995_v8 = vcombine.low %v1561_v3, %v1569_v4  ;;  %v1540_v3 = vld [vmem:[%s10406_s7 + $0x58] sm:$0xff] }
 0x757   : > { %v1149_v10 = vmul.f32 1.442695, %v1148_v9 }
 0x758   : > { %v1312_v11 = vpop.xlane.xlu1 %1311 }
 0x759   : > { %8566 = vpow2.f32 %v1149_v10  ;;  %v1313_v13 = vsub.f32 %v1306_v5, %v1312_v11  ;;  %v1562_v5 = vld [vmem:[%s10406_s7 + $0x108] sm:$0xff]  ;;  %v1545_v11 = vld [vmem:[%s10406_s7 + $0x80] sm:$0xff] }
 0x75a   : > { %v6997_v9 = vcombine.low %v1562_v5, %v1570_v7  ;;  %v6998_v10 = vcombine.high %v1562_v5, %v1570_v7 }
 0x75b   : > { %v1314_v14 = vmul.f32 1.442695, %v1313_v13  ;;  %v1553_v13 = vld [vmem:[%s10406_s7 + $0xc0] sm:$0xff] }
 0x75c   : > { %v1322_v29 = vpop.permute.xlu1 %1321 }
 0x75d   : > { %8568 = vpow2.f32 %v1314_v14  ;;  %v1546_v14 = vld [vmem:[%s10406_s7 + $0x88] sm:$0xff] }
 0x760   : > { %v1399_v39 = vpop.permute.xlu1 %1398 }
 0x761   : > { %v1409_v41 = vsel %vm741_vm4, %v8812_v46, %v1399_v39 }
 0x766   : > { %v8567_v16 = vpop.eup %8566 }
 0x767   : > { %v1151_v17 = vsel %vm816_vm5, %v8567_v16, 0.0 }
 0x768   : > { %1152 = vadd.xlane.f32.xlu0 %v1151_v17  ;;  %v1554_v17 = vld [vmem:[%s10406_s7 + $0xc8] sm:$0xff] }
 0x76a   : > { %v8569_v18 = vpop.eup %8568 }
 0x76b   : > { %v1316_v21 = vsel %vm816_vm5, %v8569_v18, 0.0 }
 0x76c   : > { %1317 = vadd.xlane.f32.xlu0 %v1316_v21  ;;  %v6981_v21 = vcombine.low %v1546_v14, %v1554_v17 }
 0x782   : > { %1156 = vrot.lane.b32.xlu0 %v8783_v28, %s8612_s16  ;;  %v8282_v28 = vld [vmem:[%s10404_s5 + $0x18] sm:$0xff]  }
 0x783   : > { %8189 = vmatpush3.bf16.msra.mxu0 %v8282_v28 }
 0x784   : > { %8190 = vmatprep.subr.bf16.mxu0 %v8606_v2 }
 0x787   : > { %8191 = vmatpush3.bf16.msra.mxu0 %v8283_v32  ;;  %v1579_v32 = vld [vmem:[%s10406_s7 + $0x190] sm:$0xff] }
 0x788   : > { %8192 = vmatprep.subr.bf16.mxu0 %v8606_v2 }
 0x78b   : > { %8193 = vmatpush3.bf16.msra.mxu0 %v8284_v33  ;;  %v1587_v33 = vld [vmem:[%s10406_s7 + $0x1d0] sm:$0xff] }
 0x78c   : > { %8194 = vmatprep.subr.bf16.mxu0 %v8606_v2 }
 0x78f   : > { %8195 = vmatpush3.bf16.msra.mxu0 %v8285_v34  ;;  %v1580_v34 = vld [vmem:[%s10406_s7 + $0x198] sm:$0xff] }
 0x790   : > { %2049 = vmatprep.subr.bf16.mxu0 %v7014_v1  ;;  %v1532_v1 = vld [vmem:[%s10406_s7 + $0x18] sm:$0xff] }
 0x791   : > { %v6970_v7 = vcombine.high %v1532_v1, %v1540_v3 }
 0x7f1   : > { %v1153_v23 = vpop.xlane.xlu0 %1152 }
 0x7f2   : > { %8570 = vrcp.f32 %v1153_v23  ;;  %v6982_v23 = vcombine.high %v1546_v14, %v1554_v17  ;;  %v6969_v14 = vcombine.low %v1532_v1, %v1540_v3  ;;  %v1560_v1 = vld [vmem:[%s10406_s7 + $0xf8] sm:$0xff] }
 0x7f5   : > { %v1318_v24 = vpop.xlane.xlu0 %1317 }
 0x7f6   : > { %8572 = vrcp.f32 %v1318_v24  ;;  %v1529_v24 = vld [vmem:[%s10406_s7] sm:$0xff] }
 0x7f9   : > { %v1157_v25 = vpop.permute.xlu0 %1156 }
 0x7fa   : > { %8174 = vmatpush3.msra.mxu1 %v1157_v25  ;;  %v1537_v25 = vld [vmem:[%s10406_s7 + $0x40] sm:$0xff] }
 0x7fb   : > { %8183 = vmatprep.subr.mxu1 %v8606_v2 }
 0x7ff   : > { %v8571_v26 = vpop.eup %8570 }
 0x800   : > { %v1155_v27 = vmul.f32 %v8571_v26, %v8567_v16  ;;  %v6980_v16 = vcombine.high %v1545_v11, %v1553_v13  ;;  %v1530_v26 = vld [vmem:[%s10406_s7 + $0x8] sm:$0xff] }
 0x802   : > { %8176 = vmatmul.mubr.msk.f32.vlgmr.msra.gmra.mxu1 %vm816_vm5, %v1155_v27  ;;  %v6964_v27 = vcombine.high %v1529_v24, %v1537_v25 }
 0x803   : > { %v8573_v30 = vpop.eup %8572  ;;  %8184 = vmatpush3.msra.mxu1 %v1322_v29  ;;  %8185 = vmatprep.mubr.msk.f32.mxu1 %vm8607_vm1, %v8606_v2  ;;  %v1538_v29 = vld [vmem:[%s10406_s7 + $0x48] sm:$0xff] }
 0x804   : > { %v1320_v31 = vmul.f32 %v8573_v30, %v8569_v18  ;;  %v6979_v18 = vcombine.low %v1545_v11, %v1553_v13  ;;  %v6963_v30 = vcombine.low %v1529_v24, %v1537_v25  ;;  %v6966_v28 = vcombine.high %v1530_v26, %v1538_v29  ;;  %v1590_v11 = vld [vmem:[%s10406_s7 + $0x1e8] sm:$0xff] }
 0x805   : > { %v1574_v24 = vld [vmem:[%s10406_s7 + $0x168] sm:$0xff] }
 0x806   : > { %8186 = vmatmul.mubr.msk.f32.vlgmr.msra.gmra.mxu1 %vm816_vm5, %v1320_v31  ;;  %v6965_v31 = vcombine.low %v1530_v26, %v1538_v29 }
 0x807   : > { %2032 = vmatprep.mubr.bf16.mxu1 %v8608_v12 }
 0x8c2   : > { %v1228_v35 = vpop.f32.mrf.mxu1 }
 0x8c3   : > { %1402 = vrot.lane.b32.xlu0 %v1228_v35, %s10419_s30  ;;  %v7015_v35 = vcombine.low %v1579_v32, %v1587_v33  ;;  %s10427_s30 = smov 80  }
 0x8c4   : > { %v8177_v36 = vpop.f32.mrf.mxu1 }
 0x8c5   : > { %v7016_v36 = vcombine.high %v1579_v32, %v1587_v33  ;;  %v1558_v32 = vld [vmem:[%s10406_s7 + $0xe8] sm:$0xff] }
 0x8c6   : > { %v1393_v37 = vpop.f32.mrf.mxu1 }
 0x8c7   : > { %1406 = vrot.lane.b32.xlu1 %v1393_v37, %s8609_s28  ;;  %v1588_v37 = vld [vmem:[%s10406_s7 + $0x1d8] sm:$0xff] }
 0x8c8   : > { %v8187_v38 = vpop.f32.mrf.mxu1  ;;  %v7018_v39 = vcombine.high %v1580_v34, %v1588_v37 }
 0x8c9   : > { %v7017_v38 = vcombine.low %v1580_v34, %v1588_v37  ;;  %v1533_v37 = vld [vmem:[%s10406_s7 + $0x20] sm:$0xff] }
 0x935   : > { %v1403_v40 = vpop.permute.xlu0 %1402 }
 0x936   : > { %v1411_v42 = vsel %vm1410_vm6, %v1409_v41, %v1403_v40 }
 0x939   : > { %v1407_v43 = vpop.permute.xlu1 %1406 }
 0x93a   : > { %v1413_v44 = vsel %vm1412_vm7, %v1411_v42, %v1407_v43 }
 0x93b   : > { %v1414_v45 = vpack.c.bf16 %v1413_v44, %v1413_v44  ;;  %v6961_v44 = vld [vmem:[%s10410_s11] ss:$0 sm:$0xff] }
 0x93d   : > { %8197 = vmatmul.mubr.msk.bf16.vlgmr.msra.gmra.mxu0 %vm693_vm3, %v1414_v45 }
 0x93e   : > { %2073 = vmatprep.mubr.bf16.mxu0 %v8608_v12  ;;  %2050 = vmatpush1.bf16.msra.mxu0 %v7013_v0  ;;  %v1539_v0 = vld [vmem:[%s10406_s7 + $0x50] sm:$0xff] }
 0x93f   : > { %2051 = vmatprep.subr.bf16.mxu0 %v6998_v10  ;;  %v1582_v10 = vld [vmem:[%s10406_s7 + $0x1a8] sm:$0xff] }
 0x940   : > { %v7022_v17 = vcombine.high %v1582_v10, %v1590_v11  ;;  %v7021_v26 = vcombine.low %v1582_v10, %v1590_v11  ;;  %v1544_v10 = vld [vmem:[%s10406_s7 + $0x78] sm:$0xff] }
 0x942   : > { %2052 = vmatpush1.bf16.msra.mxu0 %v6997_v9  ;;  %v1589_v9 = vld [vmem:[%s10406_s7 + $0x1e0] sm:$0xff] }
 0x943   : > { %2053 = vmatprep.subr.bf16.mxu0 %v6982_v23  ;;  %v1566_v23 = vld [vmem:[%s10406_s7 + $0x128] sm:$0xff] }
 0x944   : > { %v7006_v29 = vcombine.high %v1566_v23, %v1574_v24  ;;  %v7005_v34 = vcombine.low %v1566_v23, %v1574_v24  ;;  %v8287_v23 = vld [vmem:[%s10408_s9 + $0xf8] sm:$0xff]  }
 0x945   : > { %v8288_v24 = vld [vmem:[%s10408_s9 + $0x38] sm:$0xff]  }
 0x946   : > { %2054 = vmatpush1.bf16.msra.mxu0 %v6981_v21  ;;  %v1573_v21 = vld [vmem:[%s10406_s7 + $0x160] sm:$0xff] }
 0x947   : > { %2055 = vmatprep.subr.bf16.mxu0 %v6966_v28  ;;  %v1550_v28 = vld [vmem:[%s10406_s7 + $0xa8] sm:$0xff] }
 0x94a   : > { %2056 = vmatpush1.bf16.msra.mxu0 %v6965_v31  ;;  %v1557_v31 = vld [vmem:[%s10406_s7 + $0xe0] sm:$0xff] }
 0x94b   : > { %2131 = vmatprep.subr.bf16.mxu0 %v7018_v39  ;;  %v1534_v39 = vld [vmem:[%s10406_s7 + $0x28] sm:$0xff] }
 0x9fd   : > { %v1491_v48 = vpop.f32.mrf.mxu0 }
 0x9fe   : > { %v1492_v49 = vadd.f32 %v6955_v47, %v1491_v48  ;;  %v6962_v47 = vld [vmem:[%s10411_s12] ss:$0 sm:$0xff] }
 0x9ff   : > { %v8198_v50 = vpop.f32.mrf.mxu0 }
 0xa00   : > { %v1497_v51 = vadd.f32 %v1492_v49, %v8761_v15  ;;  %v1585_v15 = vld [vmem:[%s10406_s7 + $0x1c0] sm:$0xff]  ;;  %v1563_v49 = vld [vmem:[%s10406_s7 + $0x110] sm:$0xff] }
 0xa01   : > { %v1494_v46 = vpop.f32.mrf.mxu0  ;;  %v7012_v61 = vcombine.high %v1577_v59, %v1585_v15  ;;  %v7011_v63 = vcombine.low %v1577_v59, %v1585_v15  ;;  %v1571_v50 = vld [vmem:[%s10406_s7 + $0x150] sm:$0xff]  ;;  %v1556_v59 = vld [vmem:[%s10406_s7 + $0xd8] sm:$0xff] }
 0xa02   : > { %v1500_v52 = vsel %vm693_vm3, %v1497_v51, 0.0  ;;  %v1572_v46 = vld [vmem:[%s10406_s7 + $0x158] sm:$0xff]  ;;  %v6999_v15 = vcombine.low %v1563_v49, %v1571_v50 }
 0xa03   : > { %1501 = vadd.xlane.f32.xlu0 %v1500_v52  ;;  %v8199_v53 = vpop.f32.mrf.mxu0  ;;  %2008 = vmatprep.subr.bf16.mxu1 %v7012_v61 }
 0xa04   : > { %2009 = vmatpush1.bf16.msra.mxu1 %v7011_v63  ;;  %v1531_v63 = vld [vmem:[%s10406_s7 + $0x10] sm:$0xff] }
 0xa05   : > { %2010 = vmatprep.subr.bf16.mxu1 %v6996_v6  ;;  %v6968_v6 = vcombine.high %v1531_v63, %v1539_v0  ;;  %v6967_v13 = vcombine.low %v1531_v63, %v1539_v0  ;;  %v1559_v63 = vld [vmem:[%s10406_s7 + $0xf0] sm:$0xff]  ;;  %v1552_v0 = vld [vmem:[%s10406_s7 + $0xb8] sm:$0xff] }
 0xa08   : > { %2011 = vmatpush1.bf16.msra.mxu1 %v6995_v8  ;;  %v1581_v8 = vld [vmem:[%s10406_s7 + $0x1a0] sm:$0xff] }
 0xa09   : > { %2012 = vmatprep.subr.bf16.mxu1 %v6980_v16  ;;  %v7020_v16 = vcombine.high %v1581_v8, %v1589_v9  ;;  %v7019_v25 = vcombine.low %v1581_v8, %v1589_v9  ;;  %v1543_v8 = vld [vmem:[%s10406_s7 + $0x70] sm:$0xff]  ;;  %v1536_v9 = vld [vmem:[%s10406_s7 + $0x38] sm:$0xff] }
 0xa0c   : > { %2013 = vmatpush1.bf16.msra.mxu1 %v6979_v18  ;;  %v1565_v18 = vld [vmem:[%s10406_s7 + $0x120] sm:$0xff] }
 0xa0d   : > { %2014 = vmatprep.subr.bf16.mxu1 %v6964_v27  ;;  %v7004_v27 = vcombine.high %v1565_v18, %v1573_v21  ;;  %v7003_v33 = vcombine.low %v1565_v18, %v1573_v21  ;;  %v6977_v18 = vcombine.low %v1536_v9, %v1544_v10  ;;  %v8286_v21 = vld [vmem:[%s10408_s9 + $0x78] sm:$0xff]  }
 0xa10   : > { %2015 = vmatpush1.bf16.msra.mxu1 %v6963_v30  ;;  %v1549_v30 = vld [vmem:[%s10406_s7 + $0xa0] sm:$0xff] }
 0xa11   : > { %2090 = vmatprep.subr.bf16.mxu1 %v7016_v36  ;;  %v6990_v36 = vcombine.high %v1550_v28, %v1558_v32 }
 0xa8c   : > { %v1502_v54 = vpop.xlane.xlu0 %1501 }
 0xa8d   : > { %v1504_v55 = vmul.f32 0.015625, %v1502_v54  ;;  %v7000_v54 = vcombine.high %v1563_v49, %v1571_v50  ;;  %v1592_v49 = vld [vmem:[%s10406_s7 + $0x1f8] sm:$0xff] }
 0xa8f   : > { %v8880_v56 = vsub.f32 %v1497_v51, %v1504_v55  ;;  %v1564_v51 = vld [vmem:[%s10406_s7 + $0x118] sm:$0xff] }
 0xa90   : > { %v7002_v55 = vcombine.high %v1564_v51, %v1572_v46  ;;  %v7001_v60 = vcombine.low %v1564_v51, %v1572_v46 }
 0xa91   : > { %v1506_v57 = vmul.f32 %v8880_v56, %v8880_v56 }
 0xa93   : > { %v1507_v58 = vsel %vm693_vm3, %v1506_v57, 0.0  ;;  %v1555_v57 = vld [vmem:[%s10406_s7 + $0xd0] sm:$0xff] }
 0xa94   : > { %1508 = vadd.xlane.f32.xlu1 %v1507_v58  ;;  %v1548_v58 = vld [vmem:[%s10406_s7 + $0x98] sm:$0xff] }
 0xa95   : > { %v6986_v62 = vcombine.high %v1548_v58, %v1556_v59  ;;  %v6985_v5 = vcombine.low %v1548_v58, %v1556_v59  ;;  %v1576_v58 = vld [vmem:[%s10406_s7 + $0x178] sm:$0xff] }
 0xb1d   : > { %v1509_v40 = vpop.xlane.xlu1 %1508 }
 0xb1e   : > { %v1510_v41 = vmul.f32 0.015625, %v1509_v40  ;;  %v1542_v40 = vld [vmem:[%s10406_s7 + $0x68] sm:$0xff] }
 0xb1f   : > { %v6973_v51 = vcombine.low %v1534_v39, %v1542_v40 }
 0xb20   : > { %v1511_v42 = vadd.f32 1e-05, %v1510_v41  ;;  %v6987_v41 = vcombine.low %v1549_v30, %v1557_v31 }
 0xb22   : > { %8574 = vrsqrt.f32 %v1511_v42  ;;  %v6989_v42 = vcombine.low %v1550_v28, %v1558_v32  ;;  %v8296_v28 = vld [vmem:[%s10408_s9 + $0x28] sm:$0xff]  }
 0xb23   : > { %v8297_v32 = vld [vmem:[%s10408_s9 + $0xa8] sm:$0xff]  }
 0xb2f   : > { %v8575_v43 = vpop.eup %8574 }
 0xb30   : > { %v1513_v45 = vmul.f32 %v8575_v43, %v8880_v56  ;;  %v1547_v56 = vld [vmem:[%s10406_s7 + $0x90] sm:$0xff] }
 0xb31   : > { %v6984_v61 = vcombine.high %v1547_v56, %v1555_v57  ;;  %v6983_v4 = vcombine.low %v1547_v56, %v1555_v57  ;;  %v1575_v56 = vld [vmem:[%s10406_s7 + $0x170] sm:$0xff]  ;;  %v1568_v57 = vld [vmem:[%s10406_s7 + $0x138] sm:$0xff] }
 0xb32   : > { %v1520_v48 = vmul.f32 %v6961_v44, %v1513_v45  ;;  %v6974_v44 = vcombine.high %v1534_v39, %v1542_v40  ;;  %v1583_v45 = vld [vmem:[%s10406_s7 + $0x1b0] sm:$0xff]  ;;  %v8304_v39 = vld [vmem:[%s10408_s9 + $0x18] sm:$0xff]  }
 0xb33   : > { %v8305_v40 = vld [vmem:[%s10408_s9 + $0x98] sm:$0xff]  }
 0xb34   : > { %v8964_v52 = vadd.f32 %v6962_v47, %v1520_v48  ;;  %v1591_v47 = vld [vmem:[%s10406_s7 + $0x1f0] sm:$0xff]  ;;  %v1584_v48 = vld [vmem:[%s10406_s7 + $0x1b8] sm:$0xff] }
 0xb35   : > { %v7024_v46 = vcombine.high %v1583_v45, %v1591_v47  ;;  %v7023_v59 = vcombine.low %v1583_v45, %v1591_v47  ;;  %v8310_v45 = vld [vmem:[%s10408_s9 + $0x48] sm:$0xff]  }
 0xb36   : > { %v8968_v53 = vpack.c.bf16 %v8964_v52, %v8964_v52  ;;  %v8311_v47 = vld [vmem:[%s10408_s9 + $0xc8] sm:$0xff]  }
 0xb38   : > { %7027 = vmatmul.mubr.msk.bf16.vlgmr.msra.gmra.mxu1 %vm693_vm3, %v8968_v53  ;;  %7028 = vmatmul.mubr.msk.bf16.vlgmr.msra.gmra.mxu0 %vm693_vm3, %v8968_v53 }
 0xb39   : > { %2091 = vmatpush1.bf16.msra.mxu1 %v7015_v35  ;;  %2132 = vmatpush1.bf16.msra.mxu0 %v7017_v38  ;;  %v6988_v35 = vcombine.high %v1549_v30, %v1557_v31  ;;  %v1541_v38 = vld [vmem:[%s10406_s7 + $0x60] sm:$0xff]  ;;  %v8293_v30 = vld [vmem:[%s10408_s9 + $0xb0] sm:$0xff]   ;;  %v8294_v31 = vld [vmem:[%s10408_s9 + $0x68] sm:$0xff]  }
 0xb3a   : > { %2092 = vmatprep.subr.bf16.mxu1 %v7000_v54  ;;  %2133 = vmatprep.subr.bf16.mxu0 %v7002_v55  ;;  %v6972_v43 = vcombine.high %v1533_v37, %v1541_v38  ;;  %v6971_v50 = vcombine.low %v1533_v37, %v1541_v38  ;;  %v7026_v54 = vcombine.high %v1584_v48, %v1592_v49  ;;  %v1567_v55 = vld [vmem:[%s10406_s7 + $0x130] sm:$0xff]  ;;  %v8302_v37 = vld [vmem:[%s10408_s9 + $0x58] sm:$0xff]  }
 0xb3b   : > { %2114 = vmatprep.mubr.bf16.mxu1 %v8608_v12  ;;  %2155 = vmatprep.mubr.bf16.mxu0 %v8608_v12  ;;  %v7007_v3 = vcombine.low %v1567_v55, %v1575_v56  ;;  %v8303_v38 = vld [vmem:[%s10408_s9 + $0xd8] sm:$0xff]  }
 0xb3d   : > { %2093 = vmatpush1.bf16.msra.mxu1 %v6999_v15  ;;  %2134 = vmatpush1.bf16.msra.mxu0 %v7001_v60  ;;  %v7025_v15 = vcombine.low %v1584_v48, %v1592_v49  ;;  %v7008_v60 = vcombine.high %v1567_v55, %v1575_v56  ;;  %v8312_v48 = vld [vmem:[%s10408_s9 + $0x8] sm:$0xff]   ;;  %v8318_v55 = vld [vmem:[%s10408_s9 + $0x178] sm:$0xff]  }
 0xb3e   : > { %2094 = vmatprep.subr.bf16.mxu1 %v6984_v61  ;;  %2135 = vmatprep.subr.bf16.mxu0 %v6986_v62  ;;  %v7010_v61 = vcombine.high %v1568_v57, %v1576_v58  ;;  %v1551_v62 = vld [vmem:[%s10406_s7 + $0xb0] sm:$0xff]  ;;  %v8313_v49 = vld [vmem:[%s10408_s9 + $0x88] sm:$0xff]   ;;  %v8319_v56 = vld [vmem:[%s10408_s9 + $0x1f8] sm:$0xff]  }
 0xb3f   : > { %v6991_v11 = vcombine.low %v1551_v62, %v1559_v63 }
 0xb41   : > { %2095 = vmatpush1.bf16.msra.mxu1 %v6983_v4  ;;  %2136 = vmatpush1.bf16.msra.mxu0 %v6985_v5  ;;  %v7009_v4 = vcombine.low %v1568_v57, %v1576_v58  ;;  %v6992_v5 = vcombine.high %v1551_v62, %v1559_v63  ;;  %v9215_v57 = vsub.s32 2, %v8768_v19  ;;  %v9220_v58 = vld [vmem:[%s10407_s8] sm:$0xff] }
 0xb42   : > { %2096 = vmatprep.subr.bf16.mxu1 %v6968_v6  ;;  %2137 = vmatprep.subr.bf16.mxu0 %v6970_v7  ;;  %v6994_v6 = vcombine.high %v1552_v0, %v1560_v1  ;;  %v1535_v7 = vld [vmem:[%s10406_s7 + $0x30] sm:$0xff] }
 0xb45   : > { %2097 = vmatpush1.bf16.msra.mxu1 %v6967_v13  ;;  %2138 = vmatpush1.bf16.msra.mxu0 %v6969_v14  ;;  %v6993_v13 = vcombine.low %v1552_v0, %v1560_v1  ;;  %v6976_v14 = vcombine.high %v1535_v7, %v1543_v8 }
 0xb46   : > { %2172 = vmatprep.subr.bf16.mxu1 %v7020_v16  ;;  %2213 = vmatprep.subr.bf16.mxu0 %v7022_v17  ;;  %v6978_v16 = vcombine.high %v1536_v9, %v1544_v10  ;;  %v6975_v17 = vcombine.low %v1535_v7, %v1543_v8 }
 0xb48   : > { %7029 = vmatmul.mubr.msk.bf16.vlgmr.msra.gmra.mxu1 %vm693_vm3, %v8968_v53  ;;  %7030 = vmatmul.mubr.msk.bf16.vlgmr.msra.gmra.mxu0 %vm693_vm3, %v8968_v53 }
 0xb49   : > { %2173 = vmatpush1.bf16.msra.mxu1 %v7019_v25  ;;  %2214 = vmatpush1.bf16.msra.mxu0 %v7021_v26  ;;  %v8289_v25 = vld [vmem:[%s10408_s9 + $0xb8] sm:$0xff]   ;;  %v8290_v26 = vld [vmem:[%s10408_s9 + $0x70] sm:$0xff]  }
 0xb4a   : > { %2174 = vmatprep.subr.bf16.mxu1 %v7004_v27  ;;  %2215 = vmatprep.subr.bf16.mxu0 %v7006_v29  ;;  %v8291_v27 = vld [vmem:[%s10408_s9 + $0xf0] sm:$0xff]  }
 0xb4b   : > { %2196 = vmatprep.mubr.bf16.mxu1 %v8608_v12  ;;  %2237 = vmatprep.mubr.bf16.mxu0 %v8608_v12  ;;  %v8292_v29 = vld [vmem:[%s10408_s9 + $0x30] sm:$0xff]  }
 0xb4d   : > { %2175 = vmatpush1.bf16.msra.mxu1 %v7003_v33  ;;  %2216 = vmatpush1.bf16.msra.mxu0 %v7005_v34  ;;  %v8298_v33 = vld [vmem:[%s10408_s9 + $0x60] sm:$0xff]  }
 0xb4e   : > { %2176 = vmatprep.subr.bf16.mxu1 %v6988_v35  ;;  %2217 = vmatprep.subr.bf16.mxu0 %v6990_v36  ;;  %v8299_v34 = vld [vmem:[%s10408_s9 + $0xe0] sm:$0xff]  }
 0xb4f   : > { %v8300_v35 = vld [vmem:[%s10408_s9 + $0x20] sm:$0xff]  }
 0xb50   : > { %v8301_v36 = vld [vmem:[%s10408_s9 + $0xa0] sm:$0xff]  }
 0xb51   : > { %2177 = vmatpush1.bf16.msra.mxu1 %v6987_v41  ;;  %2218 = vmatpush1.bf16.msra.mxu0 %v6989_v42  ;;  %v8306_v41 = vld [vmem:[%s10408_s9 + $0x50] sm:$0xff]  }
 0xb52   : > { %2178 = vmatprep.subr.bf16.mxu1 %v6972_v43  ;;  %2219 = vmatprep.subr.bf16.mxu0 %v6974_v44  ;;  %v8307_v42 = vld [vmem:[%s10408_s9 + $0xd0] sm:$0xff]  }
 0xb53   : > { %v8308_v43 = vld [vmem:[%s10408_s9 + $0x10] sm:$0xff]  }
 0xb54   : > { %v8309_v44 = vld [vmem:[%s10408_s9 + $0x90] sm:$0xff]  }
 0xb55   : > { %2179 = vmatpush1.bf16.msra.mxu1 %v6971_v50  ;;  %2220 = vmatpush1.bf16.msra.mxu0 %v6973_v51  ;;  %v8314_v50 = vld [vmem:[%s10408_s9 + $0x40] sm:$0xff]  }
 0xb56   : > { %2254 = vmatprep.subr.bf16.mxu1 %v7024_v46  ;;  %2295 = vmatprep.subr.bf16.mxu0 %v7026_v54  ;;  %v8315_v51 = vld [vmem:[%s10408_s9 + $0xc0] sm:$0xff]  }
 0xb57   : > { %v8316_v46 = vld [vmem:[%s10408_s9] sm:$0xff]  }
 0xb58   : > { %7031 = vmatmul.mubr.msk.bf16.vlgmr.msra.gmra.mxu1 %vm693_vm3, %v8968_v53  ;;  %7032 = vmatmul.mubr.msk.bf16.vlgmr.msra.gmra.mxu0 %vm693_vm3, %v8968_v53  ;;  %v8317_v54 = vld [vmem:[%s10408_s9 + $0x80] sm:$0xff]  }
 0xb59   : > { %2255 = vmatpush1.bf16.msra.mxu1 %v7023_v59  ;;  %2296 = vmatpush1.bf16.msra.mxu0 %v7025_v15  ;;  %v9223_v59 = vsub.s32 3, %v8768_v19  ;;  %v1600_v15 = vrot.slane %v9220_v58, %v8771_v20 }
 0xb5a   : > { %2256 = vmatprep.subr.bf16.mxu1 %v7008_v60  ;;  %2297 = vmatprep.subr.bf16.mxu0 %v7010_v61  ;;  %v1608_v60 = vrot.slane %v9220_v58, %v9215_v57  ;;  %v1604_v61 = vrot.slane %v9220_v58, %v8777_v22 }
 0xb5b   : > { %2278 = vmatprep.mubr.bf16.mxu1 %v8608_v12  ;;  %2319 = vmatprep.mubr.bf16.mxu0 %v8608_v12  ;;  %v1612_v62 = vrot.slane %v9220_v58, %v9223_v59 }
 0xb5d   : > { %2257 = vmatpush1.bf16.msra.mxu1 %v7007_v3  ;;  %2298 = vmatpush1.bf16.msra.mxu0 %v7009_v4 }
 0xb5e   : > { %2258 = vmatprep.subr.bf16.mxu1 %v6992_v5  ;;  %2299 = vmatprep.subr.bf16.mxu0 %v6994_v6 }
 0xb61   : > { %2259 = vmatpush1.bf16.msra.mxu1 %v6991_v11  ;;  %2300 = vmatpush1.bf16.msra.mxu0 %v6993_v13 }
 0xb62   : > { %2260 = vmatprep.subr.bf16.mxu1 %v6976_v14  ;;  %2301 = vmatprep.subr.bf16.mxu0 %v6978_v16 }
 0xb65   : > { %2261 = vmatpush1.bf16.msra.mxu1 %v6975_v17  ;;  %2302 = vmatpush1.bf16.msra.mxu0 %v6977_v18 }
 0xb66   : > { %7770 = vmatprep.subr.bf16.mxu1 %v8286_v21  ;;  %7792 = vmatprep.subr.bf16.mxu0 %v8287_v23  ;;  %v8320_v23 = vld [vmem:[%s10408_s9 + $0x138] sm:$0xff]  }
 0xb68   : > { %7033 = vmatmul.mubr.msk.bf16.vlgmr.msra.gmra.mxu1 %vm693_vm3, %v8968_v53  ;;  %7034 = vmatmul.mubr.msk.bf16.vlgmr.msra.gmra.mxu0 %vm693_vm3, %v8968_v53  ;;  %v8295_v53 = vld [vmem:[%s10408_s9 + $0xe8] sm:$0xff]  }
 0xb69   : > { %7771 = vmatpush3.bf16.msra.mxu1 %v8288_v24  ;;  %7793 = vmatpush3.bf16.msra.mxu0 %v8289_v25  ;;  %v8321_v24 = vld [vmem:[%s10408_s9 + $0x1b8] sm:$0xff]  }
 0xb6a   : > { %7772 = vmatprep.subr.bf16.mxu1 %v8290_v26  ;;  %7794 = vmatprep.subr.bf16.mxu0 %v8291_v27  ;;  %v8322_v27 = vld [vmem:[%s10408_s9 + $0x170] sm:$0xff]  }
 0xb6d   : > { %7773 = vmatpush3.bf16.msra.mxu1 %v8292_v29  ;;  %7795 = vmatpush3.bf16.msra.mxu0 %v8293_v30  ;;  %v8323_v29 = vld [vmem:[%s10408_s9 + $0x1f0] sm:$0xff]  }
 0xb6e   : > { %7774 = vmatprep.subr.bf16.mxu1 %v8294_v31  ;;  %7796 = vmatprep.subr.bf16.mxu0 %v8295_v53  ;;  %v8324_v30 = vld [vmem:[%s10408_s9 + $0x130] sm:$0xff]   ;;  %v9252_v53 = vsub.s32 5, %v8768_v19 }
 0xb6f   : > { %v8325_v31 = vld [vmem:[%s10408_s9 + $0x1b0] sm:$0xff]  }
 0xb71   : > { %7775 = vmatpush3.bf16.msra.mxu1 %v8296_v28  ;;  %7797 = vmatpush3.bf16.msra.mxu0 %v8297_v32  ;;  %v9255_v28 = vsub.s32 7, %v8768_v19  ;;  %v8326_v32 = vld [vmem:[%s10408_s9 + $0x168] sm:$0xff]  }
 0xb72   : > { %7776 = vmatprep.subr.bf16.mxu1 %v8298_v33  ;;  %7798 = vmatprep.subr.bf16.mxu0 %v8299_v34  ;;  %v8327_v33 = vld [vmem:[%s10408_s9 + $0x1e8] sm:$0xff]   ;;  %v1620_v34 = vrot.slane %v9220_v58, %v9252_v53 }
 0xb75   : > { %7777 = vmatpush3.bf16.msra.mxu1 %v8300_v35  ;;  %7799 = vmatpush3.bf16.msra.mxu0 %v8301_v36  ;;  %v1628_v35 = vrot.slane %v9220_v58, %v9255_v28  ;;  %v8328_v36 = vld [vmem:[%s10408_s9 + $0x128] sm:$0xff]  }
 0xb76   : > { %7778 = vmatprep.subr.bf16.mxu1 %v8302_v37  ;;  %7800 = vmatprep.subr.bf16.mxu0 %v8303_v38  ;;  %v8329_v37 = vld [vmem:[%s10408_s9 + $0x1a8] sm:$0xff]  }
 0xb79   : > { %7779 = vmatpush3.bf16.msra.mxu1 %v8304_v39  ;;  %7801 = vmatpush3.bf16.msra.mxu0 %v8305_v40  ;;  %v8330_v40 = vld [vmem:[%s10408_s9 + $0x160] sm:$0xff]  }
 0xb7a   : > { %7780 = vmatprep.subr.bf16.mxu1 %v8306_v41  ;;  %7802 = vmatprep.subr.bf16.mxu0 %v8307_v42  ;;  %v8331_v41 = vld [vmem:[%s10408_s9 + $0x1e0] sm:$0xff]  }
 0xb7d   : > { %7781 = vmatpush3.bf16.msra.mxu1 %v8308_v43  ;;  %7803 = vmatpush3.bf16.msra.mxu0 %v8309_v44 }
 0xb7e   : > { %7782 = vmatprep.subr.bf16.mxu1 %v8310_v45  ;;  %7804 = vmatprep.subr.bf16.mxu0 %v8311_v47  ;;  %v8332_v47 = vld [vmem:[%s10408_s9 + $0x120] sm:$0xff]  }
 0xb81   : > { %7783 = vmatpush3.bf16.msra.mxu1 %v8312_v48  ;;  %7805 = vmatpush3.bf16.msra.mxu0 %v8313_v49  ;;  %v8333_v48 = vld [vmem:[%s10408_s9 + $0x1a0] sm:$0xff]  }
 0xb82   : > { %7784 = vmatprep.subr.bf16.mxu1 %v8314_v50  ;;  %7806 = vmatprep.subr.bf16.mxu0 %v8315_v51  ;;  %v8334_v51 = vld [vmem:[%s10408_s9 + $0x158] sm:$0xff]  }
 0xb85   : > { %7785 = vmatpush3.bf16.msra.mxu1 %v8316_v46  ;;  %7807 = vmatpush3.bf16.msra.mxu0 %v8317_v54  ;;  %v8335_v46 = vld [vmem:[%s10408_s9 + $0x1d8] sm:$0xff]  }
 0xb86   : > { %7814 = vmatprep.subr.bf16.mxu1 %v8318_v55  ;;  %7836 = vmatprep.subr.bf16.mxu0 %v8319_v56 }
 0xbf8   : > { %v2034_v63 = vpop.f32.mrf.mxu1  ;;  %v2075_v0 = vpop.f32.mrf.mxu0 }
 0xbf9   : > { %v2035_v1 = vadd.f32 %v2034_v63, %v1600_v15  ;;  %v2076_v3 = vadd.f32 %v2075_v0, %v1608_v60  ;;  %v8337_v63 = vld [vmem:[%s10408_s9 + $0x198] sm:$0xff]   ;;  %v9298_v0 = vsub.s32 4, %v8768_v19 }
 0xbfa   : > { %v2036_v4 = vpop.f32.mrf.mxu1  ;;  %v2077_v5 = vpop.f32.mrf.mxu0 }
 0xbfb   : > { %v2037_v6 = vadd.f32 %v2036_v4, %v1604_v61  ;;  %v2078_v7 = vadd.f32 %v2077_v5, %v1612_v62  ;;  %v2328_v8 = vmax.f32 %v2035_v1, 0.0  ;;  %v2330_v9 = vmax.f32 %v2076_v3, 0.0  ;;  %v8336_v62 = vld [vmem:[%s10408_s9 + $0x118] sm:$0xff]   ;;  %v8338_v3 = vld [vmem:[%s10408_s9 + $0x150] sm:$0xff]  }
 0xbfc   : > { %v2038_v10 = vpop.f32.mrf.mxu1  ;;  %v2079_v11 = vpop.f32.mrf.mxu0  ;;  %v9301_v1 = vsub.s32 6, %v8768_v19  ;;  %v8339_v4 = vld [vmem:[%s10408_s9 + $0x1d0] sm:$0xff]  }
 0xbfd   : > { %v2329_v13 = vmax.f32 %v2037_v6, 0.0  ;;  %v2331_v14 = vmax.f32 %v2078_v7, 0.0  ;;  %v2344_v25 = vpack.c.bf16 %v2328_v8, %v2328_v8  ;;  %v2346_v26 = vpack.c.bf16 %v2330_v9, %v2330_v9  ;;  %v8340_v5 = vld [vmem:[%s10408_s9 + $0x110] sm:$0xff]   ;;  %v8342_v8 = vld [vmem:[%s10408_s9 + $0x148] sm:$0xff]  }
 0xbfe   : > { %v2039_v16 = vpop.f32.mrf.mxu1  ;;  %v2080_v17 = vpop.f32.mrf.mxu0  ;;  %v8341_v19 = vld [vmem:[%s10408_s9 + $0x190] sm:$0xff]   ;;  %v1616_v6 = vrot.slane %v9220_v58, %v9298_v0  ;;  %v1624_v7 = vrot.slane %v9220_v58, %v9301_v1  ;;  %v8343_v9 = vld [vmem:[%s10408_s9 + $0x1c8] sm:$0xff]  }
 0xbff   : > { %v2345_v18 = vpack.c.bf16 %v2329_v13, %v2329_v13  ;;  %v2347_v21 = vpack.c.bf16 %v2331_v14, %v2331_v14  ;;  %v9328_v10 = vld [vmem:[%s10407_s8 + $0x8] sm:$0xff] }
 0xc00   : > { %v1636_v58 = vrot.slane %v9328_v10, %v8777_v22  ;;  %v1644_v11 = vrot.slane %v9328_v10, %v9223_v59  ;;  %v8344_v13 = vld [vmem:[%s10408_s9 + $0x108] sm:$0xff]  }
 0xc01   : > { %3423 = vmatprep.mubr.bf16.mxu1 %v2345_v18  ;;  %3463 = vmatprep.mubr.bf16.mxu0 %v2347_v21  ;;  %v8345_v14 = vld [vmem:[%s10408_s9 + $0x188] sm:$0xff]  }
 0xc02   : > { %3424 = vmatmul.mubr.bf16.vlgmr.msra.gmra.mxu1 %v2344_v25  ;;  %3464 = vmatmul.mubr.bf16.vlgmr.msra.gmra.mxu0 %v2346_v26 }
 0xc03   : > { %7815 = vmatpush3.bf16.msra.mxu1 %v8320_v23  ;;  %7837 = vmatpush3.bf16.msra.mxu0 %v8321_v24  ;;  %v8346_v23 = vld [vmem:[%s10408_s9 + $0x140] sm:$0xff]  }
 0xc04   : > { %7816 = vmatprep.subr.bf16.mxu1 %v8322_v27  ;;  %7838 = vmatprep.subr.bf16.mxu0 %v8323_v29  ;;  %v8347_v24 = vld [vmem:[%s10408_s9 + $0x1c0] sm:$0xff]  }
 0xc07   : > { %7817 = vmatpush3.bf16.msra.mxu1 %v8324_v30  ;;  %7839 = vmatpush3.bf16.msra.mxu0 %v8325_v31  ;;  %v8348_v30 = vld [vmem:[%s10408_s9 + $0x100] sm:$0xff]  }
 0xc08   : > { %v2116_v38 = vpop.f32.mrf.mxu1  ;;  %v2157_v39 = vpop.f32.mrf.mxu0  ;;  %7818 = vmatprep.subr.bf16.mxu1 %v8326_v32  ;;  %7840 = vmatprep.subr.bf16.mxu0 %v8327_v33  ;;  %v8349_v31 = vld [vmem:[%s10408_s9 + $0x180] sm:$0xff]  }
 0xc09   : > { %v2117_v16 = vadd.f32 %v2116_v38, %v1616_v6  ;;  %v2158_v17 = vadd.f32 %v2157_v39, %v1624_v7  ;;  %v8365_v7 = vld [vmem:[%s10408_s9 + $0x2a0] sm:$0xff]  }
 0xc0a   : > { %v2118_v42 = vpop.f32.mrf.mxu1  ;;  %v2159_v43 = vpop.f32.mrf.mxu0 }
 0xc0b   : > { %v2119_v44 = vadd.f32 %v2118_v42, %v1620_v34  ;;  %v2160_v45 = vadd.f32 %v2159_v43, %v1628_v35  ;;  %7819 = vmatpush3.bf16.msra.mxu1 %v8328_v36  ;;  %7841 = vmatpush3.bf16.msra.mxu0 %v8329_v37  ;;  %v2332_v32 = vmax.f32 %v2117_v16, 0.0  ;;  %v2334_v33 = vmax.f32 %v2158_v17, 0.0  ;;  %v8350_v36 = vld [vmem:[%s10408_s9 + $0x278] sm:$0xff]   ;;  %v8370_v16 = vld [vmem:[%s10408_s9 + $0x250] sm:$0xff]  }
 0xc0c   : > { %v2120_v49 = vpop.f32.mrf.mxu1  ;;  %v2161_v50 = vpop.f32.mrf.mxu0  ;;  %7820 = vmatprep.subr.bf16.mxu1 %v8330_v40  ;;  %7842 = vmatprep.subr.bf16.mxu0 %v8331_v41  ;;  %v8351_v37 = vld [vmem:[%s10408_s9 + $0x2f8] sm:$0xff]   ;;  %v8371_v17 = vld [vmem:[%s10408_s9 + $0x2d0] sm:$0xff]  }
 0xc0d   : > { %v2333_v54 = vmax.f32 %v2119_v44, 0.0  ;;  %v2335_v55 = vmax.f32 %v2160_v45, 0.0  ;;  %v8352_v42 = vld [vmem:[%s10408_s9 + $0x238] sm:$0xff]   ;;  %v2348_v43 = vpack.c.bf16 %v2332_v32, %v2332_v32  ;;  %v2350_v44 = vpack.c.bf16 %v2334_v33, %v2334_v33  ;;  %v8355_v49 = vld [vmem:[%s10408_s9 + $0x2f0] sm:$0xff]   ;;  %v8376_v32 = vld [vmem:[%s10408_s9 + $0x208] sm:$0xff]  }
 0xc0e   : > { %v2121_v56 = vpop.f32.mrf.mxu1  ;;  %v2162_v15 = vpop.f32.mrf.mxu0  ;;  %v8353_v45 = vld [vmem:[%s10408_s9 + $0x2b8] sm:$0xff]  }
 0xc0f   : > { %v2349_v60 = vpack.c.bf16 %v2333_v54, %v2333_v54  ;;  %v2351_v61 = vpack.c.bf16 %v2335_v55, %v2335_v55  ;;  %7821 = vmatpush3.bf16.msra.mxu1 %v8332_v47  ;;  %7843 = vmatpush3.bf16.msra.mxu0 %v8333_v48  ;;  %v8354_v48 = vld [vmem:[%s10408_s9 + $0x270] sm:$0xff]   ;;  %v8358_v54 = vld [vmem:[%s10408_s9 + $0x268] sm:$0xff]  }
 0xc10   : > { %7822 = vmatprep.subr.bf16.mxu1 %v8334_v51  ;;  %7844 = vmatprep.subr.bf16.mxu0 %v8335_v46  ;;  %v8356_v51 = vld [vmem:[%s10408_s9 + $0x230] sm:$0xff]   ;;  %v8359_v55 = vld [vmem:[%s10408_s9 + $0x2e8] sm:$0xff]  }
 0xc11   : > { %3503 = vmatprep.mubr.bf16.mxu1 %v2349_v60  ;;  %3543 = vmatprep.mubr.bf16.mxu0 %v2351_v61  ;;  %v8357_v46 = vld [vmem:[%s10408_s9 + $0x2b0] sm:$0xff]   ;;  %v8360_v56 = vld [vmem:[%s10408_s9 + $0x228] sm:$0xff]  }
 0xc12   : > { %v8361_v61 = vld [vmem:[%s10408_s9 + $0x2a8] sm:$0xff]  }
 0xc13   : > { %7823 = vmatpush3.bf16.msra.mxu1 %v8336_v62  ;;  %7845 = vmatpush3.bf16.msra.mxu0 %v8337_v63  ;;  %v8362_v62 = vld [vmem:[%s10408_s9 + $0x260] sm:$0xff]  }
 0xc14   : > { %7824 = vmatprep.subr.bf16.mxu1 %v8338_v3  ;;  %7846 = vmatprep.subr.bf16.mxu0 %v8339_v4  ;;  %v8363_v63 = vld [vmem:[%s10408_s9 + $0x2e0] sm:$0xff]  }
 0xc17   : > { %7825 = vmatpush3.bf16.msra.mxu1 %v8340_v5  ;;  %7847 = vmatpush3.bf16.msra.mxu0 %v8341_v19  ;;  %v8364_v5 = vld [vmem:[%s10408_s9 + $0x220] sm:$0xff]  }
 0xc18   : > { %v9340_v18 = vpop.f32.mrf.mxu1  ;;  %v9342_v21 = vpop.f32.mrf.mxu0  ;;  %7826 = vmatprep.subr.bf16.mxu1 %v8342_v8  ;;  %7848 = vmatprep.subr.bf16.mxu0 %v8343_v9  ;;  %v8366_v8 = vld [vmem:[%s10408_s9 + $0x258] sm:$0xff]  }
 0xc19   : > { %v8367_v9 = vld [vmem:[%s10408_s9 + $0x2d8] sm:$0xff]  }
 0xc1a   : > { %v2200_v25 = vpop.f32.mrf.mxu1  ;;  %v2241_v26 = vpop.f32.mrf.mxu0 }
 0xc1b   : > { %v2201_v27 = vadd.f32 %v2200_v25, %v1636_v58  ;;  %v2242_v29 = vadd.f32 %v2241_v26, %v1644_v11  ;;  %7827 = vmatpush3.bf16.msra.mxu1 %v8344_v13  ;;  %7849 = vmatpush3.bf16.msra.mxu0 %v8345_v14  ;;  %v8368_v13 = vld [vmem:[%s10408_s9 + $0x218] sm:$0xff]   ;;  %v8373_v25 = vld [vmem:[%s10408_s9 + $0x290] sm:$0xff]   ;;  %v8374_v26 = vld [vmem:[%s10408_s9 + $0x248] sm:$0xff]  }
 0xc1c   : > { %v2202_v34 = vpop.f32.mrf.mxu1  ;;  %v2243_v35 = vpop.f32.mrf.mxu0  ;;  %7828 = vmatprep.subr.bf16.mxu1 %v8346_v23  ;;  %7850 = vmatprep.subr.bf16.mxu0 %v8347_v24  ;;  %v8369_v14 = vld [vmem:[%s10408_s9 + $0x298] sm:$0xff]   ;;  %v8372_v23 = vld [vmem:[%s10408_s9 + $0x210] sm:$0xff]   ;;  %v1632_v24 = vrot.slane %v9328_v10, %v8771_v20 }
 0xc1d   : > { %v2337_v38 = vmax.f32 %v2201_v27, 0.0  ;;  %v2339_v39 = vmax.f32 %v2242_v29, 0.0  ;;  %v1640_v27 = vrot.slane %v9328_v10, %v9215_v57  ;;  %v8375_v29 = vld [vmem:[%s10408_s9 + $0x2c8] sm:$0xff]   ;;  %v8378_v35 = vld [vmem:[%s10408_s9 + $0x240] sm:$0xff]  }
 0xc1e   : > { %v2203_v40 = vpop.f32.mrf.mxu1  ;;  %v2244_v41 = vpop.f32.mrf.mxu0  ;;  %v2199_v33 = vadd.f32 %v9340_v18, %v1632_v24  ;;  %v8377_v34 = vld [vmem:[%s10408_s9 + $0x288] sm:$0xff]   ;;  %v8380_v18 = vld [vmem:[%s10408_s9 + $0x200] sm:$0xff]  }
 0xc1f   : > { %7829 = vmatpush3.bf16.msra.mxu1 %v8348_v30  ;;  %7851 = vmatpush3.bf16.msra.mxu0 %v8349_v31  ;;  %v2353_v47 = vpack.c.bf16 %v2337_v38, %v2337_v38  ;;  %v2355_v50 = vpack.c.bf16 %v2339_v39, %v2339_v39  ;;  %v1652_v30 = vrot.slane %v9328_v10, %v9252_v53  ;;  %v8381_v41 = vld [vmem:[%s10408_s9 + $0x280] sm:$0xff]   ;;  %v8406_v24 = vld [vmem:[%s10408_s9 + $0x348] sm:$0xff]  }
 0xc20   : > { %7858 = vmatprep.subr.bf16.mxu1 %v8350_v36  ;;  %7880 = vmatprep.subr.bf16.mxu0 %v8351_v37  ;;  %v1660_v31 = vrot.slane %v9328_v10, %v9255_v28  ;;  %v2240_v36 = vadd.f32 %v9342_v21, %v1640_v27  ;;  %v8379_v37 = vld [vmem:[%s10408_s9 + $0x2c0] sm:$0xff]   ;;  %v2336_v40 = vmax.f32 %v2199_v33, 0.0  ;;  %v8382_v21 = vld [vmem:[%s10408_s9 + $0x378] sm:$0xff]   ;;  %v8408_v27 = vld [vmem:[%s10408_s9 + $0x308] sm:$0xff]  }
 0xc22   : > { %3504 = vmatmul.mubr.bf16.vlgmr.msra.gmra.mxu1 %v2348_v43  ;;  %3544 = vmatmul.mubr.bf16.vlgmr.msra.gmra.mxu0 %v2350_v44  ;;  %v8383_v43 = vld [vmem:[%s10408_s9 + $0x3f8] sm:$0xff]  }
 0xc23   : > { %7859 = vmatpush3.bf16.msra.mxu1 %v8352_v42  ;;  %3583 = vmatprep.mubr.bf16.mxu1 %v2353_v47  ;;  %v2338_v42 = vmax.f32 %v2240_v36, 0.0  ;;  %v8384_v47 = vld [vmem:[%s10408_s9 + $0x338] sm:$0xff]  }
 0xc24   : > { %7881 = vmatpush3.bf16.msra.mxu0 %v8353_v45  ;;  %3623 = vmatprep.mubr.bf16.mxu0 %v2355_v50 }
 0xc25   : > { %7860 = vmatprep.subr.bf16.mxu1 %v8354_v48  ;;  %7882 = vmatprep.subr.bf16.mxu0 %v8355_v49  ;;  %v2352_v48 = vpack.c.bf16 %v2336_v40, %v2336_v40  ;;  %v8385_v49 = vld [vmem:[%s10408_s9 + $0x3b8] sm:$0xff]   ;;  %v2354_v50 = vpack.c.bf16 %v2338_v42, %v2338_v42 }
 0xc27   : > { %7861 = vmatpush3.bf16.msra.mxu1 %v8356_v51  ;;  %v8386_v51 = vld [vmem:[%s10408_s9 + $0x370] sm:$0xff]  }
 0xc28   : > { %7883 = vmatpush3.bf16.msra.mxu0 %v8357_v46  ;;  %v9389_v15 = vpop.f32.mrf.mxu1  ;;  %v9391_v60 = vpop.f32.mrf.mxu0  ;;  %7862 = vmatprep.subr.bf16.mxu1 %v8358_v54  ;;  %v8387_v54 = vld [vmem:[%s10408_s9 + $0x3f0] sm:$0xff]  }
 0xc29   : > { %7884 = vmatprep.subr.bf16.mxu0 %v8359_v55 }
 0xc2a   : > { %v2282_v3 = vpop.f32.mrf.mxu1  ;;  %v2323_v4 = vpop.f32.mrf.mxu0 }
 0xc2b   : > { %7863 = vmatpush3.bf16.msra.mxu1 %v8360_v56  ;;  %v2283_v38 = vadd.f32 %v2282_v3, %v1652_v30  ;;  %v2324_v39 = vadd.f32 %v2323_v4, %v1660_v31  ;;  %v8388_v56 = vld [vmem:[%s10408_s9 + $0x330] sm:$0xff]   ;;  %v8392_v3 = vld [vmem:[%s10408_s9 + $0x328] sm:$0xff]  }
 0xc2c   : > { %7885 = vmatpush3.bf16.msra.mxu0 %v8361_v61  ;;  %v2284_v19 = vpop.f32.mrf.mxu1  ;;  %v2325_v6 = vpop.f32.mrf.mxu0  ;;  %7864 = vmatprep.subr.bf16.mxu1 %v8362_v62  ;;  %v8389_v61 = vld [vmem:[%s10408_s9 + $0x3b0] sm:$0xff]   ;;  %v8390_v62 = vld [vmem:[%s10408_s9 + $0x368] sm:$0xff]  }
 0xc2d   : > { %7886 = vmatprep.subr.bf16.mxu0 %v8363_v63  ;;  %v2341_v44 = vmax.f32 %v2283_v38, 0.0  ;;  %v2343_v45 = vmax.f32 %v2324_v39, 0.0  ;;  %v8391_v63 = vld [vmem:[%s10408_s9 + $0x3e8] sm:$0xff]   ;;  %v8395_v19 = vld [vmem:[%s10408_s9 + $0x3e0] sm:$0xff]  }
 0xc2e   : > { %v2285_v58 = vpop.f32.mrf.mxu1  ;;  %v2326_v11 = vpop.f32.mrf.mxu0  ;;  %v8393_v4 = vld [vmem:[%s10408_s9 + $0x3a8] sm:$0xff]   ;;  %v8396_v6 = vld [vmem:[%s10408_s9 + $0x320] sm:$0xff]  }
 0xc2f   : > { %7865 = vmatpush3.bf16.msra.mxu1 %v8364_v5  ;;  %v2357_v46 = vpack.c.bf16 %v2341_v44, %v2341_v44  ;;  %v2359_v55 = vpack.c.bf16 %v2343_v45, %v2343_v45  ;;  %v8394_v5 = vld [vmem:[%s10408_s9 + $0x360] sm:$0xff]   ;;  %v8400_v58 = vld [vmem:[%s10408_s9 + $0x318] sm:$0xff]   ;;  %v8409_v30 = vld [vmem:[%s10408_s9 + $0x388] sm:$0xff]  }
 0xc30   : > { %7887 = vmatpush3.bf16.msra.mxu0 %v8365_v7  ;;  %7866 = vmatprep.subr.bf16.mxu1 %v8366_v8  ;;  %v8397_v7 = vld [vmem:[%s10408_s9 + $0x3a0] sm:$0xff]   ;;  %v8398_v8 = vld [vmem:[%s10408_s9 + $0x358] sm:$0xff]  }
 0xc31   : > { %7888 = vmatprep.subr.bf16.mxu0 %v8367_v9  ;;  %v8399_v9 = vld [vmem:[%s10408_s9 + $0x3d8] sm:$0xff]   ;;  %v7035_v39 = vld [vmem:[%s10409_s10] ss:$0 sm:$0xff] }
 0xc32   : > { %v8401_v11 = vld [vmem:[%s10408_s9 + $0x398] sm:$0xff]  }
 0xc33   : > { %7867 = vmatpush3.bf16.msra.mxu1 %v8368_v13  ;;  %v8402_v13 = vld [vmem:[%s10408_s9 + $0x350] sm:$0xff]  }
 0xc34   : > { %7889 = vmatpush3.bf16.msra.mxu0 %v8369_v14  ;;  %7868 = vmatprep.subr.bf16.mxu1 %v8370_v16  ;;  %v8403_v14 = vld [vmem:[%s10408_s9 + $0x3d0] sm:$0xff]  }
 0xc35   : > { %7890 = vmatprep.subr.bf16.mxu0 %v8371_v17  ;;  %v8404_v16 = vld [vmem:[%s10408_s9 + $0x310] sm:$0xff]   ;;  %v1648_v17 = vrot.slane %v9328_v10, %v9298_v0 }
 0xc37   : > { %7869 = vmatpush3.bf16.msra.mxu1 %v8372_v23  ;;  %v8405_v23 = vld [vmem:[%s10408_s9 + $0x390] sm:$0xff]  }
 0xc38   : > { %7891 = vmatpush3.bf16.msra.mxu0 %v8373_v25  ;;  %7870 = vmatprep.subr.bf16.mxu1 %v8374_v26  ;;  %v1656_v25 = vrot.slane %v9328_v10, %v9301_v1  ;;  %v8407_v26 = vld [vmem:[%s10408_s9 + $0x3c8] sm:$0xff]   ;;  %v8410_v10 = vld [vmem:[%s10408_s9 + $0x340] sm:$0xff]  }
 0xc39   : > { %7892 = vmatprep.subr.bf16.mxu0 %v8375_v29  ;;  %v2281_v29 = vadd.f32 %v9389_v15, %v1648_v17  ;;  %v8412_v15 = vld [vmem:[%s10408_s9 + $0x300] sm:$0xff]  }
 0xc3a   : > { %v2322_v31 = vadd.f32 %v9391_v60, %v1656_v25 }
 0xc3b   : > { %7871 = vmatpush3.bf16.msra.mxu1 %v8376_v32  ;;  %v8411_v32 = vld [vmem:[%s10408_s9 + $0x3c0] sm:$0xff]   ;;  %v2340_v33 = vmax.f32 %v2281_v29, 0.0 }
 0xc3c   : > { %7893 = vmatpush3.bf16.msra.mxu0 %v8377_v34  ;;  %7872 = vmatprep.subr.bf16.mxu1 %v8378_v35  ;;  %v8413_v34 = vld [vmem:[%s10408_s9 + $0x380] sm:$0xff]   ;;  %v2342_v35 = vmax.f32 %v2322_v31, 0.0 }
 0xc3d   : > { %7894 = vmatprep.subr.bf16.mxu0 %v8379_v37  ;;  %v2356_v60 = vpack.c.bf16 %v2340_v33, %v2340_v33 }
 0xc3e   : > { %v2358_v36 = vpack.c.bf16 %v2342_v35, %v2342_v35 }
 0xc3f   : > { %7873 = vmatpush3.bf16.msra.mxu1 %v8380_v18 }
 0xc40   : > { %7895 = vmatpush3.bf16.msra.mxu0 %v8381_v41  ;;  %7902 = vmatprep.subr.bf16.mxu1 %v8382_v21 }
 0xc41   : > { %7924 = vmatprep.subr.bf16.mxu0 %v8383_v43 }
 0xc42   : > { %3584 = vmatmul.mubr.bf16.vlgmr.msra.gmra.mxu1 %v2352_v48 }
 0xc43   : > { %3624 = vmatmul.mubr.bf16.vlgmr.msra.gmra.mxu0 %v2354_v50  ;;  %7903 = vmatpush3.bf16.msra.mxu1 %v8384_v47 }
 0xc44   : > { %3663 = vmatprep.mubr.bf16.mxu1 %v2357_v46  ;;  %7925 = vmatpush3.bf16.msra.mxu0 %v8385_v49 }
 0xc45   : > { %3703 = vmatprep.mubr.bf16.mxu0 %v2359_v55  ;;  %7904 = vmatprep.subr.bf16.mxu1 %v8386_v51 }
 0xc46   : > { %7926 = vmatprep.subr.bf16.mxu0 %v8387_v54 }
 0xc47   : > { %7905 = vmatpush3.bf16.msra.mxu1 %v8388_v56 }
 0xc48   : > { %7927 = vmatpush3.bf16.msra.mxu0 %v8389_v61  ;;  %7906 = vmatprep.subr.bf16.mxu1 %v8390_v62 }
 0xc49   : > { %7928 = vmatprep.subr.bf16.mxu0 %v8391_v63 }
 0xc4b   : > { %7907 = vmatpush3.bf16.msra.mxu1 %v8392_v3 }
 0xc4c   : > { %7929 = vmatpush3.bf16.msra.mxu0 %v8393_v4  ;;  %7908 = vmatprep.subr.bf16.mxu1 %v8394_v5 }
 0xc4d   : > { %7930 = vmatprep.subr.bf16.mxu0 %v8395_v19 }
 0xc4f   : > { %7909 = vmatpush3.bf16.msra.mxu1 %v8396_v6 }
 0xc50   : > { %7931 = vmatpush3.bf16.msra.mxu0 %v8397_v7  ;;  %7910 = vmatprep.subr.bf16.mxu1 %v8398_v8 }
 0xc51   : > { %7932 = vmatprep.subr.bf16.mxu0 %v8399_v9 }
 0xc53   : > { %7911 = vmatpush3.bf16.msra.mxu1 %v8400_v58 }
 0xc54   : > { %7933 = vmatpush3.bf16.msra.mxu0 %v8401_v11  ;;  %7912 = vmatprep.subr.bf16.mxu1 %v8402_v13 }
 0xc55   : > { %7934 = vmatprep.subr.bf16.mxu0 %v8403_v14 }
 0xc57   : > { %7913 = vmatpush3.bf16.msra.mxu1 %v8404_v16 }
 0xc58   : > { %7935 = vmatpush3.bf16.msra.mxu0 %v8405_v23  ;;  %7914 = vmatprep.subr.bf16.mxu1 %v8406_v24 }
 0xc59   : > { %7936 = vmatprep.subr.bf16.mxu0 %v8407_v26 }
 0xc5b   : > { %7915 = vmatpush3.bf16.msra.mxu1 %v8408_v27 }
 0xc5c   : > { %7937 = vmatpush3.bf16.msra.mxu0 %v8409_v30  ;;  %7916 = vmatprep.subr.bf16.mxu1 %v8410_v10 }
 0xc5d   : > { %7938 = vmatprep.subr.bf16.mxu0 %v8411_v32 }
 0xc5f   : > { %7917 = vmatpush3.bf16.msra.mxu1 %v8412_v15 }
 0xc60   : > { %7939 = vmatpush3.bf16.msra.mxu0 %v8413_v34 }
 0xc61   : > { %8200 = vmatprep.subr.mxu0 %v8606_v2 }
 0xc62   : > { %3664 = vmatmul.mubr.bf16.vlgmr.msra.gmra.mxu1 %v2356_v60 }
 0xc63   : > { %3704 = vmatmul.mubr.bf16.vlgmr.msra.gmra.mxu0 %v2358_v36  ;;  %3839 = vmatprep.mubr.bf16.mxu1 %v8608_v12 }
 0xc64   : > { %8202 = vmatprep.mubr.msk.f32.mxu0 %vm8607_vm1, %v8606_v2 }
 0xcc2   : > { %v7786_v37 = vpop.f32.mrf.mxu1  ;;  %v7808_v38 = vpop.f32.mrf.mxu0 }
 0xcc4   : > { %v7787_v18 = vpop.f32.mrf.mxu1  ;;  %v7809_v40 = vpop.f32.mrf.mxu0 }
 0xcc5   : > { %v7788_v41 = vadd.f32 %v7787_v18, %v7786_v37  ;;  %v7810_v21 = vadd.f32 %v7809_v40, %v7808_v38  ;;  %v8416_v18 = vld [vmem:[%s10402_s3 + $0x74] ss:$8 sps:$4 sm:$0xff]   ;;  %v8414_v40 = vld [vmem:[%s10402_s3 + $0x70] ss:$8 sps:$4 sm:$0xff]  }
 0xcc6   : > { %v7789_v42 = vpop.f32.mrf.mxu1  ;;  %v7811_v43 = vpop.f32.mrf.mxu0  ;;  %3815 = vmatprep.subr.bf16.mxu1 %v8416_v18 }
 0xcc7   : > { %v3426_v44 = vadd.f32 %v7788_v41, %v7035_v39  ;;  %3816 = vmatpush1.bf16.msra.mxu1 %v8414_v40  ;;  %v8417_v41 = vld [vmem:[%s10402_s3 + $0x60] ss:$8 sps:$4 sm:$0xff]   ;;  %v8422_v42 = vld [vmem:[%s10402_s3 + $0x54] ss:$8 sps:$4 sm:$0xff]   ;;  %v8425_v43 = vld [vmem:[%s10402_s3 + $0x44] ss:$8 sps:$4 sm:$0xff]  }
 0xcc8   : > { %v7790_v45 = vpop.f32.mrf.mxu1  ;;  %v7812_v47 = vpop.f32.mrf.mxu0 }
 0xcc9   : > { %v3466_v48 = vadd.f32 %v7810_v21, %v3426_v44  ;;  %v8420_v21 = vld [vmem:[%s10402_s3 + $0x50] ss:$8 sps:$4 sm:$0xff]   ;;  %v8423_v44 = vld [vmem:[%s10402_s3 + $0x40] ss:$8 sps:$4 sm:$0xff]  }
 0xce2   : > { %v7830_v49 = vpop.f32.mrf.mxu1  ;;  %v7852_v50 = vpop.f32.mrf.mxu0 }
 0xce4   : > { %v7831_v51 = vpop.f32.mrf.mxu1  ;;  %v7853_v46 = vpop.f32.mrf.mxu0 }
 0xce5   : > { %v7832_v8 = vadd.f32 %v7831_v51, %v7830_v49  ;;  %v7854_v58 = vadd.f32 %v7853_v46, %v7852_v50  ;;  %v7164_v50 = vld [vmem:[%s10412_s13] ss:$0 sm:$0xff] }
 0xce6   : > { %v7833_v54 = vpop.f32.mrf.mxu1  ;;  %v7855_v55 = vpop.f32.mrf.mxu0  ;;  %v7165_v46 = vld [vmem:[%s10413_s14] ss:$0 sm:$0xff] }
 0xce7   : > { %v3506_v9 = vadd.f32 %v7832_v8, %v3466_v48 }
 0xce8   : > { %v7834_v56 = vpop.f32.mrf.mxu1  ;;  %v7856_v61 = vpop.f32.mrf.mxu0 }
 0xce9   : > { %v3546_v13 = vadd.f32 %v7854_v58, %v3506_v9  ;;  %v7174_v61 = vld [vmem:[%s10403_s4 + $0x2] sm:$0x3] }
 0xd02   : > { %v7874_v62 = vpop.f32.mrf.mxu1 }
 0xd03   : > { %v7896_v63 = vpop.f32.mrf.mxu0 }
 0xd04   : > { %v7875_v3 = vpop.f32.mrf.mxu1 }
 0xd05   : > { %v7897_v4 = vpop.f32.mrf.mxu0  ;;  %v7876_v11 = vadd.f32 %v7875_v3, %v7874_v62  ;;  %v3757_v62 = vrot.slane %v7174_v61, %v8771_v20 }
 0xd06   : > { %v7877_v5 = vpop.f32.mrf.mxu1  ;;  %v7898_v17 = vadd.f32 %v7897_v4, %v7896_v63  ;;  %v3761_v63 = vrot.slane %v7174_v61, %v8777_v22 }
 0xd07   : > { %v7899_v19 = vpop.f32.mrf.mxu0  ;;  %v3586_v14 = vadd.f32 %v7876_v11, %v3546_v13 }
 0xd08   : > { %v7878_v6 = vpop.f32.mrf.mxu1 }
 0xd09   : > { %v7900_v7 = vpop.f32.mrf.mxu0  ;;  %v3626_v25 = vadd.f32 %v7898_v17, %v3586_v14 }
 0xd22   : > { %v7918_v16 = vpop.f32.mrf.mxu1 }
 0xd23   : > { %v7940_v23 = vpop.f32.mrf.mxu0 }
 0xd24   : > { %v7919_v24 = vpop.f32.mrf.mxu1 }
 0xd25   : > { %v7920_v26 = vadd.f32 %v7919_v24, %v7918_v16  ;;  %v7941_v27 = vpop.f32.mrf.mxu0 }
 0xd26   : > { %v7921_v29 = vpop.f32.mrf.mxu1  ;;  %v7942_v10 = vadd.f32 %v7941_v27, %v7940_v23 }
 0xd27   : > { %v3666_v30 = vadd.f32 %v7920_v26, %v3626_v25  ;;  %v7943_v31 = vpop.f32.mrf.mxu0 }
 0xd28   : > { %v7922_v32 = vpop.f32.mrf.mxu1 }
 0xd29   : > { %v3706_v15 = vadd.f32 %v7942_v10, %v3666_v30  ;;  %v7944_v33 = vpop.f32.mrf.mxu0 }
 0xd2b   : > { %v3711_v34 = vadd.f32 %v3706_v15, %v8964_v52  ;;  %v8419_v52 = vld [vmem:[%s10402_s3 + $0x64] ss:$8 sps:$4 sm:$0xff]  }
 0xd2c   : > { %3817 = vmatprep.subr.bf16.mxu1 %v8419_v52 }
 0xd2d   : > { %v3714_v35 = vsel %vm693_vm3, %v3711_v34, 0.0  ;;  %3818 = vmatpush1.bf16.msra.mxu1 %v8417_v41 }
 0xd2e   : > { %3715 = vadd.xlane.f32.xlu0 %v3714_v35  ;;  %3819 = vmatprep.subr.bf16.mxu1 %v8422_v42 }
 0xd31   : > { %3820 = vmatpush1.bf16.msra.mxu1 %v8420_v21 }
 0xd32   : > { %3821 = vmatprep.subr.bf16.mxu1 %v8425_v43 }
 0xd35   : > { %3822 = vmatpush1.bf16.msra.mxu1 %v8423_v44 }
 0xd36   : > { %8205 = vmatprep.subr.mxu1 %v8606_v2 }
 0xdb7   : > { %v3716_v60 = vpop.xlane.xlu0 %3715 }
 0xdb8   : > { %v3717_v36 = vmul.f32 0.015625, %v3716_v60 }
 0xdba   : > { %v3718_v37 = vsub.f32 %v3711_v34, %v3717_v36 }
 0xdbc   : > { %v3719_v38 = vmul.f32 %v3718_v37, %v3718_v37 }
 0xdbe   : > { %v3720_v39 = vsel %vm693_vm3, %v3719_v38, 0.0 }
 0xdbf   : > { %3721 = vadd.xlane.f32.xlu0 %v3720_v39 }
 0xe48   : > { %v3722_v45 = vpop.xlane.xlu0 %3721 }
 0xe49   : > { %v3723_v47 = vmul.f32 0.015625, %v3722_v45 }
 0xe4b   : > { %v3724_v48 = vadd.f32 1e-05, %v3723_v47 }
 0xe4d   : > { %8576 = vrsqrt.f32 %v3724_v48 }
 0xe5a   : > { %v8577_v49 = vpop.eup %8576 }
 0xe5b   : > { %v3726_v51 = vmul.f32 %v8577_v49, %v3718_v37 }
 0xe5d   : > { %v3733_v54 = vmul.f32 %v7164_v50, %v3726_v51 }
 0xe5f   : > { %v9609_v55 = vadd.f32 %v7165_v46, %v3733_v54 }
 0xe61   : > { %v3741_v56 = vpack.c.bf16 %v9609_v55, %v9609_v55 }
 0xe63   : > { %7183 = vmatmul.mubr.msk.bf16.vlgmr.msra.gmra.mxu1 %vm693_vm3, %v3741_v56 }
 0xe64   : > { %8207 = vmatprep.mubr.msk.f32.mxu1 %vm8607_vm1, %v8606_v2 }
 0xf23   : > { %v3841_v3 = vpop.f32.mrf.mxu1 }
 0xf24   : > { %v3842_v4 = vadd.f32 %v3841_v3, %v3757_v62 }
 0xf25   : > { %v3843_v5 = vpop.f32.mrf.mxu1 }
 0xf26   : > { %v9621_v19 = vadd.f32 %v3843_v5, %v3761_v63  ;;  %4011 = vrot.lane.b32.xlu0 %v3842_v4, %s8609_s28  ;;  %3849 = vrot.lane.b32.xlu1 %v3842_v4, %s8610_s29 }
 0xf27   : > { %v3845_v6 = vpop.f32.mrf.mxu1 }
 0xf28   : > { %8206 = vmatpush3.msra.mxu1 %v9621_v19 }
 0xf29   : > { %v3846_v7 = vpop.f32.mrf.mxu1  ;;  %8215 = vmatprep.subr.mxu1 %v8606_v2 }
 0xf2a   : > { %4175 = vrot.lane.b32.xlu0 %v3842_v4, %s8612_s16  ;;  %4009 = vrot.lane.b32.xlu1 %v3842_v4, %s8611_s0 }
 0xf2e   : > { %4340 = vrot.lane.b32.xlu0 %v3842_v4, %s10427_s30  ;;  %4177 = vrot.lane.b32.xlu1 %v3842_v4, %s10428_s18 }
 0xf32   : > { %4342 = vrot.lane.b32.xlu1 %v3842_v4, %s10429_s19 }
 0xf98   : > { %v3850_v8 = vpop.permute.xlu1 %3849  ;;  %v4012_v9 = vpop.permute.xlu0 %4011 }
 0xf99   : > { %8201 = vmatpush3.xpose.msk.msra.mxu0 %vm741_vm4, %v3850_v8 }
 0xf9a   : > { %8210 = vmatprep.subr.mxu0 %v8606_v2 }
 0xf9c   : > { %8203 = vmatmul.mubr.msk.f32.vlgmr.msra.gmra.mxu0 %vm741_vm4, %v3842_v4  ;;  %v4010_v58 = vpop.permute.xlu1 %4009  ;;  %v4176_v13 = vpop.permute.xlu0 %4175 }
 0xf9d   : > { %8211 = vmatpush3.xpose.msk.msra.mxu0 %vm741_vm4, %v4012_v9  ;;  %8212 = vmatprep.mubr.msk.f32.mxu0 %vm8607_vm1, %v8606_v2  ;;  %v8426_v9 = vld [vmem:[%s10404_s5 + $0x38] sm:$0xff]  }
 0xf9e   : > { %8220 = vmatprep.subr.mxu0 %v8606_v2 }
 0xfa0   : > { %8213 = vmatmul.mubr.msk.f32.vlgmr.msra.gmra.mxu0 %vm741_vm4, %v4010_v58  ;;  %v4178_v11 = vpop.permute.xlu1 %4177  ;;  %v4341_v16 = vpop.permute.xlu0 %4340  ;;  %v8427_v58 = vld [vmem:[%s10404_s5 + $0x30] sm:$0xff]  }
 0xfa1   : > { %8221 = vmatpush3.xpose.msk.msra.mxu0 %vm741_vm4, %v4178_v11  ;;  %8222 = vmatprep.mubr.msk.f32.mxu0 %vm8607_vm1, %v8606_v2 }
 0xfa2   : > { %8230 = vmatprep.subr.mxu0 %v8606_v2 }
 0xfa4   : > { %8223 = vmatmul.mubr.msk.f32.vlgmr.msra.gmra.mxu0 %vm741_vm4, %v4176_v13  ;;  %v4343_v14 = vpop.permute.xlu1 %4342 }
 0xfa5   : > { %8231 = vmatpush3.xpose.msk.msra.mxu0 %vm741_vm4, %v4343_v14  ;;  %8232 = vmatprep.mubr.msk.f32.mxu0 %vm8607_vm1, %v8606_v2  ;;  %v8428_v14 = vld [vmem:[%s10404_s5 + $0x28] sm:$0xff]  }
 0xfa6   : > { %8240 = vmatprep.subr.bf16.mxu0 %v8606_v2 }
 0xfa8   : > { %8233 = vmatmul.mubr.msk.f32.vlgmr.msra.gmra.mxu0 %vm741_vm4, %v4341_v16 }
 0xfa9   : > { %8248 = vmatprep.mubr.msk.bf16.mxu0 %vm8607_vm1, %v8606_v2  ;;  %8241 = vmatpush3.bf16.msra.mxu0 %v8426_v9 }
 0xfaa   : > { %8242 = vmatprep.subr.bf16.mxu0 %v8606_v2 }
 0xfad   : > { %8243 = vmatpush3.bf16.msra.mxu0 %v8427_v58  ;;  %v7215_v58 = vld [vmem:[%s10406_s7 + $0x200] sm:$0xff] }
 0xfae   : > { %8244 = vmatprep.subr.bf16.mxu0 %v8606_v2 }
 0xfb1   : > { %8245 = vmatpush3.bf16.msra.mxu0 %v8428_v14 }
 0xfb2   : > { %8246 = vmatprep.subr.bf16.mxu0 %v8606_v2 }
0x105c   : > { %v3921_v17 = vpop.f32.mrf.mxu0 }
0x105d   : > { %v3925_v23 = vsel %vm816_vm5, %v3921_v17, -inf }
0x105e   : > { %3926 = vmax.xlane.f32.xlu1 %v3925_v23  ;;  %v8204_v24 = vpop.f32.mrf.mxu0 }
0x1060   : > { %v4083_v25 = vpop.f32.mrf.mxu0 }
0x1061   : > { %v4087_v26 = vsel %vm816_vm5, %v4083_v25, -inf }
0x1062   : > { %4088 = vmax.xlane.f32.xlu0 %v4087_v26  ;;  %v8214_v27 = vpop.f32.mrf.mxu0 }
0x1064   : > { %v4249_v29 = vpop.f32.mrf.mxu0 }
0x1065   : > { %v4253_v30 = vsel %vm816_vm5, %v4249_v29, -inf }
0x1066   : > { %4254 = vmax.xlane.f32.xlu0 %v4253_v30  ;;  %v8224_v10 = vpop.f32.mrf.mxu0 }
0x1068   : > { %v4414_v31 = vpop.f32.mrf.mxu0 }
0x1069   : > { %v4418_v32 = vsel %vm816_vm5, %v4414_v31, -inf }
0x106a   : > { %4419 = vmax.xlane.f32.xlu1 %v4418_v32  ;;  %v8234_v15 = vpop.f32.mrf.mxu0 }
0x10e7   : > { %v3927_v33 = vpop.xlane.xlu1 %3926 }
0x10e8   : > { %v3928_v34 = vsub.f32 %v3921_v17, %v3927_v33  ;;  %v7205_v33 = vld [vmem:[%s10405_s6 + $0x1] ss:$0 sm:$0xff] }
0x10ea   : > { %v3929_v35 = vmul.f32 1.442695, %v3928_v34 }
0x10eb   : > { %v4089_v60 = vpop.xlane.xlu0 %4088 }
0x10ec   : > { %8578 = vpow2.f32 %v3929_v35  ;;  %v4090_v36 = vsub.f32 %v4083_v25, %v4089_v60  ;;  %v8429_v25 = vld [vmem:[%s10404_s5 + $0x20] sm:$0xff]  }
0x10ed   : > { %8247 = vmatpush3.bf16.msra.mxu0 %v8429_v25  ;;  %v7265_v25 = vld [vmem:[%s10406_s7 + $0x390] sm:$0xff] }
0x10ee   : > { %v4091_v37 = vmul.f32 1.442695, %v4090_v36 }
0x10ef   : > { %v4255_v38 = vpop.xlane.xlu0 %4254 }
0x10f0   : > { %8580 = vpow2.f32 %v4091_v37  ;;  %v4256_v39 = vsub.f32 %v4249_v29, %v4255_v38 }
0x10f2   : > { %v4257_v18 = vmul.f32 1.442695, %v4256_v39 }
0x10f3   : > { %v4420_v44 = vpop.xlane.xlu1 %4419 }
0x10f4   : > { %8582 = vpow2.f32 %v4257_v18  ;;  %v4421_v45 = vsub.f32 %v4414_v31, %v4420_v44 }
0x10f6   : > { %v4422_v47 = vmul.f32 1.442695, %v4421_v45  ;;  %v7272_v45 = vld [vmem:[%s10406_s7 + $0x3c8] sm:$0xff] }
0x10f8   : > { %8584 = vpow2.f32 %v4422_v47 }
0x10f9   : > { %v8579_v40 = vpop.eup %8578 }
0x10fa   : > { %v3931_v52 = vsel %vm816_vm5, %v8579_v40, 0.0 }
0x10fb   : > { %3932 = vadd.xlane.f32.xlu0 %v3931_v52 }
0x10fd   : > { %v8581_v41 = vpop.eup %8580 }
0x10fe   : > { %v4093_v21 = vsel %vm816_vm5, %v8581_v41, 0.0 }
0x10ff   : > { %4094 = vadd.xlane.f32.xlu1 %v4093_v21 }
0x1101   : > { %v8583_v42 = vpop.eup %8582 }
0x1102   : > { %v4259_v43 = vsel %vm816_vm5, %v8583_v42, 0.0 }
0x1103   : > { %4260 = vadd.xlane.f32.xlu0 %v4259_v43  ;;  %v7264_v43 = vld [vmem:[%s10406_s7 + $0x388] sm:$0xff] }
0x1105   : > { %v8585_v48 = vpop.eup %8584 }
0x1106   : > { %v4424_v49 = vsel %vm816_vm5, %v8585_v48, 0.0 }
0x1110   : > { %4264 = vrot.lane.b32.xlu1 %v9621_v19, %s8612_s16 }
0x1119   : > { %4099 = vrot.lane.b32.xlu0 %v9621_v19, %s8611_s0 }
0x1134   : > { %4425 = vadd.xlane.f32.xlu1 %v4424_v49  ;;  %v7332_v49 = vcombine.high %v7264_v43, %v7272_v45 }
0x1136   : > { %5160 = vmatprep.subr.bf16.mxu0 %v7332_v49 }
0x1145   : > { %4429 = vrot.lane.b32.xlu1 %v9621_v19, %s10427_s30 }
0x1184   : > { %v3933_v50 = vpop.xlane.xlu0 %3932 }
0x1185   : > { %8586 = vrcp.f32 %v3933_v50  ;;  %v7247_v50 = vld [vmem:[%s10406_s7 + $0x300] sm:$0xff] }
0x1188   : > { %v4095_v51 = vpop.xlane.xlu1 %4094 }
0x1189   : > { %8588 = vrcp.f32 %v4095_v51  ;;  %v7255_v51 = vld [vmem:[%s10406_s7 + $0x340] sm:$0xff] }
0x118c   : > { %v4261_v46 = vpop.xlane.xlu0 %4260  ;;  %v4265_v3 = vpop.permute.xlu1 %4264 }
0x118d   : > { %8590 = vrcp.f32 %v4261_v46  ;;  %v7248_v46 = vld [vmem:[%s10406_s7 + $0x308] sm:$0xff] }
0x1190   : > { %v4100_v61 = vpop.permute.xlu0 %4099 }
0x1192   : > { %v8587_v54 = vpop.eup %8586 }
0x1193   : > { %v3935_v56 = vmul.f32 %v8587_v54, %v8579_v40  ;;  %v7314_v54 = vcombine.high %v7247_v50, %v7255_v51 }
0x1195   : > { %8208 = vmatmul.mubr.msk.f32.vlgmr.msra.gmra.mxu1 %vm816_vm5, %v3935_v56  ;;  %v7256_v56 = vld [vmem:[%s10406_s7 + $0x348] sm:$0xff] }
0x1196   : > { %v8589_v62 = vpop.eup %8588  ;;  %8216 = vmatpush3.msra.mxu1 %v4100_v61  ;;  %8217 = vmatprep.mubr.msk.f32.mxu1 %vm8607_vm1, %v8606_v2  ;;  %v7313_v61 = vcombine.low %v7247_v50, %v7255_v51  ;;  %v7217_v51 = vld [vmem:[%s10406_s7 + $0x210] sm:$0xff] }
0x1197   : > { %8225 = vmatprep.subr.mxu1 %v8606_v2  ;;  %v4097_v63 = vmul.f32 %v8589_v62, %v8581_v41  ;;  %v7315_v62 = vcombine.low %v7248_v46, %v7256_v56 }
0x1199   : > { %8218 = vmatmul.mubr.msk.f32.vlgmr.msra.gmra.mxu1 %vm816_vm5, %v4097_v63  ;;  %v7316_v63 = vcombine.high %v7248_v46, %v7256_v56  ;;  %v7225_v46 = vld [vmem:[%s10406_s7 + $0x250] sm:$0xff]  ;;  %v7226_v56 = vld [vmem:[%s10406_s7 + $0x258] sm:$0xff] }
0x119a   : > { %v8591_v4 = vpop.eup %8590  ;;  %8226 = vmatpush3.msra.mxu1 %v4265_v3  ;;  %8227 = vmatprep.mubr.msk.f32.mxu1 %vm8607_vm1, %v8606_v2  ;;  %v7231_v3 = vld [vmem:[%s10406_s7 + $0x280] sm:$0xff] }
0x119b   : > { %v4263_v5 = vmul.f32 %v8591_v4, %v8583_v42  ;;  %8235 = vmatprep.subr.mxu1 %v8606_v2  ;;  %v7263_v42 = vld [vmem:[%s10406_s7 + $0x380] sm:$0xff] }
0x119c   : > { %v7239_v4 = vld [vmem:[%s10406_s7 + $0x2c0] sm:$0xff] }
0x119d   : > { %8228 = vmatmul.mubr.msk.f32.vlgmr.msra.gmra.mxu1 %vm816_vm5, %v4263_v5  ;;  %v7232_v5 = vld [vmem:[%s10406_s7 + $0x288] sm:$0xff] }
0x119e   : > { %8237 = vmatprep.mubr.msk.f32.mxu1 %vm8607_vm1, %v8606_v2 }
0x11bd   : > { %v4426_v19 = vpop.xlane.xlu1 %4425 }
0x11be   : > { %8592 = vrcp.f32 %v4426_v19  ;;  %v7298_v19 = vcombine.high %v7231_v3, %v7239_v4 }
0x11c1   : > { %v4430_v6 = vpop.permute.xlu1 %4429 }
0x11c2   : > { %8236 = vmatpush3.msra.mxu1 %v4430_v6  ;;  %v7240_v6 = vld [vmem:[%s10406_s7 + $0x2c8] sm:$0xff] }
0x11c3   : > { %v7300_v9 = vcombine.high %v7232_v5, %v7240_v6 }
0x11cb   : > { %v8593_v7 = vpop.eup %8592 }
0x11cc   : > { %v4428_v8 = vmul.f32 %v8593_v7, %v8585_v48  ;;  %v7331_v48 = vcombine.low %v7264_v43, %v7272_v45  ;;  %v7297_v7 = vcombine.low %v7231_v3, %v7239_v4  ;;  %v7241_v43 = vld [vmem:[%s10406_s7 + $0x2d0] sm:$0xff]  ;;  %v7242_v45 = vld [vmem:[%s10406_s7 + $0x2d8] sm:$0xff]  ;;  %v7267_v4 = vld [vmem:[%s10406_s7 + $0x3a0] sm:$0xff] }
0x11ce   : > { %8238 = vmatmul.mubr.msk.f32.vlgmr.msra.gmra.mxu1 %vm816_vm5, %v4428_v8  ;;  %v7299_v8 = vcombine.low %v7232_v5, %v7240_v6  ;;  %v7275_v5 = vld [vmem:[%s10406_s7 + $0x3e0] sm:$0xff]  ;;  %v7276_v6 = vld [vmem:[%s10406_s7 + $0x3e8] sm:$0xff] }
0x11cf   : > { %5143 = vmatprep.mubr.bf16.mxu1 %v8608_v12 }
0x1255   : > { %v4005_v11 = vpop.f32.mrf.mxu1 }
0x1257   : > { %v8209_v13 = vpop.f32.mrf.mxu1 }
0x1258   : > { %v7216_v13 = vld [vmem:[%s10406_s7 + $0x208] sm:$0xff] }
0x1259   : > { %v4171_v16 = vpop.f32.mrf.mxu1 }
0x125a   : > { %4506 = vrot.lane.b32.xlu0 %v4171_v16, %s10429_s19  ;;  %v7224_v16 = vld [vmem:[%s10406_s7 + $0x248] sm:$0xff] }
0x125b   : > { %v8219_v17 = vpop.f32.mrf.mxu1 }
0x125d   : > { %v4336_v23 = vpop.f32.mrf.mxu1 }
0x125e   : > { %4510 = vrot.lane.b32.xlu1 %v4336_v23, %s10428_s18  ;;  %v7283_v23 = vcombine.low %v7216_v13, %v7224_v16 }
0x125f   : > { %v8229_v24 = vpop.f32.mrf.mxu1 }
0x1260   : > { %v7284_v24 = vcombine.high %v7216_v13, %v7224_v16  ;;  %v7259_v13 = vld [vmem:[%s10406_s7 + $0x360] sm:$0xff]  ;;  %v7260_v16 = vld [vmem:[%s10406_s7 + $0x368] sm:$0xff] }
0x128e   : > { %v4501_v26 = vpop.f32.mrf.mxu1 }
0x128f   : > { %4514 = vrot.lane.b32.xlu0 %v4501_v26, %s8609_s28  ;;  %v7273_v26 = vld [vmem:[%s10406_s7 + $0x3d0] sm:$0xff] }
0x1290   : > { %v8239_v27 = vpop.f32.mrf.mxu1 }
0x1291   : > { %v7266_v27 = vld [vmem:[%s10406_s7 + $0x398] sm:$0xff] }
0x12cc   : > { %v4507_v29 = vpop.permute.xlu0 %4506 }
0x12cd   : > { %v4517_v10 = vsel %vm741_vm4, %v4005_v11, %v4507_v29  ;;  %v7223_v11 = vld [vmem:[%s10406_s7 + $0x240] sm:$0xff]  ;;  %v7333_v29 = vcombine.low %v7265_v25, %v7273_v26 }
0x12ce   : > { %v7282_v14 = vcombine.high %v7215_v58, %v7223_v11  ;;  %v7281_v17 = vcombine.low %v7215_v58, %v7223_v11  ;;  %v7251_v11 = vld [vmem:[%s10406_s7 + $0x320] sm:$0xff] }
0x12d0   : > { %v4511_v30 = vpop.permute.xlu1 %4510 }
0x12d1   : > { %v4518_v31 = vsel %vm1410_vm6, %v4517_v10, %v4511_v30  ;;  %v7334_v30 = vcombine.high %v7265_v25, %v7273_v26  ;;  %v7274_v10 = vld [vmem:[%s10406_s7 + $0x3d8] sm:$0xff]  ;;  %v7235_v26 = vld [vmem:[%s10406_s7 + $0x2a0] sm:$0xff] }
0x1301   : > { %v4515_v2 = vpop.permute.xlu0 %4514 }
0x1302   : > { %v4519_v32 = vsel %vm1412_vm7, %v4518_v31, %v4515_v2  ;;  %v7335_v31 = vcombine.low %v7266_v27, %v7274_v10  ;;  %v7336_v2 = vcombine.high %v7266_v27, %v7274_v10  ;;  %v7243_v27 = vld [vmem:[%s10406_s7 + $0x2e0] sm:$0xff]  ;;  %v7321_v10 = vcombine.low %v7251_v11, %v7259_v13 }
0x1303   : > { %v4520_v15 = vpack.c.bf16 %v4519_v32, %v4519_v32 }
0x1305   : > { %8249 = vmatmul.mubr.msk.bf16.vlgmr.msra.gmra.mxu0 %vm693_vm3, %v4520_v15 }
0x1306   : > { %5184 = vmatprep.mubr.bf16.mxu0 %v8608_v12  ;;  %5161 = vmatpush1.bf16.msra.mxu0 %v7331_v48 }
0x1307   : > { %5162 = vmatprep.subr.bf16.mxu0 %v7316_v63  ;;  %v7286_v63 = vcombine.high %v7217_v51, %v7225_v46 }
0x130a   : > { %5163 = vmatpush1.bf16.msra.mxu0 %v7315_v62 }
0x130b   : > { %5164 = vmatprep.subr.bf16.mxu0 %v7300_v9  ;;  %v7338_v9 = vcombine.high %v7267_v4, %v7275_v5 }
0x130e   : > { %5165 = vmatpush1.bf16.msra.mxu0 %v7299_v8 }
0x130f   : > { %5166 = vmatprep.subr.bf16.mxu0 %v7284_v24  ;;  %v7322_v24 = vcombine.high %v7251_v11, %v7259_v13 }
0x1312   : > { %5167 = vmatpush1.bf16.msra.mxu0 %v7283_v23 }
0x1313   : > { %5242 = vmatprep.subr.bf16.mxu0 %v7336_v2  ;;  %v7306_v2 = vcombine.high %v7235_v26, %v7243_v27 }
0x13c5   : > { %v4599_v34 = vpop.f32.mrf.mxu0 }
0x13c6   : > { %v4600_v35 = vadd.f32 %v7205_v33, %v4599_v34 }
0x13c7   : > { %v8250_v60 = vpop.f32.mrf.mxu0 }
0x13c8   : > { %v4605_v36 = vadd.f32 %v4600_v35, %v9609_v55  ;;  %v7271_v55 = vld [vmem:[%s10406_s7 + $0x3c0] sm:$0xff] }
0x13c9   : > { %v4602_v37 = vpop.f32.mrf.mxu0  ;;  %v7330_v44 = vcombine.high %v7263_v42, %v7271_v55  ;;  %v7329_v47 = vcombine.low %v7263_v42, %v7271_v55  ;;  %v7213_v35 = vld [vmem:[%s10410_s11 + $0x1] ss:$0 sm:$0xff]  ;;  %v7233_v55 = vld [vmem:[%s10406_s7 + $0x290] sm:$0xff] }
0x13ca   : > { %v4610_v38 = vsel %vm693_vm3, %v4605_v36, 0.0  ;;  %v7302_v49 = vcombine.high %v7233_v55, %v7241_v43 }
0x13cb   : > { %4611 = vadd.xlane.f32.xlu1 %v4610_v38  ;;  %v8251_v39 = vpop.f32.mrf.mxu0  ;;  %5119 = vmatprep.subr.bf16.mxu1 %v7330_v44  ;;  %v7249_v38 = vld [vmem:[%s10406_s7 + $0x310] sm:$0xff]  ;;  %v7234_v44 = vld [vmem:[%s10406_s7 + $0x298] sm:$0xff] }
0x13cc   : > { %5120 = vmatpush1.bf16.msra.mxu1 %v7329_v47  ;;  %v7257_v39 = vld [vmem:[%s10406_s7 + $0x350] sm:$0xff]  ;;  %v7304_v50 = vcombine.high %v7234_v44, %v7242_v45  ;;  %v7303_v62 = vcombine.low %v7234_v44, %v7242_v45 }
0x13cd   : > { %5121 = vmatprep.subr.bf16.mxu1 %v7314_v54  ;;  %v7317_v47 = vcombine.low %v7249_v38, %v7257_v39  ;;  %v7218_v54 = vld [vmem:[%s10406_s7 + $0x218] sm:$0xff]  ;;  %v7253_v45 = vld [vmem:[%s10406_s7 + $0x330] sm:$0xff] }
0x13ce   : > { %v7288_v3 = vcombine.high %v7218_v54, %v7226_v56  ;;  %v7287_v8 = vcombine.low %v7218_v54, %v7226_v56  ;;  %v7237_v56 = vld [vmem:[%s10406_s7 + $0x2b0] sm:$0xff] }
0x13d0   : > { %5122 = vmatpush1.bf16.msra.mxu1 %v7313_v61  ;;  %v7301_v61 = vcombine.low %v7233_v55, %v7241_v43 }
0x13d1   : > { %5123 = vmatprep.subr.bf16.mxu1 %v7298_v19  ;;  %v7268_v19 = vld [vmem:[%s10406_s7 + $0x3a8] sm:$0xff] }
0x13d2   : > { %v7340_v58 = vcombine.high %v7268_v19, %v7276_v6  ;;  %v7339_v23 = vcombine.low %v7268_v19, %v7276_v6  ;;  %v7221_v6 = vld [vmem:[%s10406_s7 + $0x230] sm:$0xff] }
0x13d4   : > { %5124 = vmatpush1.bf16.msra.mxu1 %v7297_v7  ;;  %v7285_v7 = vcombine.low %v7217_v51, %v7225_v46 }
0x13d5   : > { %5125 = vmatprep.subr.bf16.mxu1 %v7282_v14  ;;  %v7252_v14 = vld [vmem:[%s10406_s7 + $0x328] sm:$0xff] }
0x13d6   : > { %v7324_v25 = vcombine.high %v7252_v14, %v7260_v16 }
0x13d8   : > { %5126 = vmatpush1.bf16.msra.mxu1 %v7281_v17  ;;  %v7337_v17 = vcombine.low %v7267_v4, %v7275_v5 }
0x13d9   : > { %5201 = vmatprep.subr.bf16.mxu1 %v7334_v30  ;;  %v7244_v30 = vld [vmem:[%s10406_s7 + $0x2e8] sm:$0xff] }
0x1454   : > { %v4612_v18 = vpop.xlane.xlu1 %4611 }
0x1455   : > { %v4613_v40 = vmul.f32 0.015625, %v4612_v18  ;;  %v7250_v18 = vld [vmem:[%s10406_s7 + $0x318] sm:$0xff] }
0x1457   : > { %v9707_v52 = vsub.f32 %v4605_v36, %v4613_v40  ;;  %v7214_v36 = vld [vmem:[%s10411_s12 + $0x1] ss:$0 sm:$0xff]  ;;  %v7258_v40 = vld [vmem:[%s10406_s7 + $0x358] sm:$0xff] }
0x1458   : > { %v7320_v42 = vcombine.high %v7250_v18, %v7258_v40  ;;  %v7319_v48 = vcombine.low %v7250_v18, %v7258_v40  ;;  %v7277_v18 = vld [vmem:[%s10406_s7 + $0x3f0] sm:$0xff]  ;;  %v7270_v40 = vld [vmem:[%s10406_s7 + $0x3b8] sm:$0xff] }
0x1459   : > { %v4615_v41 = vmul.f32 %v9707_v52, %v9707_v52 }
0x145b   : > { %v4616_v21 = vsel %vm693_vm3, %v4615_v41, 0.0 }
0x145c   : > { %4617 = vadd.xlane.f32.xlu0 %v4616_v21  ;;  %v7318_v21 = vcombine.high %v7249_v38, %v7257_v39  ;;  %v7269_v39 = vld [vmem:[%s10406_s7 + $0x3b0] sm:$0xff] }
0x145d   : > { %v7342_v43 = vcombine.high %v7269_v39, %v7277_v18 }
0x14e5   : > { %v4618_v32 = vpop.xlane.xlu0 %4617 }
0x14e6   : > { %v4619_v15 = vmul.f32 0.015625, %v4618_v32 }
0x14e8   : > { %v4620_v33 = vadd.f32 1e-05, %v4619_v15  ;;  %v7219_v15 = vld [vmem:[%s10406_s7 + $0x220] sm:$0xff] }
0x14ea   : > { %8594 = vrsqrt.f32 %v4620_v33  ;;  %v7227_v33 = vld [vmem:[%s10406_s7 + $0x260] sm:$0xff] }
0x14f7   : > { %v8595_v34 = vpop.eup %8594 }
0x14f8   : > { %v4622_v60 = vmul.f32 %v8595_v34, %v9707_v52  ;;  %v7220_v34 = vld [vmem:[%s10406_s7 + $0x228] sm:$0xff] }
0x14fa   : > { %v4629_v37 = vmul.f32 %v7213_v35, %v4622_v60  ;;  %v7228_v35 = vld [vmem:[%s10406_s7 + $0x268] sm:$0xff]  ;;  %v7305_v60 = vcombine.low %v7235_v26, %v7243_v27  ;;  %v8434_v26 = vld [vmem:[%s10408_s9 + $0x470] sm:$0xff]  }
0x14fb   : > { %v7292_v38 = vcombine.high %v7220_v34, %v7228_v35  ;;  %v7291_v55 = vcombine.low %v7220_v34, %v7228_v35  ;;  %v8435_v27 = vld [vmem:[%s10408_s9 + $0x4f0] sm:$0xff]   ;;  %v8445_v34 = vld [vmem:[%s10408_s9 + $0x4a0] sm:$0xff]   ;;  %v8446_v35 = vld [vmem:[%s10408_s9 + $0x458] sm:$0xff]  }
0x14fc   : > { %v9791_v52 = vadd.f32 %v7214_v36, %v4629_v37  ;;  %v7290_v37 = vcombine.high %v7219_v15, %v7227_v33 }
0x14fe   : > { %v9795_v41 = vpack.c.bf16 %v9791_v52, %v9791_v52 }
0x1500   : > { %7345 = vmatmul.mubr.msk.bf16.vlgmr.msra.gmra.mxu1 %vm693_vm3, %v9795_v41  ;;  %7346 = vmatmul.mubr.msk.bf16.vlgmr.msra.gmra.mxu0 %vm693_vm3, %v9795_v41 }
0x1501   : > { %5202 = vmatpush1.bf16.msra.mxu1 %v7333_v29  ;;  %5243 = vmatpush1.bf16.msra.mxu0 %v7335_v31  ;;  %v7236_v29 = vld [vmem:[%s10406_s7 + $0x2a8] sm:$0xff]  ;;  %v7323_v31 = vcombine.low %v7252_v14, %v7260_v16 }
0x1502   : > { %5203 = vmatprep.subr.bf16.mxu1 %v7318_v21  ;;  %5244 = vmatprep.subr.bf16.mxu0 %v7320_v42  ;;  %v7308_v32 = vcombine.high %v7236_v29, %v7244_v30  ;;  %v7307_v36 = vcombine.low %v7236_v29, %v7244_v30  ;;  %v7278_v21 = vld [vmem:[%s10406_s7 + $0x3f8] sm:$0xff]  ;;  %v7289_v42 = vcombine.low %v7219_v15, %v7227_v33  ;;  %v8436_v29 = vld [vmem:[%s10408_s9 + $0x430] sm:$0xff]   ;;  %v8443_v15 = vld [vmem:[%s10408_s9 + $0x4e0] sm:$0xff]  }
0x1503   : > { %5225 = vmatprep.mubr.bf16.mxu1 %v8608_v12  ;;  %5266 = vmatprep.mubr.bf16.mxu0 %v8608_v12  ;;  %v7344_v44 = vcombine.high %v7270_v40, %v7278_v21  ;;  %v7343_v51 = vcombine.low %v7270_v40, %v7278_v21  ;;  %v8437_v30 = vld [vmem:[%s10408_s9 + $0x4b0] sm:$0xff]   ;;  %v8444_v33 = vld [vmem:[%s10408_s9 + $0x420] sm:$0xff]   ;;  %v8454_v21 = vld [vmem:[%s10408_s9 + $0x448] sm:$0xff]  }
0x1504   : > { %v8453_v40 = vld [vmem:[%s10408_s9 + $0x490] sm:$0xff]  }
0x1505   : > { %5204 = vmatpush1.bf16.msra.mxu1 %v7317_v47  ;;  %5245 = vmatpush1.bf16.msra.mxu0 %v7319_v48  ;;  %v7261_v47 = vld [vmem:[%s10406_s7 + $0x370] sm:$0xff]  ;;  %v7254_v48 = vld [vmem:[%s10406_s7 + $0x338] sm:$0xff] }
0x1506   : > { %5205 = vmatprep.subr.bf16.mxu1 %v7302_v49  ;;  %5246 = vmatprep.subr.bf16.mxu0 %v7304_v50  ;;  %v7262_v49 = vld [vmem:[%s10406_s7 + $0x378] sm:$0xff]  ;;  %v7341_v50 = vcombine.low %v7269_v39, %v7277_v18  ;;  %v7326_v46 = vcombine.high %v7253_v45, %v7261_v47  ;;  %v8451_v39 = vld [vmem:[%s10408_s9 + $0x4d0] sm:$0xff]  }
0x1507   : > { %v7328_v54 = vcombine.high %v7254_v48, %v7262_v49  ;;  %v7327_v4 = vcombine.low %v7254_v48, %v7262_v49  ;;  %v8452_v18 = vld [vmem:[%s10408_s9 + $0x410] sm:$0xff]   ;;  %v8461_v48 = vld [vmem:[%s10408_s9 + $0x480] sm:$0xff]   ;;  %v8462_v49 = vld [vmem:[%s10408_s9 + $0x578] sm:$0xff]  }
0x1509   : > { %5206 = vmatpush1.bf16.msra.mxu1 %v7301_v61  ;;  %5247 = vmatpush1.bf16.msra.mxu0 %v7303_v62  ;;  %v7245_v61 = vld [vmem:[%s10406_s7 + $0x2f0] sm:$0xff]  ;;  %v7238_v62 = vld [vmem:[%s10406_s7 + $0x2b8] sm:$0xff] }
0x150a   : > { %5207 = vmatprep.subr.bf16.mxu1 %v7286_v63  ;;  %5248 = vmatprep.subr.bf16.mxu0 %v7288_v3  ;;  %v7246_v63 = vld [vmem:[%s10406_s7 + $0x2f8] sm:$0xff]  ;;  %v7325_v3 = vcombine.low %v7253_v45, %v7261_v47  ;;  %v7310_v5 = vcombine.high %v7237_v56, %v7245_v61  ;;  %v8459_v45 = vld [vmem:[%s10408_s9 + $0x4c0] sm:$0xff]  }
0x150b   : > { %v7312_v19 = vcombine.high %v7238_v62, %v7246_v63  ;;  %v7311_v11 = vcombine.low %v7238_v62, %v7246_v63  ;;  %v8460_v47 = vld [vmem:[%s10408_s9 + $0x400] sm:$0xff]  }
0x150d   : > { %5208 = vmatpush1.bf16.msra.mxu1 %v7285_v7  ;;  %5249 = vmatpush1.bf16.msra.mxu0 %v7287_v8  ;;  %v7229_v7 = vld [vmem:[%s10406_s7 + $0x270] sm:$0xff]  ;;  %v7222_v8 = vld [vmem:[%s10406_s7 + $0x238] sm:$0xff] }
0x150e   : > { %5283 = vmatprep.subr.bf16.mxu1 %v7338_v9  ;;  %5324 = vmatprep.subr.bf16.mxu0 %v7340_v58  ;;  %v7230_v9 = vld [vmem:[%s10406_s7 + $0x278] sm:$0xff]  ;;  %v7309_v58 = vcombine.low %v7237_v56, %v7245_v61  ;;  %v7294_v13 = vcombine.high %v7221_v6, %v7229_v7  ;;  %v7293_v16 = vcombine.low %v7221_v6, %v7229_v7 }
0x150f   : > { %v7296_v14 = vcombine.high %v7222_v8, %v7230_v9 }
0x1510   : > { %7347 = vmatmul.mubr.msk.bf16.vlgmr.msra.gmra.mxu1 %vm693_vm3, %v9795_v41  ;;  %7348 = vmatmul.mubr.msk.bf16.vlgmr.msra.gmra.mxu0 %vm693_vm3, %v9795_v41 }
0x1511   : > { %5284 = vmatpush1.bf16.msra.mxu1 %v7337_v17  ;;  %5325 = vmatpush1.bf16.msra.mxu0 %v7339_v23  ;;  %v7295_v17 = vcombine.low %v7222_v8, %v7230_v9  ;;  %v8430_v23 = vld [vmem:[%s10408_s9 + $0x478] sm:$0xff]  }
0x1512   : > { %5285 = vmatprep.subr.bf16.mxu1 %v7322_v24  ;;  %5326 = vmatprep.subr.bf16.mxu0 %v7324_v25  ;;  %v8432_v24 = vld [vmem:[%s10408_s9 + $0x438] sm:$0xff]  }
0x1513   : > { %5307 = vmatprep.mubr.bf16.mxu1 %v8608_v12  ;;  %5348 = vmatprep.mubr.bf16.mxu0 %v8608_v12  ;;  %v8433_v25 = vld [vmem:[%s10408_s9 + $0x4b8] sm:$0xff]  }
0x1515   : > { %5286 = vmatpush1.bf16.msra.mxu1 %v7321_v10  ;;  %5327 = vmatpush1.bf16.msra.mxu0 %v7323_v31  ;;  %v8438_v10 = vld [vmem:[%s10408_s9 + $0x468] sm:$0xff]  }
0x1516   : > { %5287 = vmatprep.subr.bf16.mxu1 %v7306_v2  ;;  %5328 = vmatprep.subr.bf16.mxu0 %v7308_v32  ;;  %v8440_v31 = vld [vmem:[%s10408_s9 + $0x428] sm:$0xff]   ;;  %v8442_v32 = vld [vmem:[%s10408_s9 + $0x460] sm:$0xff]  }
0x1517   : > { %v8441_v2 = vld [vmem:[%s10408_s9 + $0x4a8] sm:$0xff]  }
0x1519   : > { %5288 = vmatpush1.bf16.msra.mxu1 %v7305_v60  ;;  %5329 = vmatpush1.bf16.msra.mxu0 %v7307_v36  ;;  %v8447_v60 = vld [vmem:[%s10408_s9 + $0x4d8] sm:$0xff]  }
0x151a   : > { %5289 = vmatprep.subr.bf16.mxu1 %v7290_v37  ;;  %5330 = vmatprep.subr.bf16.mxu0 %v7292_v38  ;;  %v8448_v36 = vld [vmem:[%s10408_s9 + $0x418] sm:$0xff]   ;;  %v8450_v38 = vld [vmem:[%s10408_s9 + $0x450] sm:$0xff]  }
0x151b   : > { %v8449_v37 = vld [vmem:[%s10408_s9 + $0x498] sm:$0xff]  }
0x151d   : > { %5290 = vmatpush1.bf16.msra.mxu1 %v7289_v42  ;;  %5331 = vmatpush1.bf16.msra.mxu0 %v7291_v55  ;;  %v8455_v42 = vld [vmem:[%s10408_s9 + $0x4c8] sm:$0xff]  }
0x151e   : > { %5365 = vmatprep.subr.bf16.mxu1 %v7342_v43  ;;  %5406 = vmatprep.subr.bf16.mxu0 %v7344_v44  ;;  %v8456_v55 = vld [vmem:[%s10408_s9 + $0x408] sm:$0xff]   ;;  %v8458_v44 = vld [vmem:[%s10408_s9 + $0x440] sm:$0xff]  }
0x151f   : > { %v8457_v43 = vld [vmem:[%s10408_s9 + $0x488] sm:$0xff]  }
0x1520   : > { %7349 = vmatmul.mubr.msk.bf16.vlgmr.msra.gmra.mxu1 %vm693_vm3, %v9795_v41  ;;  %7350 = vmatmul.mubr.msk.bf16.vlgmr.msra.gmra.mxu0 %vm693_vm3, %v9795_v41 }
0x1521   : > { %5366 = vmatpush1.bf16.msra.mxu1 %v7341_v50  ;;  %5407 = vmatpush1.bf16.msra.mxu0 %v7343_v51  ;;  %v8463_v50 = vld [vmem:[%s10408_s9 + $0x5f8] sm:$0xff]   ;;  %v10044_v51 = vld [vmem:[%s10407_s8 + $0x10] sm:$0xff] }
0x1522   : > { %5367 = vmatprep.subr.bf16.mxu1 %v7326_v46  ;;  %5408 = vmatprep.subr.bf16.mxu0 %v7328_v54  ;;  %v4711_v46 = vrot.slane %v10044_v51, %v8771_v20  ;;  %v4719_v54 = vrot.slane %v10044_v51, %v9215_v57  ;;  %v4715_v56 = vrot.slane %v10044_v51, %v8777_v22 }
0x1523   : > { %5389 = vmatprep.mubr.bf16.mxu1 %v8608_v12  ;;  %5430 = vmatprep.mubr.bf16.mxu0 %v8608_v12  ;;  %v8431_v12 = vld [vmem:[%s10408_s9 + $0x4f8] sm:$0xff]   ;;  %v4723_v61 = vrot.slane %v10044_v51, %v9223_v59 }
0x1525   : > { %5368 = vmatpush1.bf16.msra.mxu1 %v7325_v3  ;;  %5409 = vmatpush1.bf16.msra.mxu0 %v7327_v4 }
0x1526   : > { %5369 = vmatprep.subr.bf16.mxu1 %v7310_v5  ;;  %5410 = vmatprep.subr.bf16.mxu0 %v7312_v19 }
0x1529   : > { %5370 = vmatpush1.bf16.msra.mxu1 %v7309_v58  ;;  %5411 = vmatpush1.bf16.msra.mxu0 %v7311_v11 }
0x152a   : > { %5371 = vmatprep.subr.bf16.mxu1 %v7294_v13  ;;  %5412 = vmatprep.subr.bf16.mxu0 %v7296_v14 }
0x152d   : > { %5372 = vmatpush1.bf16.msra.mxu1 %v7293_v16  ;;  %5413 = vmatpush1.bf16.msra.mxu0 %v7295_v17 }
0x152e   : > { %7967 = vmatprep.subr.bf16.mxu1 %v8430_v23  ;;  %7989 = vmatprep.subr.bf16.mxu0 %v8431_v12 }
0x1530   : > { %7351 = vmatmul.mubr.msk.bf16.vlgmr.msra.gmra.mxu1 %vm693_vm3, %v9795_v41  ;;  %7352 = vmatmul.mubr.msk.bf16.vlgmr.msra.gmra.mxu0 %vm693_vm3, %v9795_v41  ;;  %v8439_v41 = vld [vmem:[%s10408_s9 + $0x4e8] sm:$0xff]  }
0x1531   : > { %7968 = vmatpush3.bf16.msra.mxu1 %v8432_v24  ;;  %7990 = vmatpush3.bf16.msra.mxu0 %v8433_v25  ;;  %v8464_v24 = vld [vmem:[%s10408_s9 + $0x538] sm:$0xff]  }
0x1532   : > { %7969 = vmatprep.subr.bf16.mxu1 %v8434_v26  ;;  %7991 = vmatprep.subr.bf16.mxu0 %v8435_v27  ;;  %v8465_v25 = vld [vmem:[%s10408_s9 + $0x5b8] sm:$0xff]  }
0x1535   : > { %7970 = vmatpush3.bf16.msra.mxu1 %v8436_v29  ;;  %7992 = vmatpush3.bf16.msra.mxu0 %v8437_v30  ;;  %v8466_v29 = vld [vmem:[%s10408_s9 + $0x570] sm:$0xff]  }
0x1536   : > { %7971 = vmatprep.subr.bf16.mxu1 %v8438_v10  ;;  %7993 = vmatprep.subr.bf16.mxu0 %v8439_v41  ;;  %v8467_v30 = vld [vmem:[%s10408_s9 + $0x5f0] sm:$0xff]  }
0x1537   : > { %v8468_v10 = vld [vmem:[%s10408_s9 + $0x530] sm:$0xff]  }
0x1538   : > { %v8469_v41 = vld [vmem:[%s10408_s9 + $0x5b0] sm:$0xff]  }
0x1539   : > { %7972 = vmatpush3.bf16.msra.mxu1 %v8440_v31  ;;  %7994 = vmatpush3.bf16.msra.mxu0 %v8441_v2  ;;  %v8470_v31 = vld [vmem:[%s10408_s9 + $0x568] sm:$0xff]  }
0x153a   : > { %7973 = vmatprep.subr.bf16.mxu1 %v8442_v32  ;;  %7995 = vmatprep.subr.bf16.mxu0 %v8443_v15  ;;  %v8471_v2 = vld [vmem:[%s10408_s9 + $0x5e8] sm:$0xff]   ;;  %v4731_v32 = vrot.slane %v10044_v51, %v9252_v53  ;;  %v4739_v15 = vrot.slane %v10044_v51, %v9255_v28 }
0x153d   : > { %7974 = vmatpush3.bf16.msra.mxu1 %v8444_v33  ;;  %7996 = vmatpush3.bf16.msra.mxu0 %v8445_v34  ;;  %v8472_v33 = vld [vmem:[%s10408_s9 + $0x528] sm:$0xff]  }
0x153e   : > { %7975 = vmatprep.subr.bf16.mxu1 %v8446_v35  ;;  %7997 = vmatprep.subr.bf16.mxu0 %v8447_v60  ;;  %v8473_v34 = vld [vmem:[%s10408_s9 + $0x5a8] sm:$0xff]  }
0x1541   : > { %7976 = vmatpush3.bf16.msra.mxu1 %v8448_v36  ;;  %7998 = vmatpush3.bf16.msra.mxu0 %v8449_v37  ;;  %v8474_v36 = vld [vmem:[%s10408_s9 + $0x560] sm:$0xff]  }
0x1542   : > { %7977 = vmatprep.subr.bf16.mxu1 %v8450_v38  ;;  %7999 = vmatprep.subr.bf16.mxu0 %v8451_v39  ;;  %v8475_v37 = vld [vmem:[%s10408_s9 + $0x5e0] sm:$0xff]  }
0x1545   : > { %7978 = vmatpush3.bf16.msra.mxu1 %v8452_v18  ;;  %8000 = vmatpush3.bf16.msra.mxu0 %v8453_v40 }
0x1546   : > { %7979 = vmatprep.subr.bf16.mxu1 %v8454_v21  ;;  %8001 = vmatprep.subr.bf16.mxu0 %v8455_v42  ;;  %v8476_v21 = vld [vmem:[%s10408_s9 + $0x520] sm:$0xff]  }
0x1547   : > { %v8477_v42 = vld [vmem:[%s10408_s9 + $0x5a0] sm:$0xff]  }
0x1549   : > { %7980 = vmatpush3.bf16.msra.mxu1 %v8456_v55  ;;  %8002 = vmatpush3.bf16.msra.mxu0 %v8457_v43 }
0x154a   : > { %7981 = vmatprep.subr.bf16.mxu1 %v8458_v44  ;;  %8003 = vmatprep.subr.bf16.mxu0 %v8459_v45  ;;  %v8478_v44 = vld [vmem:[%s10408_s9 + $0x558] sm:$0xff]  }
0x154b   : > { %v8479_v45 = vld [vmem:[%s10408_s9 + $0x5d8] sm:$0xff]  }
0x154d   : > { %7982 = vmatpush3.bf16.msra.mxu1 %v8460_v47  ;;  %8004 = vmatpush3.bf16.msra.mxu0 %v8461_v48 }
0x154e   : > { %8011 = vmatprep.subr.bf16.mxu1 %v8462_v49  ;;  %8033 = vmatprep.subr.bf16.mxu0 %v8463_v50 }
0x15c0   : > { %v5145_v62 = vpop.f32.mrf.mxu1  ;;  %v5186_v63 = vpop.f32.mrf.mxu0 }
0x15c1   : > { %v5146_v3 = vadd.f32 %v5145_v62, %v4711_v46  ;;  %v5187_v4 = vadd.f32 %v5186_v63, %v4719_v54  ;;  %v8482_v62 = vld [vmem:[%s10408_s9 + $0x550] sm:$0xff]  }
0x15c2   : > { %v5147_v5 = vpop.f32.mrf.mxu1  ;;  %v5188_v19 = vpop.f32.mrf.mxu0  ;;  %v8483_v63 = vld [vmem:[%s10408_s9 + $0x5d0] sm:$0xff]  }
0x15c3   : > { %v5148_v6 = vadd.f32 %v5147_v5, %v4715_v56  ;;  %v5189_v7 = vadd.f32 %v5188_v19, %v4723_v61  ;;  %v5439_v8 = vmax.f32 %v5146_v3, 0.0  ;;  %v5441_v9 = vmax.f32 %v5187_v4, 0.0  ;;  %v8480_v56 = vld [vmem:[%s10408_s9 + $0x518] sm:$0xff]   ;;  %v8484_v3 = vld [vmem:[%s10408_s9 + $0x510] sm:$0xff]  }
0x15c4   : > { %v5149_v58 = vpop.f32.mrf.mxu1  ;;  %v5190_v11 = vpop.f32.mrf.mxu0  ;;  %v8481_v61 = vld [vmem:[%s10408_s9 + $0x598] sm:$0xff]   ;;  %v8485_v4 = vld [vmem:[%s10408_s9 + $0x590] sm:$0xff]   ;;  %v4727_v5 = vrot.slane %v10044_v51, %v9298_v0  ;;  %v4735_v19 = vrot.slane %v10044_v51, %v9301_v1 }
0x15c5   : > { %v5440_v13 = vmax.f32 %v5148_v6, 0.0  ;;  %v5442_v14 = vmax.f32 %v5189_v7, 0.0  ;;  %v5455_v26 = vpack.c.bf16 %v5439_v8, %v5439_v8  ;;  %v5457_v27 = vpack.c.bf16 %v5441_v9, %v5441_v9  ;;  %v8486_v6 = vld [vmem:[%s10408_s9 + $0x548] sm:$0xff]   ;;  %v10137_v8 = vld [vmem:[%s10407_s8 + $0x18] sm:$0xff] }
0x15c6   : > { %v5150_v16 = vpop.f32.mrf.mxu1  ;;  %v5191_v17 = vpop.f32.mrf.mxu0  ;;  %v8487_v7 = vld [vmem:[%s10408_s9 + $0x5c8] sm:$0xff]   ;;  %v4747_v51 = vrot.slane %v10137_v8, %v8777_v22  ;;  %v4755_v9 = vrot.slane %v10137_v8, %v9223_v59  ;;  %v8490_v22 = vld [vmem:[%s10408_s9 + $0x540] sm:$0xff]  }
0x15c7   : > { %v5456_v23 = vpack.c.bf16 %v5440_v13, %v5440_v13  ;;  %v5458_v12 = vpack.c.bf16 %v5442_v14, %v5442_v14  ;;  %v8488_v58 = vld [vmem:[%s10408_s9 + $0x508] sm:$0xff]   ;;  %v8491_v59 = vld [vmem:[%s10408_s9 + $0x5c0] sm:$0xff]  }
0x15c8   : > { %v8489_v11 = vld [vmem:[%s10408_s9 + $0x588] sm:$0xff]  }
0x15c9   : > { %6536 = vmatprep.mubr.bf16.mxu1 %v5456_v23  ;;  %6576 = vmatprep.mubr.bf16.mxu0 %v5458_v12 }
0x15ca   : > { %6537 = vmatmul.mubr.bf16.vlgmr.msra.gmra.mxu1 %v5455_v26  ;;  %6577 = vmatmul.mubr.bf16.vlgmr.msra.gmra.mxu0 %v5457_v27  ;;  %v8492_v26 = vld [vmem:[%s10408_s9 + $0x500] sm:$0xff]  }
0x15cb   : > { %8012 = vmatpush3.bf16.msra.mxu1 %v8464_v24  ;;  %8034 = vmatpush3.bf16.msra.mxu0 %v8465_v25  ;;  %v8493_v27 = vld [vmem:[%s10408_s9 + $0x580] sm:$0xff]  }
0x15cc   : > { %8013 = vmatprep.subr.bf16.mxu1 %v8466_v29  ;;  %8035 = vmatprep.subr.bf16.mxu0 %v8467_v30 }
0x15cf   : > { %8014 = vmatpush3.bf16.msra.mxu1 %v8468_v10  ;;  %8036 = vmatpush3.bf16.msra.mxu0 %v8469_v41 }
0x15d0   : > { %v5227_v35 = vpop.f32.mrf.mxu1  ;;  %v5268_v60 = vpop.f32.mrf.mxu0  ;;  %8015 = vmatprep.subr.bf16.mxu1 %v8470_v31  ;;  %8037 = vmatprep.subr.bf16.mxu0 %v8471_v2  ;;  %v8494_v31 = vld [vmem:[%s10408_s9 + $0x678] sm:$0xff]  }
0x15d1   : > { %v5228_v13 = vadd.f32 %v5227_v35, %v4727_v5  ;;  %v5269_v14 = vadd.f32 %v5268_v60, %v4735_v19  ;;  %v8495_v2 = vld [vmem:[%s10408_s9 + $0x6f8] sm:$0xff]  }
0x15d2   : > { %v5229_v38 = vpop.f32.mrf.mxu1  ;;  %v5270_v39 = vpop.f32.mrf.mxu0  ;;  %v8496_v35 = vld [vmem:[%s10408_s9 + $0x638] sm:$0xff]  }
0x15d3   : > { %v5230_v18 = vadd.f32 %v5229_v38, %v4731_v32  ;;  %v5271_v40 = vadd.f32 %v5270_v39, %v4739_v15  ;;  %8016 = vmatpush3.bf16.msra.mxu1 %v8472_v33  ;;  %8038 = vmatpush3.bf16.msra.mxu0 %v8473_v34  ;;  %v5443_v29 = vmax.f32 %v5228_v13, 0.0  ;;  %v5445_v30 = vmax.f32 %v5269_v14, 0.0  ;;  %v8498_v39 = vld [vmem:[%s10408_s9 + $0x670] sm:$0xff]   ;;  %v8518_v14 = vld [vmem:[%s10408_s9 + $0x648] sm:$0xff]  }
0x15d4   : > { %v5231_v55 = vpop.f32.mrf.mxu1  ;;  %v5272_v43 = vpop.f32.mrf.mxu0  ;;  %8017 = vmatprep.subr.bf16.mxu1 %v8474_v36  ;;  %8039 = vmatprep.subr.bf16.mxu0 %v8475_v37  ;;  %v8497_v37 = vld [vmem:[%s10408_s9 + $0x6b8] sm:$0xff]   ;;  %v8517_v13 = vld [vmem:[%s10408_s9 + $0x690] sm:$0xff]  }
0x15d5   : > { %v5444_v47 = vmax.f32 %v5230_v18, 0.0  ;;  %v5446_v48 = vmax.f32 %v5271_v40, 0.0  ;;  %v5459_v60 = vpack.c.bf16 %v5443_v29, %v5443_v29  ;;  %v5461_v36 = vpack.c.bf16 %v5445_v30, %v5445_v30  ;;  %v8499_v18 = vld [vmem:[%s10408_s9 + $0x6f0] sm:$0xff]   ;;  %v8502_v55 = vld [vmem:[%s10408_s9 + $0x668] sm:$0xff]   ;;  %v8525_v30 = vld [vmem:[%s10408_s9 + $0x680] sm:$0xff]  }
0x15d6   : > { %v5232_v49 = vpop.f32.mrf.mxu1  ;;  %v5273_v50 = vpop.f32.mrf.mxu0  ;;  %v8503_v43 = vld [vmem:[%s10408_s9 + $0x6e8] sm:$0xff]  }
0x15d7   : > { %v5460_v46 = vpack.c.bf16 %v5444_v47, %v5444_v47  ;;  %v5462_v54 = vpack.c.bf16 %v5446_v48, %v5446_v48  ;;  %8018 = vmatpush3.bf16.msra.mxu1 %v8476_v21  ;;  %8040 = vmatpush3.bf16.msra.mxu0 %v8477_v42  ;;  %v8500_v21 = vld [vmem:[%s10408_s9 + $0x630] sm:$0xff]   ;;  %v8505_v48 = vld [vmem:[%s10408_s9 + $0x6a8] sm:$0xff]   ;;  %v8506_v49 = vld [vmem:[%s10408_s9 + $0x660] sm:$0xff]  }
0x15d8   : > { %8019 = vmatprep.subr.bf16.mxu1 %v8478_v44  ;;  %8041 = vmatprep.subr.bf16.mxu0 %v8479_v45  ;;  %v8501_v42 = vld [vmem:[%s10408_s9 + $0x6b0] sm:$0xff]   ;;  %v8504_v44 = vld [vmem:[%s10408_s9 + $0x628] sm:$0xff]   ;;  %v8507_v50 = vld [vmem:[%s10408_s9 + $0x6e0] sm:$0xff]  }
0x15d9   : > { %6616 = vmatprep.mubr.bf16.mxu1 %v5460_v46  ;;  %6656 = vmatprep.mubr.bf16.mxu0 %v5462_v54 }
0x15db   : > { %8020 = vmatpush3.bf16.msra.mxu1 %v8480_v56  ;;  %8042 = vmatpush3.bf16.msra.mxu0 %v8481_v61  ;;  %v8508_v56 = vld [vmem:[%s10408_s9 + $0x620] sm:$0xff]  }
0x15dc   : > { %8021 = vmatprep.subr.bf16.mxu1 %v8482_v62  ;;  %8043 = vmatprep.subr.bf16.mxu0 %v8483_v63  ;;  %v8509_v63 = vld [vmem:[%s10408_s9 + $0x6a0] sm:$0xff]  }
0x15df   : > { %8022 = vmatpush3.bf16.msra.mxu1 %v8484_v3  ;;  %8044 = vmatpush3.bf16.msra.mxu0 %v8485_v4  ;;  %v8510_v3 = vld [vmem:[%s10408_s9 + $0x658] sm:$0xff]  }
0x15e0   : > { %v10149_v16 = vpop.f32.mrf.mxu1  ;;  %v10151_v17 = vpop.f32.mrf.mxu0  ;;  %8023 = vmatprep.subr.bf16.mxu1 %v8486_v6  ;;  %8045 = vmatprep.subr.bf16.mxu0 %v8487_v7  ;;  %v8511_v4 = vld [vmem:[%s10408_s9 + $0x6d8] sm:$0xff]  }
0x15e1   : > { %v8512_v6 = vld [vmem:[%s10408_s9 + $0x618] sm:$0xff]  }
0x15e2   : > { %v5311_v23 = vpop.f32.mrf.mxu1  ;;  %v5352_v12 = vpop.f32.mrf.mxu0  ;;  %v8513_v7 = vld [vmem:[%s10408_s9 + $0x698] sm:$0xff]  }
0x15e3   : > { %v5312_v24 = vadd.f32 %v5311_v23, %v4747_v51  ;;  %v5353_v25 = vadd.f32 %v5352_v12, %v4755_v9  ;;  %8024 = vmatpush3.bf16.msra.mxu1 %v8488_v58  ;;  %8046 = vmatpush3.bf16.msra.mxu0 %v8489_v11  ;;  %v8514_v51 = vld [vmem:[%s10408_s9 + $0x650] sm:$0xff]   ;;  %v4743_v11 = vrot.slane %v10137_v8, %v8771_v20  ;;  %v8520_v12 = vld [vmem:[%s10408_s9 + $0x608] sm:$0xff]  }
0x15e4   : > { %v5313_v10 = vpop.f32.mrf.mxu1  ;;  %v5354_v41 = vpop.f32.mrf.mxu0  ;;  %8025 = vmatprep.subr.bf16.mxu1 %v8490_v22  ;;  %8047 = vmatprep.subr.bf16.mxu0 %v8491_v59  ;;  %v8515_v9 = vld [vmem:[%s10408_s9 + $0x6d0] sm:$0xff]   ;;  %v4751_v22 = vrot.slane %v10137_v8, %v9215_v57  ;;  %v8519_v59 = vld [vmem:[%s10408_s9 + $0x6c8] sm:$0xff]   ;;  %v4763_v20 = vrot.slane %v10137_v8, %v9252_v53  ;;  %v4771_v23 = vrot.slane %v10137_v8, %v9255_v28  ;;  %v8522_v53 = vld [vmem:[%s10408_s9 + $0x640] sm:$0xff]  }
0x15e5   : > { %v5448_v32 = vmax.f32 %v5312_v24, 0.0  ;;  %v5450_v15 = vmax.f32 %v5353_v25, 0.0  ;;  %v8516_v58 = vld [vmem:[%s10408_s9 + $0x610] sm:$0xff]   ;;  %v5310_v24 = vadd.f32 %v10149_v16, %v4743_v11  ;;  %v8521_v57 = vld [vmem:[%s10408_s9 + $0x688] sm:$0xff]   ;;  %v8523_v28 = vld [vmem:[%s10408_s9 + $0x6c0] sm:$0xff]  }
0x15e6   : > { %v5314_v33 = vpop.f32.mrf.mxu1  ;;  %v5355_v34 = vpop.f32.mrf.mxu0  ;;  %v5351_v25 = vadd.f32 %v10151_v17, %v4751_v22  ;;  %v8524_v16 = vld [vmem:[%s10408_s9 + $0x600] sm:$0xff]   ;;  %v8526_v17 = vld [vmem:[%s10408_s9 + $0x778] sm:$0xff]  }
0x15e7   : > { %8026 = vmatpush3.bf16.msra.mxu1 %v8492_v26  ;;  %8048 = vmatpush3.bf16.msra.mxu0 %v8493_v27  ;;  %v5464_v38 = vpack.c.bf16 %v5448_v32, %v5448_v32  ;;  %v5466_v40 = vpack.c.bf16 %v5450_v15, %v5450_v15  ;;  %v5447_v29 = vmax.f32 %v5310_v24, 0.0  ;;  %v8527_v41 = vld [vmem:[%s10408_s9 + $0x7f8] sm:$0xff]  }
0x15e8   : > { %8055 = vmatprep.subr.bf16.mxu1 %v8494_v31  ;;  %8077 = vmatprep.subr.bf16.mxu0 %v8495_v2  ;;  %v5449_v10 = vmax.f32 %v5351_v25, 0.0  ;;  %v8528_v32 = vld [vmem:[%s10408_s9 + $0x738] sm:$0xff]  }
0x15e9   : > { %v5463_v15 = vpack.c.bf16 %v5447_v29, %v5447_v29  ;;  %v8529_v33 = vld [vmem:[%s10408_s9 + $0x7b8] sm:$0xff]  }
0x15ea   : > { %6617 = vmatmul.mubr.bf16.vlgmr.msra.gmra.mxu1 %v5459_v60  ;;  %6657 = vmatmul.mubr.bf16.vlgmr.msra.gmra.mxu0 %v5461_v36  ;;  %v5465_v34 = vpack.c.bf16 %v5449_v10, %v5449_v10  ;;  %v8531_v36 = vld [vmem:[%s10408_s9 + $0x7f0] sm:$0xff]  }
0x15eb   : > { %8056 = vmatpush3.bf16.msra.mxu1 %v8496_v35  ;;  %6696 = vmatprep.mubr.bf16.mxu1 %v5464_v38  ;;  %v8530_v35 = vld [vmem:[%s10408_s9 + $0x770] sm:$0xff]  }
0x15ec   : > { %8078 = vmatpush3.bf16.msra.mxu0 %v8497_v37  ;;  %6736 = vmatprep.mubr.bf16.mxu0 %v5466_v40  ;;  %v8532_v38 = vld [vmem:[%s10408_s9 + $0x730] sm:$0xff]   ;;  %v8535_v40 = vld [vmem:[%s10408_s9 + $0x7e8] sm:$0xff]  }
0x15ed   : > { %8057 = vmatprep.subr.bf16.mxu1 %v8498_v39  ;;  %8079 = vmatprep.subr.bf16.mxu0 %v8499_v18  ;;  %v8533_v39 = vld [vmem:[%s10408_s9 + $0x7b0] sm:$0xff]   ;;  %v8534_v18 = vld [vmem:[%s10408_s9 + $0x768] sm:$0xff]  }
0x15ef   : > { %8058 = vmatpush3.bf16.msra.mxu1 %v8500_v21  ;;  %v8536_v21 = vld [vmem:[%s10408_s9 + $0x728] sm:$0xff]  }
0x15f0   : > { %8080 = vmatpush3.bf16.msra.mxu0 %v8501_v42  ;;  %v10198_v45 = vpop.f32.mrf.mxu1  ;;  %v10200_v47 = vpop.f32.mrf.mxu0  ;;  %8059 = vmatprep.subr.bf16.mxu1 %v8502_v55  ;;  %v8537_v42 = vld [vmem:[%s10408_s9 + $0x7a8] sm:$0xff]   ;;  %v8538_v55 = vld [vmem:[%s10408_s9 + $0x760] sm:$0xff]  }
0x15f1   : > { %8081 = vmatprep.subr.bf16.mxu0 %v8503_v43  ;;  %v8539_v43 = vld [vmem:[%s10408_s9 + $0x7e0] sm:$0xff]  }
0x15f2   : > { %v5393_v46 = vpop.f32.mrf.mxu1  ;;  %v5434_v54 = vpop.f32.mrf.mxu0 }
0x15f3   : > { %8060 = vmatpush3.bf16.msra.mxu1 %v8504_v44  ;;  %v5394_v26 = vadd.f32 %v5393_v46, %v4763_v20  ;;  %v5435_v27 = vadd.f32 %v5434_v54, %v4771_v23  ;;  %v8540_v44 = vld [vmem:[%s10408_s9 + $0x720] sm:$0xff]   ;;  %v8544_v46 = vld [vmem:[%s10408_s9 + $0x718] sm:$0xff]  }
0x15f4   : > { %8082 = vmatpush3.bf16.msra.mxu0 %v8505_v48  ;;  %v5395_v61 = vpop.f32.mrf.mxu1  ;;  %v5436_v62 = vpop.f32.mrf.mxu0  ;;  %8061 = vmatprep.subr.bf16.mxu1 %v8506_v49  ;;  %v8541_v48 = vld [vmem:[%s10408_s9 + $0x7a0] sm:$0xff]   ;;  %v8542_v49 = vld [vmem:[%s10408_s9 + $0x758] sm:$0xff]  }
0x15f5   : > { %8083 = vmatprep.subr.bf16.mxu0 %v8507_v50  ;;  %v5452_v31 = vmax.f32 %v5394_v26, 0.0  ;;  %v5454_v2 = vmax.f32 %v5435_v27, 0.0  ;;  %v8543_v50 = vld [vmem:[%s10408_s9 + $0x7d8] sm:$0xff]   ;;  %v8547_v61 = vld [vmem:[%s10408_s9 + $0x7d0] sm:$0xff]  }
0x15f6   : > { %v5396_v5 = vpop.f32.mrf.mxu1  ;;  %v5437_v19 = vpop.f32.mrf.mxu0  ;;  %v8545_v54 = vld [vmem:[%s10408_s9 + $0x798] sm:$0xff]   ;;  %v8548_v62 = vld [vmem:[%s10408_s9 + $0x710] sm:$0xff]  }
0x15f7   : > { %8062 = vmatpush3.bf16.msra.mxu1 %v8508_v56  ;;  %v5468_v60 = vpack.c.bf16 %v5452_v31, %v5452_v31  ;;  %v5470_v37 = vpack.c.bf16 %v5454_v2, %v5454_v2  ;;  %v8546_v56 = vld [vmem:[%s10408_s9 + $0x750] sm:$0xff]   ;;  %v4767_v5 = vrot.slane %v10137_v8, %v9301_v1  ;;  %v8551_v19 = vld [vmem:[%s10408_s9 + $0x7c8] sm:$0xff]   ;;  %v8554_v1 = vld [vmem:[%s10408_s9 + $0x740] sm:$0xff]  }
0x15f8   : > { %8084 = vmatpush3.bf16.msra.mxu0 %v8509_v63  ;;  %8063 = vmatprep.subr.bf16.mxu1 %v8510_v3  ;;  %v4759_v63 = vrot.slane %v10137_v8, %v9298_v0  ;;  %v8549_v3 = vld [vmem:[%s10408_s9 + $0x790] sm:$0xff]   ;;  %v8552_v0 = vld [vmem:[%s10408_s9 + $0x708] sm:$0xff]  }
0x15f9   : > { %8085 = vmatprep.subr.bf16.mxu0 %v8511_v4  ;;  %v8550_v4 = vld [vmem:[%s10408_s9 + $0x748] sm:$0xff]   ;;  %v5433_v8 = vadd.f32 %v10200_v47, %v4767_v5 }
0x15fb   : > { %8064 = vmatpush3.bf16.msra.mxu1 %v8512_v6  ;;  %v5392_v6 = vadd.f32 %v10198_v45, %v4759_v63  ;;  %v8556_v45 = vld [vmem:[%s10408_s9 + $0x700] sm:$0xff]   ;;  %v5453_v11 = vmax.f32 %v5433_v8, 0.0 }
0x15fc   : > { %8086 = vmatpush3.bf16.msra.mxu0 %v8513_v7  ;;  %8065 = vmatprep.subr.bf16.mxu1 %v8514_v51  ;;  %v8553_v7 = vld [vmem:[%s10408_s9 + $0x788] sm:$0xff]   ;;  %v8555_v51 = vld [vmem:[%s10408_s9 + $0x7c0] sm:$0xff]  }
0x15fd   : > { %8087 = vmatprep.subr.bf16.mxu0 %v8515_v9  ;;  %v5451_v9 = vmax.f32 %v5392_v6, 0.0 }
0x15ff   : > { %8066 = vmatpush3.bf16.msra.mxu1 %v8516_v58  ;;  %v8557_v58 = vld [vmem:[%s10408_s9 + $0x780] sm:$0xff]   ;;  %v5467_v47 = vpack.c.bf16 %v5451_v9, %v5451_v9 }
0x1600   : > { %8088 = vmatpush3.bf16.msra.mxu0 %v8517_v13  ;;  %8067 = vmatprep.subr.bf16.mxu1 %v8518_v14  ;;  %v5469_v13 = vpack.c.bf16 %v5453_v11, %v5453_v11 }
0x1601   : > { %8089 = vmatprep.subr.bf16.mxu0 %v8519_v59  ;;  %v7610_v59 = vld [vmem:[%s10409_s10 + $0x1] ss:$0 sm:$0xff] }
0x1603   : > { %8068 = vmatpush3.bf16.msra.mxu1 %v8520_v12 }
0x1604   : > { %8090 = vmatpush3.bf16.msra.mxu0 %v8521_v57  ;;  %8069 = vmatprep.subr.bf16.mxu1 %v8522_v53 }
0x1605   : > { %8091 = vmatprep.subr.bf16.mxu0 %v8523_v28 }
0x1607   : > { %8070 = vmatpush3.bf16.msra.mxu1 %v8524_v16 }
0x1608   : > { %8092 = vmatpush3.bf16.msra.mxu0 %v8525_v30  ;;  %8099 = vmatprep.subr.bf16.mxu1 %v8526_v17 }
0x1609   : > { %8121 = vmatprep.subr.bf16.mxu0 %v8527_v41 }
0x160a   : > { %6697 = vmatmul.mubr.bf16.vlgmr.msra.gmra.mxu1 %v5463_v15 }
0x160b   : > { %6737 = vmatmul.mubr.bf16.vlgmr.msra.gmra.mxu0 %v5465_v34  ;;  %8100 = vmatpush3.bf16.msra.mxu1 %v8528_v32 }
0x160c   : > { %6776 = vmatprep.mubr.bf16.mxu1 %v5468_v60  ;;  %8122 = vmatpush3.bf16.msra.mxu0 %v8529_v33 }
0x160d   : > { %6816 = vmatprep.mubr.bf16.mxu0 %v5470_v37  ;;  %8101 = vmatprep.subr.bf16.mxu1 %v8530_v35 }
0x160e   : > { %8123 = vmatprep.subr.bf16.mxu0 %v8531_v36 }
0x160f   : > { %8102 = vmatpush3.bf16.msra.mxu1 %v8532_v38 }
0x1610   : > { %8124 = vmatpush3.bf16.msra.mxu0 %v8533_v39  ;;  %8103 = vmatprep.subr.bf16.mxu1 %v8534_v18 }
0x1611   : > { %8125 = vmatprep.subr.bf16.mxu0 %v8535_v40 }
0x1613   : > { %8104 = vmatpush3.bf16.msra.mxu1 %v8536_v21 }
0x1614   : > { %8126 = vmatpush3.bf16.msra.mxu0 %v8537_v42  ;;  %8105 = vmatprep.subr.bf16.mxu1 %v8538_v55 }
0x1615   : > { %8127 = vmatprep.subr.bf16.mxu0 %v8539_v43 }
0x1617   : > { %8106 = vmatpush3.bf16.msra.mxu1 %v8540_v44 }
0x1618   : > { %8128 = vmatpush3.bf16.msra.mxu0 %v8541_v48  ;;  %8107 = vmatprep.subr.bf16.mxu1 %v8542_v49 }
0x1619   : > { %8129 = vmatprep.subr.bf16.mxu0 %v8543_v50 }
0x161b   : > { %8108 = vmatpush3.bf16.msra.mxu1 %v8544_v46 }
0x161c   : > { %8130 = vmatpush3.bf16.msra.mxu0 %v8545_v54  ;;  %8109 = vmatprep.subr.bf16.mxu1 %v8546_v56 }
0x161d   : > { %8131 = vmatprep.subr.bf16.mxu0 %v8547_v61 }
0x161f   : > { %8110 = vmatpush3.bf16.msra.mxu1 %v8548_v62 }
0x1620   : > { %8132 = vmatpush3.bf16.msra.mxu0 %v8549_v3  ;;  %8111 = vmatprep.subr.bf16.mxu1 %v8550_v4 }
0x1621   : > { %8133 = vmatprep.subr.bf16.mxu0 %v8551_v19 }
0x1623   : > { %8112 = vmatpush3.bf16.msra.mxu1 %v8552_v0 }
0x1624   : > { %8134 = vmatpush3.bf16.msra.mxu0 %v8553_v7  ;;  %8113 = vmatprep.subr.bf16.mxu1 %v8554_v1 }
0x1625   : > { %8135 = vmatprep.subr.bf16.mxu0 %v8555_v51 }
0x1627   : > { %8114 = vmatpush3.bf16.msra.mxu1 %v8556_v45 }
0x1628   : > { %8136 = vmatpush3.bf16.msra.mxu0 %v8557_v58 }
0x162a   : > { %6777 = vmatmul.mubr.bf16.vlgmr.msra.gmra.mxu1 %v5467_v47  ;;  %v7742_v47 = vld [vmem:[%s10413_s14 + $0x1] ss:$0 sm:$0xff] }
0x162b   : > { %6817 = vmatmul.mubr.bf16.vlgmr.msra.gmra.mxu0 %v5469_v13 }
0x168a   : > { %v7983_v14 = vpop.f32.mrf.mxu1  ;;  %v8005_v22 = vpop.f32.mrf.mxu0 }
0x168c   : > { %v7984_v20 = vpop.f32.mrf.mxu1  ;;  %v8006_v23 = vpop.f32.mrf.mxu0 }
0x168d   : > { %v7985_v12 = vadd.f32 %v7984_v20, %v7983_v14  ;;  %v8007_v24 = vadd.f32 %v8006_v23, %v8005_v22  ;;  %v7743_v14 = vld [vmem:[%s10414_s15] ss:$0 sm:$0xff] }
0x168e   : > { %v7986_v57 = vpop.f32.mrf.mxu1  ;;  %v8008_v53 = vpop.f32.mrf.mxu0  ;;  %v7744_v23 = vld [vmem:[#allocation2] ss:$0 sm:$0xff] }
0x168f   : > { %v6539_v25 = vadd.f32 %v7985_v12, %v7610_v59 }
0x1690   : > { %v7987_v28 = vpop.f32.mrf.mxu1  ;;  %v8009_v26 = vpop.f32.mrf.mxu0 }
0x1691   : > { %v6579_v27 = vadd.f32 %v8007_v24, %v6539_v25 }
0x16aa   : > { %v8027_v16 = vpop.f32.mrf.mxu1  ;;  %v8049_v29 = vpop.f32.mrf.mxu0 }
0x16ac   : > { %v8028_v30 = vpop.f32.mrf.mxu1  ;;  %v8050_v17 = vpop.f32.mrf.mxu0 }
0x16ad   : > { %v8029_v38 = vadd.f32 %v8028_v30, %v8027_v16  ;;  %v8051_v18 = vadd.f32 %v8050_v17, %v8049_v29 }
0x16ae   : > { %v8030_v10 = vpop.f32.mrf.mxu1  ;;  %v8052_v41 = vpop.f32.mrf.mxu0 }
0x16af   : > { %v6619_v39 = vadd.f32 %v8029_v38, %v6579_v27 }
0x16b0   : > { %v8031_v31 = vpop.f32.mrf.mxu1  ;;  %v8053_v2 = vpop.f32.mrf.mxu0 }
0x16b1   : > { %v6659_v21 = vadd.f32 %v8051_v18, %v6619_v39 }
0x16ca   : > { %v8071_v32 = vpop.f32.mrf.mxu1 }
0x16cb   : > { %v8093_v15 = vpop.f32.mrf.mxu0 }
0x16cc   : > { %v8072_v33 = vpop.f32.mrf.mxu1 }
0x16cd   : > { %v8094_v34 = vpop.f32.mrf.mxu0  ;;  %v8073_v40 = vadd.f32 %v8072_v33, %v8071_v32 }
0x16ce   : > { %v8074_v35 = vpop.f32.mrf.mxu1  ;;  %v8095_v43 = vadd.f32 %v8094_v34, %v8093_v15 }
0x16cf   : > { %v8096_v60 = vpop.f32.mrf.mxu0  ;;  %v6699_v42 = vadd.f32 %v8073_v40, %v6659_v21 }
0x16d0   : > { %v8075_v36 = vpop.f32.mrf.mxu1 }
0x16d1   : > { %v8097_v37 = vpop.f32.mrf.mxu0  ;;  %v6739_v49 = vadd.f32 %v8095_v43, %v6699_v42 }
0x16ea   : > { %v8115_v55 = vpop.f32.mrf.mxu1 }
0x16eb   : > { %v8137_v44 = vpop.f32.mrf.mxu0 }
0x16ec   : > { %v8116_v48 = vpop.f32.mrf.mxu1 }
0x16ed   : > { %v8117_v50 = vadd.f32 %v8116_v48, %v8115_v55  ;;  %v8138_v46 = vpop.f32.mrf.mxu0 }
0x16ee   : > { %v8118_v54 = vpop.f32.mrf.mxu1  ;;  %v8139_v61 = vadd.f32 %v8138_v46, %v8137_v44 }
0x16ef   : > { %v6779_v56 = vadd.f32 %v8117_v50, %v6739_v49  ;;  %v8140_v62 = vpop.f32.mrf.mxu0 }
0x16f0   : > { %v8119_v63 = vpop.f32.mrf.mxu1 }
0x16f1   : > { %v6819_v3 = vadd.f32 %v8139_v61, %v6779_v56  ;;  %v8141_v4 = vpop.f32.mrf.mxu0 }
0x16f3   : > { %v6824_v5 = vadd.f32 %v6819_v3, %v9791_v52  ;;  %v7741_v52 = vld [vmem:[%s10412_s13 + $0x1] ss:$0 sm:$0xff] }
0x16f5   : > { %v6829_v19 = vsel %vm693_vm3, %v6824_v5, 0.0 }
0x16f6   : > { %6830 = vadd.xlane.f32.xlu0 %v6829_v19 }
0x177f   : > { %v6831_v0 = vpop.xlane.xlu0 %6830 }
0x1780   : > { %v6832_v6 = vmul.f32 0.015625, %v6831_v0 }
0x1782   : > { %v6833_v7 = vsub.f32 %v6824_v5, %v6832_v6 }
0x1784   : > { %v6834_v1 = vmul.f32 %v6833_v7, %v6833_v7 }
0x1786   : > { %v6835_v8 = vsel %vm693_vm3, %v6834_v1, 0.0 }
0x1787   : > { %6836 = vadd.xlane.f32.xlu1 %v6835_v8 }
0x1810   : > { %v6837_v51 = vpop.xlane.xlu1 %6836 }
0x1811   : > { %v6838_v45 = vmul.f32 0.015625, %v6837_v51 }
0x1813   : > { %v6839_v9 = vadd.f32 1e-05, %v6838_v45 }
0x1815   : > { %8596 = vrsqrt.f32 %v6839_v9 }
0x1822   : > { %v8597_v58 = vpop.eup %8596 }
0x1823   : > { %v6841_v11 = vmul.f32 %v8597_v58, %v6833_v7 }
0x1825   : > { %v6848_v13 = vmul.f32 %v7741_v52, %v6841_v11 }
0x1827   : > { %v6855_v22 = vadd.f32 %v7742_v47, %v6848_v13 }
0x1829   : > { %v6863_v59 = vmul.f32 %v7743_v14, %v6855_v22 }
0x182b   : > { %v6865_v20 = vsel %vm6864_vm8, %v6863_v59, 0.0 }
0x182c   : > { %6866 = vadd.xlane.f32.xlu0 %v6865_v20 }
0x18b5   : > { %v6867_v12 = vpop.xlane.xlu0 %6866 }
0x18b6   : > { %v6875_v24 = vadd.f32 %v7744_v23, %v6867_v12 }
0x18b8   : > { %6877 = vst.msk [vmem:[%s543_s24 - $0x7] sm:$0x80] %vm6876_vm9, %v6875_v24 }
0x18b9 PF: > { %s29_s26 = sadd.s32 1, %s8604_s26  }
0x18ba   : > { %p26_p4 = scmp.ge.s32.totalorder %s29_s26, 4  }
0x18bc   :  { %28 = sbr.rel (!%p26_p4) target bundleno = 3 (0x3), region = 130 }

</bundles_post_ra>
